<compile_context>
chip_gen: v5e
topology: v5e:2x2
jax: 0.10.0
libtpu: 0.0.40
codegen_flags: <defaults>
</compile_context>

<pallas_src>
import functools

import jax
import jax.numpy as jnp
from jax.experimental import pallas as pl
from jax.experimental.pallas import tpu as pltpu


_TM_TARGET = 512                      # rows per M-tile (matmul / normalize)
_VMEM_LIMIT = 32 * 1024 * 1024        # explicit scoped-VMEM budget (fits v5e..v7x)


# ---------------------------------------------------------------------------
# Pallas kernels
# ---------------------------------------------------------------------------
def _matmul_leaky_kernel(p_ref, w_ref, o_ref):
    # conv-as-matmul (bf16 in, f32 acc) + LeakyReLU(0.2), bf16 out.
    y = jnp.dot(p_ref[...], w_ref[...], preferred_element_type=jnp.float32)
    o_ref[...] = jnp.where(y > 0, y, 0.2 * y).astype(o_ref.dtype)


def _matmul_stats_kernel(p_ref, w_ref, y_ref, s_ref, ss_ref):
    # conv-as-matmul; also accumulate per-channel sum / sum-of-squares across
    # the (arbitrary) M grid axis into resident (1, Cout) outputs.
    y = jnp.dot(p_ref[...], w_ref[...], preferred_element_type=jnp.float32)
    y_ref[...] = y

    @pl.when(pl.program_id(0) == 0)
    def _():
        s_ref[...] = jnp.zeros_like(s_ref)
        ss_ref[...] = jnp.zeros_like(ss_ref)

    s_ref[...] += jnp.sum(y, axis=0, keepdims=True)
    ss_ref[...] += jnp.sum(y * y, axis=0, keepdims=True)


def _bn_leaky_kernel(y_ref, sc_ref, sh_ref, o_ref):
    # apply precomputed BN scale/shift + LeakyReLU(0.2); bf16 activation out.
    z = y_ref[...] * sc_ref[...] + sh_ref[...]
    o_ref[...] = jnp.where(z > 0, z, 0.2 * z).astype(o_ref.dtype)


def _bn_leaky_final_kernel(y_ref, sc_ref, sh_ref, w5_ref, o_ref):
    # fused layer-4 BN+LeakyReLU finalize and layer-5 4x4 conv (Cout=1) as a
    # VPU multiply-and-reduce per sample (avoids a 1-lane MXU pass).
    z = y_ref[...] * sc_ref[...] + sh_ref[...]        # (TB, 16, C)
    a = jnp.where(z > 0, z, 0.2 * z)
    prod = a * w5_ref[...]                            # (TB, 16, C) * (1, 16, C)
    s = jnp.sum(prod, axis=2)                         # (TB, 16)
    o_ref[...] = jnp.sum(s, axis=1, keepdims=True)    # (TB, 1)


# ---------------------------------------------------------------------------
# pallas_call wrappers (M-tiled grids)
# ---------------------------------------------------------------------------
def _pad_rows(x, mult):
    m = x.shape[0]
    mp = -(-m // mult) * mult
    if mp != m:
        x = jnp.pad(x, ((0, mp - m),) + ((0, 0),) * (x.ndim - 1))
    return x, mp


def _matmul_leaky(pmat, wmat):
    m, k = pmat.shape
    cout = wmat.shape[1]
    tm = min(_TM_TARGET, m)
    pmat, mp = _pad_rows(pmat, tm)
    out = pl.pallas_call(
        _matmul_leaky_kernel,
        out_shape=jax.ShapeDtypeStruct((mp, cout), jnp.bfloat16),
        grid=(mp // tm,),
        in_specs=[pl.BlockSpec((tm, k), lambda i: (i, 0)),
                  pl.BlockSpec((k, cout), lambda i: (0, 0))],
        out_specs=pl.BlockSpec((tm, cout), lambda i: (i, 0)),
        compiler_params=pltpu.CompilerParams(
            dimension_semantics=("parallel",),
            vmem_limit_bytes=_VMEM_LIMIT),
    )(pmat, wmat)
    return out[:m]


def _matmul_stats(pmat, wmat):
    m, k = pmat.shape
    cout = wmat.shape[1]
    tm = min(_TM_TARGET, m)
    # zero-padded rows contribute 0 to sum / sumsq, so stats stay exact as
    # long as we divide by the true M later.
    pmat, mp = _pad_rows(pmat, tm)
    y, s, ss = pl.pallas_call(
        _matmul_stats_kernel,
        out_shape=(jax.ShapeDtypeStruct((mp, cout), jnp.float32),
                   jax.ShapeDtypeStruct((1, cout), jnp.float32),
                   jax.ShapeDtypeStruct((1, cout), jnp.float32)),
        grid=(mp // tm,),
        in_specs=[pl.BlockSpec((tm, k), lambda i: (i, 0)),
                  pl.BlockSpec((k, cout), lambda i: (0, 0))],
        out_specs=(pl.BlockSpec((tm, cout), lambda i: (i, 0)),
                   pl.BlockSpec((1, cout), lambda i: (0, 0)),
                   pl.BlockSpec((1, cout), lambda i: (0, 0))),
        compiler_params=pltpu.CompilerParams(
            dimension_semantics=("arbitrary",),   # stats accumulate across M
            vmem_limit_bytes=_VMEM_LIMIT),
    )(pmat, wmat)
    return y[:m], s, ss


def _bn_apply(y, scale, shift):
    m, cout = y.shape
    tm = min(_TM_TARGET, m)
    y, mp = _pad_rows(y, tm)
    out = pl.pallas_call(
        _bn_leaky_kernel,
        out_shape=jax.ShapeDtypeStruct((mp, cout), jnp.bfloat16),
        grid=(mp // tm,),
        in_specs=[pl.BlockSpec((tm, cout), lambda i: (i, 0)),
                  pl.BlockSpec((1, cout), lambda i: (0, 0)),
                  pl.BlockSpec((1, cout), lambda i: (0, 0))],
        out_specs=pl.BlockSpec((tm, cout), lambda i: (i, 0)),
        compiler_params=pltpu.CompilerParams(
            dimension_semantics=("parallel",),
            vmem_limit_bytes=_VMEM_LIMIT),
    )(y, scale, shift)
    return out[:m]


# ---------------------------------------------------------------------------
# Conv glue (im2col + weight flatten) in plain JAX
# ---------------------------------------------------------------------------
def _im2col(x_nhwc, kh, kw, stride, pad):
    n, h, w, cin = x_nhwc.shape
    xp = jnp.pad(x_nhwc, ((0, 0), (pad, pad), (pad, pad), (0, 0)))
    ho = (h + 2 * pad - kh) // stride + 1
    wo = (w + 2 * pad - kw) // stride + 1
    cols = []
    for ih in range(kh):
        for iw in range(kw):
            cols.append(
                xp[:, ih:ih + stride * ho:stride, iw:iw + stride * wo:stride, :])
    pmat = jnp.concatenate(cols, axis=-1).reshape(n * ho * wo, kh * kw * cin)
    return pmat, ho, wo


def _flatten_weight(w_oihw, dtype=jnp.bfloat16):
    cout, cin, kh, kw = w_oihw.shape
    # (Cout, Cin, Kh, Kw) -> (Kh, Kw, Cin, Cout) -> (Kh*Kw*Cin, Cout)
    return jnp.transpose(w_oihw, (2, 3, 1, 0)).reshape(kh * kw * cin, cout).astype(dtype)


def _bn_scale_shift(s, ss, m_true, gamma, beta, eps=1e-5):
    cout = s.shape[-1]
    mean = s / m_true
    var = ss / m_true - mean * mean            # biased variance (PyTorch train)
    scale = gamma.reshape(1, cout) * jax.lax.rsqrt(var + eps)
    shift = beta.reshape(1, cout) - mean * scale
    return scale, shift


# ---------------------------------------------------------------------------
# Layers
# ---------------------------------------------------------------------------
def _conv_leaky_layer(x_nhwc, w):
    n = x_nhwc.shape[0]
    cout = w.shape[0]
    pmat, ho, wo = _im2col(x_nhwc, 4, 4, 2, 1)
    act = _matmul_leaky(pmat.astype(jnp.bfloat16), _flatten_weight(w))
    return act.reshape(n, ho, wo, cout)


def _conv_bn_leaky_layer(x_nhwc, w, gamma, beta):
    n = x_nhwc.shape[0]
    cout = w.shape[0]
    pmat, ho, wo = _im2col(x_nhwc, 4, 4, 2, 1)
    y, s, ss = _matmul_stats(pmat.astype(jnp.bfloat16), _flatten_weight(w))
    scale, shift = _bn_scale_shift(s, ss, n * ho * wo, gamma, beta)
    act = _bn_apply(y, scale, shift)
    return act.reshape(n, ho, wo, cout)


def _conv_bn_leaky_final(x_nhwc, w4, gamma, beta, w5):
    # layer 4 (conv + BN + leaky) with its finalize fused with layer 5
    # (4x4, stride 1, pad 0, Cout=1) as an in-kernel VPU dot-and-reduce.
    n = x_nhwc.shape[0]
    c4 = w4.shape[0]
    pmat, ho, wo = _im2col(x_nhwc, 4, 4, 2, 1)      # ho = wo = 4
    sp = ho * wo                                     # 16
    y, s, ss = _matmul_stats(pmat.astype(jnp.bfloat16), _flatten_weight(w4))
    scale, shift = _bn_scale_shift(s, ss, n * sp, gamma, beta)

    # (1, C4, 4, 4) -> (1, 4, 4, C4) -> (1, 16, C4); row index = kh*4 + kw,
    # matching the (n, ho, wo) row ordering of y.
    w5_flat = jnp.transpose(w5, (0, 2, 3, 1)).reshape(1, sp, c4).astype(jnp.float32)

    tb = min(n, 64)
    y3d = y.reshape(n, sp, c4)
    y3d, np_ = _pad_rows(y3d, tb)
    out = pl.pallas_call(
        _bn_leaky_final_kernel,
        out_shape=jax.ShapeDtypeStruct((np_, 1), jnp.float32),
        grid=(np_ // tb,),
        in_specs=[pl.BlockSpec((tb, sp, c4), lambda i: (i, 0, 0)),
                  pl.BlockSpec((1, 1, c4), lambda i: (0, 0, 0)),
                  pl.BlockSpec((1, 1, c4), lambda i: (0, 0, 0)),
                  pl.BlockSpec((1, sp, c4), lambda i: (0, 0, 0))],
        out_specs=pl.BlockSpec((tb, 1), lambda i: (i, 0)),
        compiler_params=pltpu.CompilerParams(
            dimension_semantics=("parallel",),
            vmem_limit_bytes=_VMEM_LIMIT),
    )(y3d, scale.reshape(1, 1, c4), shift.reshape(1, 1, c4), w5_flat)
    return out.reshape(-1)[:n]


# ---------------------------------------------------------------------------
# Parameter init (matches weights_init: Conv ~ N(0,0.02), BN gamma ~ N(1,0.02),
# BN beta = 0).  Deterministic via PRNGKey.
# ---------------------------------------------------------------------------
def init_params(key, nc, ndf):
    ks = jax.random.split(key, 8)
    return {
        "w1": 0.02 * jax.random.normal(ks[0], (ndf, nc, 4, 4), jnp.float32),
        "w2": 0.02 * jax.random.normal(ks[1], (ndf * 2, ndf, 4, 4), jnp.float32),
        "w3": 0.02 * jax.random.normal(ks[2], (ndf * 4, ndf * 2, 4, 4), jnp.float32),
        "w4": 0.02 * jax.random.normal(ks[3], (ndf * 8, ndf * 4, 4, 4), jnp.float32),
        "w5": 0.02 * jax.random.normal(ks[4], (1, ndf * 8, 4, 4), jnp.float32),
        "g2": 1.0 + 0.02 * jax.random.normal(ks[5], (ndf * 2,), jnp.float32),
        "b2": jnp.zeros((ndf * 2,), jnp.float32),
        "g3": 1.0 + 0.02 * jax.random.normal(ks[6], (ndf * 4,), jnp.float32),
        "b3": jnp.zeros((ndf * 4,), jnp.float32),
        "g4": 1.0 + 0.02 * jax.random.normal(ks[7], (ndf * 8,), jnp.float32),
        "b4": jnp.zeros((ndf * 8,), jnp.float32),
    }


# ---------------------------------------------------------------------------
# Forward pass (exact DCGAN Discriminator semantics; no sigmoid in the spec)
# ---------------------------------------------------------------------------
@jax.jit
def discriminator_forward(x_nchw, params):
    x = jnp.transpose(x_nchw, (0, 2, 3, 1)).astype(jnp.bfloat16)   # NCHW -> NHWC
    x = _conv_leaky_layer(x, params["w1"])
    x = _conv_bn_leaky_layer(x, params["w2"], params["g2"], params["b2"])
    x = _conv_bn_leaky_layer(x, params["w3"], params["g3"], params["b3"])
    out = _conv_bn_leaky_final(x, params["w4"], params["g4"], params["b4"],
                               params["w5"])
    # equivalent to output.view(-1, 1).squeeze(1)
    return out


if __name__ == "__main__":
    key = jax.random.PRNGKey(0)
    k_x, k_p = jax.random.split(key)

    # Small config consistent with the module: nc=1, ndf=8 (ndf*8 = 64);
    # spatial must be 64 so the final 4x4/stride-1/pad-0 conv yields 1x1.
    N, nc, ndf, H, W = 2, 1, 8, 64, 64
    x = jax.random.normal(k_x, (N, nc, H, W), jnp.float32)
    params = init_params(k_p, nc, ndf)

    out = discriminator_forward(x, params)
    out = jax.block_until_ready(out)
    assert out.shape == (N,), out.shape
    assert bool(jnp.all(jnp.isfinite(out)))
    print("KERNEL_OK")
</pallas_src>

<mosaic_0001>
module attributes {stable_mosaic.version = 11 : i64} {
  func.func @_matmul_leaky_kernel(%arg0: i32, %arg1: memref<512x16xbf16, #tpu.memory_space<vmem>>, %arg2: memref<16x8xbf16, #tpu.memory_space<vmem>>, %arg3: memref<512x8xbf16, #tpu.memory_space<vmem>>) attributes {dimension_semantics = [#tpu.dimension_semantics<parallel>], iteration_bounds = array<i64: 4>, scalar_prefetch = 0 : i64, scratch_operands = 0 : i64, tpu.core_type = #tpu.core_type<tc>, window_params = [{transform_indices = @transform_0, window_bounds = array<i64: 512, 16>}, {pipeline_mode = #tpu.pipeline_mode<synchronous>, transform_indices = @transform_1, window_bounds = array<i64: 16, 8>}, {transform_indices = @transform_2, window_bounds = array<i64: 512, 8>}]} {
    %c0 = arith.constant 0 : index
    %c0_0 = arith.constant 0 : index
    %0 = vector.load %arg1[%c0, %c0_0] : memref<512x16xbf16, #tpu.memory_space<vmem>>, vector<512x16xbf16>
    %c0_1 = arith.constant 0 : index
    %c0_2 = arith.constant 0 : index
    %1 = vector.load %arg2[%c0_1, %c0_2] : memref<16x8xbf16, #tpu.memory_space<vmem>>, vector<16x8xbf16>
    %cst = arith.constant dense<0.000000e+00> : vector<512x8xf32>
    %2 = tpu.matmul %0, %1, %cst {dimension_numbers = #tpu.dot_dimension_numbers<[1], [0], [0], [1], [0, 0, 1, 1], [], []>} : vector<512x16xbf16>, vector<16x8xbf16>, vector<512x8xf32> -> vector<512x8xf32>
    %cst_3 = arith.constant 0.000000e+00 : f32
    %3 = vector.broadcast %cst_3 : f32 to vector<512x8xf32>
    %4 = arith.cmpf ogt, %2, %3 : vector<512x8xf32>
    %cst_4 = arith.constant 2.000000e-01 : f32
    %5 = vector.broadcast %cst_4 : f32 to vector<512x8xf32>
    %6 = arith.mulf %5, %2 : vector<512x8xf32>
    %7 = arith.select %4, %2, %6 : vector<512x8xi1>, vector<512x8xf32>
    %8 = arith.truncf %7 : vector<512x8xf32> to vector<512x8xbf16>
    %c0_5 = arith.constant 0 : index
    %c0_6 = arith.constant 0 : index
    %9 = vector.load %arg3[%c0_5, %c0_6] : memref<512x8xbf16, #tpu.memory_space<vmem>>, vector<512x8xbf16>
    tpu.vector_store %arg3[%c0_5, %c0_6], %8 {strides = array<i32>} : memref<512x8xbf16, #tpu.memory_space<vmem>>, vector<512x8xbf16>,
    return
  }
  func.func @transform_0(%arg0: i32) -> (i32, i32) {
    %c0_i32 = arith.constant 0 : i32
    %c0_i32_0 = arith.constant 0 : i32
    return %arg0, %c0_i32 : i32, i32
  }
  func.func @transform_1(%arg0: i32) -> (i32, i32) {
    %c0_i32 = arith.constant 0 : i32
    %c0_i32_0 = arith.constant 0 : i32
    %c0_i32_1 = arith.constant 0 : i32
    return %c0_i32, %c0_i32_0 : i32, i32
  }
  func.func @transform_2(%arg0: i32) -> (i32, i32) {
    %c0_i32 = arith.constant 0 : i32
    %c0_i32_0 = arith.constant 0 : i32
    return %arg0, %c0_i32 : i32, i32
  }
}

module attributes {stable_mosaic.version = 11 : i64} {
  func.func @_matmul_stats_kernel(%arg0: i32, %arg1: memref<512x128xbf16, #tpu.memory_space<vmem>>, %arg2: memref<128x16xbf16, #tpu.memory_space<vmem>>, %arg3: memref<512x16xf32, #tpu.memory_space<vmem>>, %arg4: memref<1x16xf32, #tpu.memory_space<vmem>>, %arg5: memref<1x16xf32, #tpu.memory_space<vmem>>) attributes {dimension_semantics = [#tpu.dimension_semantics<arbitrary>], iteration_bounds = array<i64: 1>, scalar_prefetch = 0 : i64, scratch_operands = 0 : i64, tpu.core_type = #tpu.core_type<tc>, window_params = [{transform_indices = @transform_0, window_bounds = array<i64: 512, 128>}, {pipeline_mode = #tpu.pipeline_mode<synchronous>, transform_indices = @transform_1, window_bounds = array<i64: 128, 16>}, {transform_indices = @transform_2, window_bounds = array<i64: 512, 16>}, {pipeline_mode = #tpu.pipeline_mode<synchronous>, transform_indices = @transform_3, window_bounds = array<i64: 1, 16>}, {pipeline_mode = #tpu.pipeline_mode<synchronous>, transform_indices = @transform_4, window_bounds = array<i64: 1, 16>}]} {
    %c0 = arith.constant 0 : index
    %c0_0 = arith.constant 0 : index
    %0 = vector.load %arg1[%c0, %c0_0] : memref<512x128xbf16, #tpu.memory_space<vmem>>, vector<512x128xbf16>
    %c0_1 = arith.constant 0 : index
    %c0_2 = arith.constant 0 : index
    %1 = vector.load %arg2[%c0_1, %c0_2] : memref<128x16xbf16, #tpu.memory_space<vmem>>, vector<128x16xbf16>
    %cst = arith.constant dense<0.000000e+00> : vector<512x16xf32>
    %2 = tpu.matmul %0, %1, %cst {dimension_numbers = #tpu.dot_dimension_numbers<[1], [0], [0], [1], [0, 0, 1, 1], [], []>} : vector<512x128xbf16>, vector<128x16xbf16>, vector<512x16xf32> -> vector<512x16xf32>
    %c0_3 = arith.constant 0 : index
    %c0_4 = arith.constant 0 : index
    %3 = vector.load %arg3[%c0_3, %c0_4] : memref<512x16xf32, #tpu.memory_space<vmem>>, vector<512x16xf32>
    tpu.vector_store %arg3[%c0_3, %c0_4], %2 {strides = array<i32>} : memref<512x16xf32, #tpu.memory_space<vmem>>, vector<512x16xf32>,
    %c0_i32 = arith.constant 0 : i32
    %4 = arith.cmpi eq, %arg0, %c0_i32 : i32
    %5 = arith.extui %4 : i1 to i32
    %c0_i32_5 = arith.constant 0 : i32
    %6 = arith.cmpi ne, %5, %c0_i32_5 : i32
    scf.if %6 {
      %cst_16 = arith.constant 0.000000e+00 : f32
      %18 = vector.broadcast %cst_16 : f32 to vector<1x16xf32>
      %c0_17 = arith.constant 0 : index
      %c0_18 = arith.constant 0 : index
      %19 = vector.load %arg4[%c0_17, %c0_18] : memref<1x16xf32, #tpu.memory_space<vmem>>, vector<1x16xf32>
      tpu.vector_store %arg4[%c0_17, %c0_18], %18 {strides = array<i32>} : memref<1x16xf32, #tpu.memory_space<vmem>>, vector<1x16xf32>,
      %cst_19 = arith.constant 0.000000e+00 : f32
      %20 = vector.broadcast %cst_19 : f32 to vector<1x16xf32>
      %c0_20 = arith.constant 0 : index
      %c0_21 = arith.constant 0 : index
      %21 = vector.load %arg5[%c0_20, %c0_21] : memref<1x16xf32, #tpu.memory_space<vmem>>, vector<1x16xf32>
      tpu.vector_store %arg5[%c0_20, %c0_21], %20 {strides = array<i32>} : memref<1x16xf32, #tpu.memory_space<vmem>>, vector<1x16xf32>,
    } else {
    }
    %c0_6 = arith.constant 0 : index
    %c0_7 = arith.constant 0 : index
    %7 = vector.load %arg4[%c0_6, %c0_7] : memref<1x16xf32, #tpu.memory_space<vmem>>, vector<1x16xf32>
    %cst_8 = arith.constant dense<0.000000e+00> : vector<16xf32>
    %8 = vector.multi_reduction <add>, %2, %cst_8 [0] : vector<512x16xf32> to vector<16xf32>
    %9 = vector.shape_cast %8 : vector<16xf32> to vector<1x16xf32>
    %10 = arith.addf %7, %9 : vector<1x16xf32>
    %c0_9 = arith.constant 0 : index
    %c0_10 = arith.constant 0 : index
    %11 = vector.load %arg4[%c0_9, %c0_10] : memref<1x16xf32, #tpu.memory_space<vmem>>, vector<1x16xf32>
    tpu.vector_store %arg4[%c0_9, %c0_10], %10 {strides = array<i32>} : memref<1x16xf32, #tpu.memory_space<vmem>>, vector<1x16xf32>,
    %c0_11 = arith.constant 0 : index
    %c0_12 = arith.constant 0 : index
    %12 = vector.load %arg5[%c0_11, %c0_12] : memref<1x16xf32, #tpu.memory_space<vmem>>, vector<1x16xf32>
    %13 = arith.mulf %2, %2 : vector<512x16xf32>
    %cst_13 = arith.constant dense<0.000000e+00> : vector<16xf32>
    %14 = vector.multi_reduction <add>, %13, %cst_13 [0] : vector<512x16xf32> to vector<16xf32>
    %15 = vector.shape_cast %14 : vector<16xf32> to vector<1x16xf32>
    %16 = arith.addf %12, %15 : vector<1x16xf32>
    %c0_14 = arith.constant 0 : index
    %c0_15 = arith.constant 0 : index
    %17 = vector.load %arg5[%c0_14, %c0_15] : memref<1x16xf32, #tpu.memory_space<vmem>>, vector<1x16xf32>
    tpu.vector_store %arg5[%c0_14, %c0_15], %16 {strides = array<i32>} : memref<1x16xf32, #tpu.memory_space<vmem>>, vector<1x16xf32>,
    return
  }
  func.func @transform_0(%arg0: i32) -> (i32, i32) {
    %c0_i32 = arith.constant 0 : i32
    %c0_i32_0 = arith.constant 0 : i32
    return %arg0, %c0_i32 : i32, i32
  }
  func.func @transform_1(%arg0: i32) -> (i32, i32) {
    %c0_i32 = arith.constant 0 : i32
    %c0_i32_0 = arith.constant 0 : i32
    %c0_i32_1 = arith.constant 0 : i32
    return %c0_i32, %c0_i32_0 : i32, i32
  }
  func.func @transform_2(%arg0: i32) -> (i32, i32) {
    %c0_i32 = arith.constant 0 : i32
    %c0_i32_0 = arith.constant 0 : i32
    return %arg0, %c0_i32 : i32, i32
  }
  func.func @transform_3(%arg0: i32) -> (i32, i32) {
    %c0_i32 = arith.constant 0 : i32
    %c0_i32_0 = arith.constant 0 : i32
    %c0_i32_1 = arith.constant 0 : i32
    return %c0_i32, %c0_i32_0 : i32, i32
  }
  func.func @transform_4(%arg0: i32) -> (i32, i32) {
    %c0_i32 = arith.constant 0 : i32
    %c0_i32_0 = arith.constant 0 : i32
    %c0_i32_1 = arith.constant 0 : i32
    return %c0_i32, %c0_i32_0 : i32, i32
  }
}

module attributes {stable_mosaic.version = 11 : i64} {
  func.func @_bn_leaky_kernel(%arg0: i32, %arg1: memref<512x16xf32, #tpu.memory_space<vmem>>, %arg2: memref<1x16xf32, #tpu.memory_space<vmem>>, %arg3: memref<1x16xf32, #tpu.memory_space<vmem>>, %arg4: memref<512x16xbf16, #tpu.memory_space<vmem>>) attributes {dimension_semantics = [#tpu.dimension_semantics<parallel>], iteration_bounds = array<i64: 1>, scalar_prefetch = 0 : i64, scratch_operands = 0 : i64, tpu.core_type = #tpu.core_type<tc>, window_params = [{transform_indices = @transform_0, window_bounds = array<i64: 512, 16>}, {pipeline_mode = #tpu.pipeline_mode<synchronous>, transform_indices = @transform_1, window_bounds = array<i64: 1, 16>}, {pipeline_mode = #tpu.pipeline_mode<synchronous>, transform_indices = @transform_2, window_bounds = array<i64: 1, 16>}, {transform_indices = @transform_3, window_bounds = array<i64: 512, 16>}]} {
    %c0 = arith.constant 0 : index
    %c0_0 = arith.constant 0 : index
    %0 = vector.load %arg1[%c0, %c0_0] : memref<512x16xf32, #tpu.memory_space<vmem>>, vector<512x16xf32>
    %c0_1 = arith.constant 0 : index
    %c0_2 = arith.constant 0 : index
    %1 = vector.load %arg2[%c0_1, %c0_2] : memref<1x16xf32, #tpu.memory_space<vmem>>, vector<1x16xf32>
    %2 = vector.broadcast %1 : vector<1x16xf32> to vector<512x16xf32>
    %3 = arith.mulf %0, %2 : vector<512x16xf32>
    %c0_3 = arith.constant 0 : index
    %c0_4 = arith.constant 0 : index
    %4 = vector.load %arg3[%c0_3, %c0_4] : memref<1x16xf32, #tpu.memory_space<vmem>>, vector<1x16xf32>
    %5 = vector.broadcast %4 : vector<1x16xf32> to vector<512x16xf32>
    %6 = arith.addf %3, %5 : vector<512x16xf32>
    %cst = arith.constant 0.000000e+00 : f32
    %7 = vector.broadcast %cst : f32 to vector<512x16xf32>
    %8 = arith.cmpf ogt, %6, %7 : vector<512x16xf32>
    %cst_5 = arith.constant 2.000000e-01 : f32
    %9 = vector.broadcast %cst_5 : f32 to vector<512x16xf32>
    %10 = arith.mulf %9, %6 : vector<512x16xf32>
    %11 = arith.select %8, %6, %10 : vector<512x16xi1>, vector<512x16xf32>
    %12 = arith.truncf %11 : vector<512x16xf32> to vector<512x16xbf16>
    %c0_6 = arith.constant 0 : index
    %c0_7 = arith.constant 0 : index
    %13 = vector.load %arg4[%c0_6, %c0_7] : memref<512x16xbf16, #tpu.memory_space<vmem>>, vector<512x16xbf16>
    tpu.vector_store %arg4[%c0_6, %c0_7], %12 {strides = array<i32>} : memref<512x16xbf16, #tpu.memory_space<vmem>>, vector<512x16xbf16>,
    return
  }
  func.func @transform_0(%arg0: i32) -> (i32, i32) {
    %c0_i32 = arith.constant 0 : i32
    %c0_i32_0 = arith.constant 0 : i32
    return %arg0, %c0_i32 : i32, i32
  }
  func.func @transform_1(%arg0: i32) -> (i32, i32) {
    %c0_i32 = arith.constant 0 : i32
    %c0_i32_0 = arith.constant 0 : i32
    %c0_i32_1 = arith.constant 0 : i32
    return %c0_i32, %c0_i32_0 : i32, i32
  }
  func.func @transform_2(%arg0: i32) -> (i32, i32) {
    %c0_i32 = arith.constant 0 : i32
    %c0_i32_0 = arith.constant 0 : i32
    %c0_i32_1 = arith.constant 0 : i32
    return %c0_i32, %c0_i32_0 : i32, i32
  }
  func.func @transform_3(%arg0: i32) -> (i32, i32) {
    %c0_i32 = arith.constant 0 : i32
    %c0_i32_0 = arith.constant 0 : i32
    return %arg0, %c0_i32 : i32, i32
  }
}

module attributes {stable_mosaic.version = 11 : i64} {
  func.func @_matmul_stats_kernel(%arg0: i32, %arg1: memref<128x256xbf16, #tpu.memory_space<vmem>>, %arg2: memref<256x32xbf16, #tpu.memory_space<vmem>>, %arg3: memref<128x32xf32, #tpu.memory_space<vmem>>, %arg4: memref<1x32xf32, #tpu.memory_space<vmem>>, %arg5: memref<1x32xf32, #tpu.memory_space<vmem>>) attributes {dimension_semantics = [#tpu.dimension_semantics<arbitrary>], iteration_bounds = array<i64: 1>, scalar_prefetch = 0 : i64, scratch_operands = 0 : i64, tpu.core_type = #tpu.core_type<tc>, window_params = [{transform_indices = @transform_0, window_bounds = array<i64: 128, 256>}, {pipeline_mode = #tpu.pipeline_mode<synchronous>, transform_indices = @transform_1, window_bounds = array<i64: 256, 32>}, {transform_indices = @transform_2, window_bounds = array<i64: 128, 32>}, {pipeline_mode = #tpu.pipeline_mode<synchronous>, transform_indices = @transform_3, window_bounds = array<i64: 1, 32>}, {pipeline_mode = #tpu.pipeline_mode<synchronous>, transform_indices = @transform_4, window_bounds = array<i64: 1, 32>}]} {
    %c0 = arith.constant 0 : index
    %c0_0 = arith.constant 0 : index
    %0 = vector.load %arg1[%c0, %c0_0] : memref<128x256xbf16, #tpu.memory_space<vmem>>, vector<128x256xbf16>
    %c0_1 = arith.constant 0 : index
    %c0_2 = arith.constant 0 : index
    %1 = vector.load %arg2[%c0_1, %c0_2] : memref<256x32xbf16, #tpu.memory_space<vmem>>, vector<256x32xbf16>
    %cst = arith.constant dense<0.000000e+00> : vector<128x32xf32>
    %2 = tpu.matmul %0, %1, %cst {dimension_numbers = #tpu.dot_dimension_numbers<[1], [0], [0], [1], [0, 0, 1, 1], [], []>} : vector<128x256xbf16>, vector<256x32xbf16>, vector<128x32xf32> -> vector<128x32xf32>
    %c0_3 = arith.constant 0 : index
    %c0_4 = arith.constant 0 : index
    %3 = vector.load %arg3[%c0_3, %c0_4] : memref<128x32xf32, #tpu.memory_space<vmem>>, vector<128x32xf32>
    tpu.vector_store %arg3[%c0_3, %c0_4], %2 {strides = array<i32>} : memref<128x32xf32, #tpu.memory_space<vmem>>, vector<128x32xf32>,
    %c0_i32 = arith.constant 0 : i32
    %4 = arith.cmpi eq, %arg0, %c0_i32 : i32
    %5 = arith.extui %4 : i1 to i32
    %c0_i32_5 = arith.constant 0 : i32
    %6 = arith.cmpi ne, %5, %c0_i32_5 : i32
    scf.if %6 {
      %cst_16 = arith.constant 0.000000e+00 : f32
      %18 = vector.broadcast %cst_16 : f32 to vector<1x32xf32>
      %c0_17 = arith.constant 0 : index
      %c0_18 = arith.constant 0 : index
      %19 = vector.load %arg4[%c0_17, %c0_18] : memref<1x32xf32, #tpu.memory_space<vmem>>, vector<1x32xf32>
      tpu.vector_store %arg4[%c0_17, %c0_18], %18 {strides = array<i32>} : memref<1x32xf32, #tpu.memory_space<vmem>>, vector<1x32xf32>,
      %cst_19 = arith.constant 0.000000e+00 : f32
      %20 = vector.broadcast %cst_19 : f32 to vector<1x32xf32>
      %c0_20 = arith.constant 0 : index
      %c0_21 = arith.constant 0 : index
      %21 = vector.load %arg5[%c0_20, %c0_21] : memref<1x32xf32, #tpu.memory_space<vmem>>, vector<1x32xf32>
      tpu.vector_store %arg5[%c0_20, %c0_21], %20 {strides = array<i32>} : memref<1x32xf32, #tpu.memory_space<vmem>>, vector<1x32xf32>,
    } else {
    }
    %c0_6 = arith.constant 0 : index
    %c0_7 = arith.constant 0 : index
    %7 = vector.load %arg4[%c0_6, %c0_7] : memref<1x32xf32, #tpu.memory_space<vmem>>, vector<1x32xf32>
    %cst_8 = arith.constant dense<0.000000e+00> : vector<32xf32>
    %8 = vector.multi_reduction <add>, %2, %cst_8 [0] : vector<128x32xf32> to vector<32xf32>
    %9 = vector.shape_cast %8 : vector<32xf32> to vector<1x32xf32>
    %10 = arith.addf %7, %9 : vector<1x32xf32>
    %c0_9 = arith.constant 0 : index
    %c0_10 = arith.constant 0 : index
    %11 = vector.load %arg4[%c0_9, %c0_10] : memref<1x32xf32, #tpu.memory_space<vmem>>, vector<1x32xf32>
    tpu.vector_store %arg4[%c0_9, %c0_10], %10 {strides = array<i32>} : memref<1x32xf32, #tpu.memory_space<vmem>>, vector<1x32xf32>,
    %c0_11 = arith.constant 0 : index
    %c0_12 = arith.constant 0 : index
    %12 = vector.load %arg5[%c0_11, %c0_12] : memref<1x32xf32, #tpu.memory_space<vmem>>, vector<1x32xf32>
    %13 = arith.mulf %2, %2 : vector<128x32xf32>
    %cst_13 = arith.constant dense<0.000000e+00> : vector<32xf32>
    %14 = vector.multi_reduction <add>, %13, %cst_13 [0] : vector<128x32xf32> to vector<32xf32>
    %15 = vector.shape_cast %14 : vector<32xf32> to vector<1x32xf32>
    %16 = arith.addf %12, %15 : vector<1x32xf32>
    %c0_14 = arith.constant 0 : index
    %c0_15 = arith.constant 0 : index
    %17 = vector.load %arg5[%c0_14, %c0_15] : memref<1x32xf32, #tpu.memory_space<vmem>>, vector<1x32xf32>
    tpu.vector_store %arg5[%c0_14, %c0_15], %16 {strides = array<i32>} : memref<1x32xf32, #tpu.memory_space<vmem>>, vector<1x32xf32>,
    return
  }
  func.func @transform_0(%arg0: i32) -> (i32, i32) {
    %c0_i32 = arith.constant 0 : i32
    %c0_i32_0 = arith.constant 0 : i32
    return %arg0, %c0_i32 : i32, i32
  }
  func.func @transform_1(%arg0: i32) -> (i32, i32) {
    %c0_i32 = arith.constant 0 : i32
    %c0_i32_0 = arith.constant 0 : i32
    %c0_i32_1 = arith.constant 0 : i32
    return %c0_i32, %c0_i32_0 : i32, i32
  }
  func.func @transform_2(%arg0: i32) -> (i32, i32) {
    %c0_i32 = arith.constant 0 : i32
    %c0_i32_0 = arith.constant 0 : i32
    return %arg0, %c0_i32 : i32, i32
  }
  func.func @transform_3(%arg0: i32) -> (i32, i32) {
    %c0_i32 = arith.constant 0 : i32
    %c0_i32_0 = arith.constant 0 : i32
    %c0_i32_1 = arith.constant 0 : i32
    return %c0_i32, %c0_i32_0 : i32, i32
  }
  func.func @transform_4(%arg0: i32) -> (i32, i32) {
    %c0_i32 = arith.constant 0 : i32
    %c0_i32_0 = arith.constant 0 : i32
    %c0_i32_1 = arith.constant 0 : i32
    return %c0_i32, %c0_i32_0 : i32, i32
  }
}

module attributes {stable_mosaic.version = 11 : i64} {
  func.func @_bn_leaky_kernel(%arg0: i32, %arg1: memref<128x32xf32, #tpu.memory_space<vmem>>, %arg2: memref<1x32xf32, #tpu.memory_space<vmem>>, %arg3: memref<1x32xf32, #tpu.memory_space<vmem>>, %arg4: memref<128x32xbf16, #tpu.memory_space<vmem>>) attributes {dimension_semantics = [#tpu.dimension_semantics<parallel>], iteration_bounds = array<i64: 1>, scalar_prefetch = 0 : i64, scratch_operands = 0 : i64, tpu.core_type = #tpu.core_type<tc>, window_params = [{transform_indices = @transform_0, window_bounds = array<i64: 128, 32>}, {pipeline_mode = #tpu.pipeline_mode<synchronous>, transform_indices = @transform_1, window_bounds = array<i64: 1, 32>}, {pipeline_mode = #tpu.pipeline_mode<synchronous>, transform_indices = @transform_2, window_bounds = array<i64: 1, 32>}, {transform_indices = @transform_3, window_bounds = array<i64: 128, 32>}]} {
    %c0 = arith.constant 0 : index
    %c0_0 = arith.constant 0 : index
    %0 = vector.load %arg1[%c0, %c0_0] : memref<128x32xf32, #tpu.memory_space<vmem>>, vector<128x32xf32>
    %c0_1 = arith.constant 0 : index
    %c0_2 = arith.constant 0 : index
    %1 = vector.load %arg2[%c0_1, %c0_2] : memref<1x32xf32, #tpu.memory_space<vmem>>, vector<1x32xf32>
    %2 = vector.broadcast %1 : vector<1x32xf32> to vector<128x32xf32>
    %3 = arith.mulf %0, %2 : vector<128x32xf32>
    %c0_3 = arith.constant 0 : index
    %c0_4 = arith.constant 0 : index
    %4 = vector.load %arg3[%c0_3, %c0_4] : memref<1x32xf32, #tpu.memory_space<vmem>>, vector<1x32xf32>
    %5 = vector.broadcast %4 : vector<1x32xf32> to vector<128x32xf32>
    %6 = arith.addf %3, %5 : vector<128x32xf32>
    %cst = arith.constant 0.000000e+00 : f32
    %7 = vector.broadcast %cst : f32 to vector<128x32xf32>
    %8 = arith.cmpf ogt, %6, %7 : vector<128x32xf32>
    %cst_5 = arith.constant 2.000000e-01 : f32
    %9 = vector.broadcast %cst_5 : f32 to vector<128x32xf32>
    %10 = arith.mulf %9, %6 : vector<128x32xf32>
    %11 = arith.select %8, %6, %10 : vector<128x32xi1>, vector<128x32xf32>
    %12 = arith.truncf %11 : vector<128x32xf32> to vector<128x32xbf16>
    %c0_6 = arith.constant 0 : index
    %c0_7 = arith.constant 0 : index
    %13 = vector.load %arg4[%c0_6, %c0_7] : memref<128x32xbf16, #tpu.memory_space<vmem>>, vector<128x32xbf16>
    tpu.vector_store %arg4[%c0_6, %c0_7], %12 {strides = array<i32>} : memref<128x32xbf16, #tpu.memory_space<vmem>>, vector<128x32xbf16>,
    return
  }
  func.func @transform_0(%arg0: i32) -> (i32, i32) {
    %c0_i32 = arith.constant 0 : i32
    %c0_i32_0 = arith.constant 0 : i32
    return %arg0, %c0_i32 : i32, i32
  }
  func.func @transform_1(%arg0: i32) -> (i32, i32) {
    %c0_i32 = arith.constant 0 : i32
    %c0_i32_0 = arith.constant 0 : i32
    %c0_i32_1 = arith.constant 0 : i32
    return %c0_i32, %c0_i32_0 : i32, i32
  }
  func.func @transform_2(%arg0: i32) -> (i32, i32) {
    %c0_i32 = arith.constant 0 : i32
    %c0_i32_0 = arith.constant 0 : i32
    %c0_i32_1 = arith.constant 0 : i32
    return %c0_i32, %c0_i32_0 : i32, i32
  }
  func.func @transform_3(%arg0: i32) -> (i32, i32) {
    %c0_i32 = arith.constant 0 : i32
    %c0_i32_0 = arith.constant 0 : i32
    return %arg0, %c0_i32 : i32, i32
  }
}

module attributes {stable_mosaic.version = 11 : i64} {
  func.func @_matmul_stats_kernel(%arg0: i32, %arg1: memref<32x512xbf16, #tpu.memory_space<vmem>>, %arg2: memref<512x64xbf16, #tpu.memory_space<vmem>>, %arg3: memref<32x64xf32, #tpu.memory_space<vmem>>, %arg4: memref<1x64xf32, #tpu.memory_space<vmem>>, %arg5: memref<1x64xf32, #tpu.memory_space<vmem>>) attributes {dimension_semantics = [#tpu.dimension_semantics<arbitrary>], iteration_bounds = array<i64: 1>, scalar_prefetch = 0 : i64, scratch_operands = 0 : i64, tpu.core_type = #tpu.core_type<tc>, window_params = [{transform_indices = @transform_0, window_bounds = array<i64: 32, 512>}, {pipeline_mode = #tpu.pipeline_mode<synchronous>, transform_indices = @transform_1, window_bounds = array<i64: 512, 64>}, {transform_indices = @transform_2, window_bounds = array<i64: 32, 64>}, {pipeline_mode = #tpu.pipeline_mode<synchronous>, transform_indices = @transform_3, window_bounds = array<i64: 1, 64>}, {pipeline_mode = #tpu.pipeline_mode<synchronous>, transform_indices = @transform_4, window_bounds = array<i64: 1, 64>}]} {
    %c0 = arith.constant 0 : index
    %c0_0 = arith.constant 0 : index
    %0 = vector.load %arg1[%c0, %c0_0] : memref<32x512xbf16, #tpu.memory_space<vmem>>, vector<32x512xbf16>
    %c0_1 = arith.constant 0 : index
    %c0_2 = arith.constant 0 : index
    %1 = vector.load %arg2[%c0_1, %c0_2] : memref<512x64xbf16, #tpu.memory_space<vmem>>, vector<512x64xbf16>
    %cst = arith.constant dense<0.000000e+00> : vector<32x64xf32>
    %2 = tpu.matmul %0, %1, %cst {dimension_numbers = #tpu.dot_dimension_numbers<[1], [0], [0], [1], [0, 0, 1, 1], [], []>} : vector<32x512xbf16>, vector<512x64xbf16>, vector<32x64xf32> -> vector<32x64xf32>
    %c0_3 = arith.constant 0 : index
    %c0_4 = arith.constant 0 : index
    %3 = vector.load %arg3[%c0_3, %c0_4] : memref<32x64xf32, #tpu.memory_space<vmem>>, vector<32x64xf32>
    tpu.vector_store %arg3[%c0_3, %c0_4], %2 {strides = array<i32>} : memref<32x64xf32, #tpu.memory_space<vmem>>, vector<32x64xf32>,
    %c0_i32 = arith.constant 0 : i32
    %4 = arith.cmpi eq, %arg0, %c0_i32 : i32
    %5 = arith.extui %4 : i1 to i32
    %c0_i32_5 = arith.constant 0 : i32
    %6 = arith.cmpi ne, %5, %c0_i32_5 : i32
    scf.if %6 {
      %cst_16 = arith.constant 0.000000e+00 : f32
      %18 = vector.broadcast %cst_16 : f32 to vector<1x64xf32>
      %c0_17 = arith.constant 0 : index
      %c0_18 = arith.constant 0 : index
      %19 = vector.load %arg4[%c0_17, %c0_18] : memref<1x64xf32, #tpu.memory_space<vmem>>, vector<1x64xf32>
      tpu.vector_store %arg4[%c0_17, %c0_18], %18 {strides = array<i32>} : memref<1x64xf32, #tpu.memory_space<vmem>>, vector<1x64xf32>,
      %cst_19 = arith.constant 0.000000e+00 : f32
      %20 = vector.broadcast %cst_19 : f32 to vector<1x64xf32>
      %c0_20 = arith.constant 0 : index
      %c0_21 = arith.constant 0 : index
      %21 = vector.load %arg5[%c0_20, %c0_21] : memref<1x64xf32, #tpu.memory_space<vmem>>, vector<1x64xf32>
      tpu.vector_store %arg5[%c0_20, %c0_21], %20 {strides = array<i32>} : memref<1x64xf32, #tpu.memory_space<vmem>>, vector<1x64xf32>,
    } else {
    }
    %c0_6 = arith.constant 0 : index
    %c0_7 = arith.constant 0 : index
    %7 = vector.load %arg4[%c0_6, %c0_7] : memref<1x64xf32, #tpu.memory_space<vmem>>, vector<1x64xf32>
    %cst_8 = arith.constant dense<0.000000e+00> : vector<64xf32>
    %8 = vector.multi_reduction <add>, %2, %cst_8 [0] : vector<32x64xf32> to vector<64xf32>
    %9 = vector.shape_cast %8 : vector<64xf32> to vector<1x64xf32>
    %10 = arith.addf %7, %9 : vector<1x64xf32>
    %c0_9 = arith.constant 0 : index
    %c0_10 = arith.constant 0 : index
    %11 = vector.load %arg4[%c0_9, %c0_10] : memref<1x64xf32, #tpu.memory_space<vmem>>, vector<1x64xf32>
    tpu.vector_store %arg4[%c0_9, %c0_10], %10 {strides = array<i32>} : memref<1x64xf32, #tpu.memory_space<vmem>>, vector<1x64xf32>,
    %c0_11 = arith.constant 0 : index
    %c0_12 = arith.constant 0 : index
    %12 = vector.load %arg5[%c0_11, %c0_12] : memref<1x64xf32, #tpu.memory_space<vmem>>, vector<1x64xf32>
    %13 = arith.mulf %2, %2 : vector<32x64xf32>
    %cst_13 = arith.constant dense<0.000000e+00> : vector<64xf32>
    %14 = vector.multi_reduction <add>, %13, %cst_13 [0] : vector<32x64xf32> to vector<64xf32>
    %15 = vector.shape_cast %14 : vector<64xf32> to vector<1x64xf32>
    %16 = arith.addf %12, %15 : vector<1x64xf32>
    %c0_14 = arith.constant 0 : index
    %c0_15 = arith.constant 0 : index
    %17 = vector.load %arg5[%c0_14, %c0_15] : memref<1x64xf32, #tpu.memory_space<vmem>>, vector<1x64xf32>
    tpu.vector_store %arg5[%c0_14, %c0_15], %16 {strides = array<i32>} : memref<1x64xf32, #tpu.memory_space<vmem>>, vector<1x64xf32>,
    return
  }
  func.func @transform_0(%arg0: i32) -> (i32, i32) {
    %c0_i32 = arith.constant 0 : i32
    %c0_i32_0 = arith.constant 0 : i32
    return %arg0, %c0_i32 : i32, i32
  }
  func.func @transform_1(%arg0: i32) -> (i32, i32) {
    %c0_i32 = arith.constant 0 : i32
    %c0_i32_0 = arith.constant 0 : i32
    %c0_i32_1 = arith.constant 0 : i32
    return %c0_i32, %c0_i32_0 : i32, i32
  }
  func.func @transform_2(%arg0: i32) -> (i32, i32) {
    %c0_i32 = arith.constant 0 : i32
    %c0_i32_0 = arith.constant 0 : i32
    return %arg0, %c0_i32 : i32, i32
  }
  func.func @transform_3(%arg0: i32) -> (i32, i32) {
    %c0_i32 = arith.constant 0 : i32
    %c0_i32_0 = arith.constant 0 : i32
    %c0_i32_1 = arith.constant 0 : i32
    return %c0_i32, %c0_i32_0 : i32, i32
  }
  func.func @transform_4(%arg0: i32) -> (i32, i32) {
    %c0_i32 = arith.constant 0 : i32
    %c0_i32_0 = arith.constant 0 : i32
    %c0_i32_1 = arith.constant 0 : i32
    return %c0_i32, %c0_i32_0 : i32, i32
  }
}

module attributes {stable_mosaic.version = 11 : i64} {
  func.func @_bn_leaky_final_kernel(%arg0: i32, %arg1: memref<2x16x64xf32, #tpu.memory_space<vmem>>, %arg2: memref<1x1x64xf32, #tpu.memory_space<vmem>>, %arg3: memref<1x1x64xf32, #tpu.memory_space<vmem>>, %arg4: memref<1x16x64xf32, #tpu.memory_space<vmem>>, %arg5: memref<2x1xf32, #tpu.memory_space<vmem>>) attributes {dimension_semantics = [#tpu.dimension_semantics<parallel>], iteration_bounds = array<i64: 1>, scalar_prefetch = 0 : i64, scratch_operands = 0 : i64, tpu.core_type = #tpu.core_type<tc>, window_params = [{transform_indices = @transform_0, window_bounds = array<i64: 2, 16, 64>}, {pipeline_mode = #tpu.pipeline_mode<synchronous>, transform_indices = @transform_1, window_bounds = array<i64: 1, 1, 64>}, {pipeline_mode = #tpu.pipeline_mode<synchronous>, transform_indices = @transform_2, window_bounds = array<i64: 1, 1, 64>}, {pipeline_mode = #tpu.pipeline_mode<synchronous>, transform_indices = @transform_3, window_bounds = array<i64: 1, 16, 64>}, {transform_indices = @transform_4, window_bounds = array<i64: 2, 1>}]} {
    %c0 = arith.constant 0 : index
    %c0_0 = arith.constant 0 : index
    %c0_1 = arith.constant 0 : index
    %0 = vector.load %arg1[%c0, %c0_0, %c0_1] : memref<2x16x64xf32, #tpu.memory_space<vmem>>, vector<2x16x64xf32>
    %c0_2 = arith.constant 0 : index
    %c0_3 = arith.constant 0 : index
    %c0_4 = arith.constant 0 : index
    %1 = vector.load %arg2[%c0_2, %c0_3, %c0_4] : memref<1x1x64xf32, #tpu.memory_space<vmem>>, vector<1x1x64xf32>
    %2 = vector.broadcast %1 : vector<1x1x64xf32> to vector<2x16x64xf32>
    %3 = arith.mulf %0, %2 : vector<2x16x64xf32>
    %c0_5 = arith.constant 0 : index
    %c0_6 = arith.constant 0 : index
    %c0_7 = arith.constant 0 : index
    %4 = vector.load %arg3[%c0_5, %c0_6, %c0_7] : memref<1x1x64xf32, #tpu.memory_space<vmem>>, vector<1x1x64xf32>
    %5 = vector.broadcast %4 : vector<1x1x64xf32> to vector<2x16x64xf32>
    %6 = arith.addf %3, %5 : vector<2x16x64xf32>
    %cst = arith.constant 0.000000e+00 : f32
    %7 = vector.broadcast %cst : f32 to vector<2x16x64xf32>
    %8 = arith.cmpf ogt, %6, %7 : vector<2x16x64xf32>
    %cst_8 = arith.constant 2.000000e-01 : f32
    %9 = vector.broadcast %cst_8 : f32 to vector<2x16x64xf32>
    %10 = arith.mulf %9, %6 : vector<2x16x64xf32>
    %11 = arith.select %8, %6, %10 : vector<2x16x64xi1>, vector<2x16x64xf32>
    %c0_9 = arith.constant 0 : index
    %c0_10 = arith.constant 0 : index
    %c0_11 = arith.constant 0 : index
    %12 = vector.load %arg4[%c0_9, %c0_10, %c0_11] : memref<1x16x64xf32, #tpu.memory_space<vmem>>, vector<1x16x64xf32>
    %13 = vector.broadcast %12 : vector<1x16x64xf32> to vector<2x16x64xf32>
    %14 = arith.mulf %11, %13 : vector<2x16x64xf32>
    %cst_12 = arith.constant dense<0.000000e+00> : vector<2x16xf32>
    %15 = vector.multi_reduction <add>, %14, %cst_12 [2] : vector<2x16x64xf32> to vector<2x16xf32>
    %cst_13 = arith.constant dense<0.000000e+00> : vector<2xf32>
    %16 = vector.multi_reduction <add>, %15, %cst_13 [1] : vector<2x16xf32> to vector<2xf32>
    %17 = vector.shape_cast %16 : vector<2xf32> to vector<2x1xf32>
    %c0_14 = arith.constant 0 : index
    %c0_15 = arith.constant 0 : index
    %18 = vector.load %arg5[%c0_14, %c0_15] : memref<2x1xf32, #tpu.memory_space<vmem>>, vector<2x1xf32>
    tpu.vector_store %arg5[%c0_14, %c0_15], %17 {strides = array<i32>} : memref<2x1xf32, #tpu.memory_space<vmem>>, vector<2x1xf32>,
    return
  }
  func.func @transform_0(%arg0: i32) -> (i32, i32, i32) {
    %c0_i32 = arith.constant 0 : i32
    %c0_i32_0 = arith.constant 0 : i32
    %c0_i32_1 = arith.constant 0 : i32
    return %arg0, %c0_i32, %c0_i32_0 : i32, i32, i32
  }
  func.func @transform_1(%arg0: i32) -> (i32, i32, i32) {
    %c0_i32 = arith.constant 0 : i32
    %c0_i32_0 = arith.constant 0 : i32
    %c0_i32_1 = arith.constant 0 : i32
    %c0_i32_2 = arith.constant 0 : i32
    return %c0_i32, %c0_i32_0, %c0_i32_1 : i32, i32, i32
  }
  func.func @transform_2(%arg0: i32) -> (i32, i32, i32) {
    %c0_i32 = arith.constant 0 : i32
    %c0_i32_0 = arith.constant 0 : i32
    %c0_i32_1 = arith.constant 0 : i32
    %c0_i32_2 = arith.constant 0 : i32
    return %c0_i32, %c0_i32_0, %c0_i32_1 : i32, i32, i32
  }
  func.func @transform_3(%arg0: i32) -> (i32, i32, i32) {
    %c0_i32 = arith.constant 0 : i32
    %c0_i32_0 = arith.constant 0 : i32
    %c0_i32_1 = arith.constant 0 : i32
    %c0_i32_2 = arith.constant 0 : i32
    return %c0_i32, %c0_i32_0, %c0_i32_1 : i32, i32, i32
  }
  func.func @transform_4(%arg0: i32) -> (i32, i32) {
    %c0_i32 = arith.constant 0 : i32
    %c0_i32_0 = arith.constant 0 : i32
    return %arg0, %c0_i32 : i32, i32
  }
}

</mosaic_0001>

<bundles_post_ra>
// kernel: discriminator_forward.7
= control target key start
LH: loop header
LB: loop body
LE: loop exit
PB: predicated region body
PF: predicated region fallthrough
CT: control target
= control target key end

     0   :  { %s1265_s9 = smov 0   ;;  %s1488_s0 = inlined_call_operand.vmem [shape: bf16[2048,16], index: 0, kind: input, shape index: {}]   ;;  %s1489_s1 = inlined_call_operand.vmem [shape: bf16[16,8], index: 1, kind: input, shape index: {}]   ;;  %s1490_s2 = inlined_call_operand.vmem [shape: bf16[2048,8], index: 2, kind: output, shape index: {}]  }
   0x1 LB: > { %s1023_s10 = sadd.s32 4294967295, %s1248_s9   ;;  %p1027_p0 = scmp.ge.s32.totalorder %s1248_s9, 1  ;;  %s1248_s9 = sphi %s1265_s9, %s12_s9  }
   0x2   : > { %p113_p1 = scmp.lt.s32.totalorder %s1248_s9, 5 }
   0x4   : > { %p114_p2 = pnand %p1027_p0, %p113_p1 }
   0x5   : > { %s1028_s13 = sshll.u32 (!%p114_p2), %s1023_s10, 6 }
   0x6   : > { %117 = sbr.rel (%p114_p2) target bundleno = 276 (0x114), region = 28  ;;  %p136_p3 = scmp.lt.s32.totalorder (!%p114_p2), %s1028_s13, 255 }
   0xb   : > { %v1230_v0 = vld [vmem:[%s1489_s1] sm:$0xff]  ;;  %s1492_s13 = smov (!%p136_p3, %s1028_s13), 255  ;;  %vm380_vm0 = vcmask 130048   ;;  %vm902_vm3 = vcmask 60416  }
   0xc   : > { %484 = vmatpush.bf16.msra.mxu0 %v1230_v0  ;;  %1231 = vmatpush.bf16.msra.mxu1 %v1230_v0  ;;  %s1029_s14 = sshll.u32 %s1492_s13, 2 }
   0xd   : > { %1232 = vmatpush.bf16.msra.mxu2 %v1230_v0  ;;  %1233 = vmatpush.bf16.msra.mxu3 %v1230_v0  ;;  %s1284_s17 = scalar_lea.vmem %s1488_s0, %s1029_s14  ;;  %s1355_s20 = scalar_lea.vmem %s1490_s2, %s1029_s14 }
   0xe   : > { %v1198_v1 = vld [vmem:[%s1284_s17] sm:$0xff]  ;;  %v1199_v5 = vld [vmem:[%s1284_s17 + $0x8] sm:$0xff]  ;;  %v1200_v9 = vld [vmem:[%s1284_s17 + $0x10] sm:$0xff] }
   0xf   : > { %v1206_v2 = vld [vmem:[%s1284_s17 + $0x40] sm:$0xff]  ;;  %1164 = vmatmul.msk.bf16.vlgmr.msra.gmra.mxu0 %vm380_vm0, %v1198_v1  ;;  %v1207_v6 = vld [vmem:[%s1284_s17 + $0x48] sm:$0xff]  ;;  %v1208_v10 = vld [vmem:[%s1284_s17 + $0x50] sm:$0xff] }
  0x10   : > { %v1214_v3 = vld [vmem:[%s1284_s17 + $0x80] sm:$0xff]  ;;  %1172 = vmatmul.msk.bf16.vlgmr.msra.gmra.mxu1 %vm380_vm0, %v1206_v2  ;;  %v1215_v7 = vld [vmem:[%s1284_s17 + $0x88] sm:$0xff]  ;;  %v1216_v11 = vld [vmem:[%s1284_s17 + $0x90] sm:$0xff] }
  0x11   : > { %v1222_v4 = vld [vmem:[%s1284_s17 + $0xc0] sm:$0xff]  ;;  %1180 = vmatmul.msk.bf16.vlgmr.msra.gmra.mxu2 %vm380_vm0, %v1214_v3  ;;  %v1223_v8 = vld [vmem:[%s1284_s17 + $0xc8] sm:$0xff]  ;;  %v1224_v12 = vld [vmem:[%s1284_s17 + $0xd0] sm:$0xff] }
  0x12   : > { %1188 = vmatmul.msk.bf16.vlgmr.msra.gmra.mxu3 %vm380_vm0, %v1222_v4  ;;  %v1201_v13 = vld [vmem:[%s1284_s17 + $0x18] sm:$0xff]  ;;  %v1202_v17 = vld [vmem:[%s1284_s17 + $0x20] sm:$0xff]  ;;  %v1203_v21 = vld [vmem:[%s1284_s17 + $0x28] sm:$0xff] }
  0x13   : > { %v1209_v14 = vld [vmem:[%s1284_s17 + $0x58] sm:$0xff]  ;;  %v1210_v18 = vld [vmem:[%s1284_s17 + $0x60] sm:$0xff]  ;;  %v1211_v22 = vld [vmem:[%s1284_s17 + $0x68] sm:$0xff] }
  0x14   : > { %v1217_v15 = vld [vmem:[%s1284_s17 + $0x98] sm:$0xff]  ;;  %v1218_v19 = vld [vmem:[%s1284_s17 + $0xa0] sm:$0xff]  ;;  %v1219_v23 = vld [vmem:[%s1284_s17 + $0xa8] sm:$0xff] }
  0x15   : > { %v1225_v16 = vld [vmem:[%s1284_s17 + $0xd8] sm:$0xff]  ;;  %v1226_v20 = vld [vmem:[%s1284_s17 + $0xe0] sm:$0xff]  ;;  %v1227_v24 = vld [vmem:[%s1284_s17 + $0xe8] sm:$0xff] }
  0x16   : > { %v1204_v25 = vld [vmem:[%s1284_s17 + $0x30] sm:$0xff]  ;;  %v1205_v29 = vld [vmem:[%s1284_s17 + $0x38] sm:$0xff] }
  0x17   : > { %v1212_v26 = vld [vmem:[%s1284_s17 + $0x70] sm:$0xff]  ;;  %v1213_v30 = vld [vmem:[%s1284_s17 + $0x78] sm:$0xff] }
  0x18   : > { %v1220_v27 = vld [vmem:[%s1284_s17 + $0xb0] sm:$0xff]  ;;  %v1221_v31 = vld [vmem:[%s1284_s17 + $0xb8] sm:$0xff] }
  0x19   : > { %v1228_v28 = vld [vmem:[%s1284_s17 + $0xf0] sm:$0xff]  ;;  %v1229_v32 = vld [vmem:[%s1284_s17 + $0xf8] sm:$0xff] }
  0x1f   : > { %1165 = vmatmul.msk.bf16.gmra.mxu0 %vm380_vm0, %v1199_v5 }
  0x20   : > { %1173 = vmatmul.msk.bf16.gmra.mxu1 %vm380_vm0, %v1207_v6 }
  0x21   : > { %1181 = vmatmul.msk.bf16.gmra.mxu2 %vm380_vm0, %v1215_v7 }
  0x22   : > { %1189 = vmatmul.msk.bf16.gmra.mxu3 %vm380_vm0, %v1223_v8 }
  0x2f   : > { %1166 = vmatmul.msk.bf16.gmra.mxu0 %vm380_vm0, %v1200_v9 }
  0x30   : > { %1174 = vmatmul.msk.bf16.gmra.mxu1 %vm380_vm0, %v1208_v10 }
  0x31   : > { %1182 = vmatmul.msk.bf16.gmra.mxu2 %vm380_vm0, %v1216_v11 }
  0x32   : > { %1190 = vmatmul.msk.bf16.gmra.mxu3 %vm380_vm0, %v1224_v12 }
  0x3f   : > { %1167 = vmatmul.msk.bf16.gmra.mxu0 %vm380_vm0, %v1201_v13 }
  0x40   : > { %1175 = vmatmul.msk.bf16.gmra.mxu1 %vm380_vm0, %v1209_v14 }
  0x41   : > { %1183 = vmatmul.msk.bf16.gmra.mxu2 %vm380_vm0, %v1217_v15 }
  0x42   : > { %1191 = vmatmul.msk.bf16.gmra.mxu3 %vm380_vm0, %v1225_v16 }
  0x4f   : > { %1168 = vmatmul.msk.bf16.gmra.mxu0 %vm380_vm0, %v1202_v17 }
  0x50   : > { %1176 = vmatmul.msk.bf16.gmra.mxu1 %vm380_vm0, %v1210_v18 }
  0x51   : > { %1184 = vmatmul.msk.bf16.gmra.mxu2 %vm380_vm0, %v1218_v19 }
  0x52   : > { %1192 = vmatmul.msk.bf16.gmra.mxu3 %vm380_vm0, %v1226_v20 }
  0x5f   : > { %1169 = vmatmul.msk.bf16.gmra.mxu0 %vm380_vm0, %v1203_v21 }
  0x60   : > { %1177 = vmatmul.msk.bf16.gmra.mxu1 %vm380_vm0, %v1211_v22 }
  0x61   : > { %1185 = vmatmul.msk.bf16.gmra.mxu2 %vm380_vm0, %v1219_v23 }
  0x62   : > { %1193 = vmatmul.msk.bf16.gmra.mxu3 %vm380_vm0, %v1227_v24 }
  0x6f   : > { %1170 = vmatmul.msk.bf16.gmra.mxu0 %vm380_vm0, %v1204_v25 }
  0x70   : > { %1178 = vmatmul.msk.bf16.gmra.mxu1 %vm380_vm0, %v1212_v26 }
  0x71   : > { %1186 = vmatmul.msk.bf16.gmra.mxu2 %vm380_vm0, %v1220_v27 }
  0x72   : > { %1194 = vmatmul.msk.bf16.gmra.mxu3 %vm380_vm0, %v1228_v28 }
  0x7f   : > { %1171 = vmatmul.msk.bf16.gmra.mxu0 %vm380_vm0, %v1205_v29 }
  0x80   : > { %1179 = vmatmul.msk.bf16.gmra.mxu1 %vm380_vm0, %v1213_v30 }
  0x81   : > { %1187 = vmatmul.msk.bf16.gmra.mxu2 %vm380_vm0, %v1221_v31 }
  0x82   : > { %1195 = vmatmul.msk.bf16.gmra.mxu3 %vm380_vm0, %v1229_v32 }
  0x8c   : > { %v486_v33 = vpop.f32.mrf.mxu0 }
  0x8d   : > { %v526_v34 = vpop.f32.mrf.mxu1  ;;  %vm646_vm1 = vcmp.gt.f32.partialorder %v486_v33, 0.0  ;;  %v710_v35 = vmul.f32 0.2, %v486_v33 }
  0x8e   : > { %vm662_vm2 = vcmp.gt.f32.partialorder %v526_v34, 0.0  ;;  %v726_v36 = vmul.f32 0.2, %v526_v34 }
  0x8f   : > { %v774_v37 = vsel %vm646_vm1, %v486_v33, %v710_v35 }
  0x90   : > { %v790_v38 = vsel %vm662_vm2, %v526_v34, %v726_v36  ;;  %v838_v39 = vpack.c.bf16 %v774_v37, %v774_v37 }
  0x91   : > { %v854_v40 = vpack.c.bf16 %v790_v38, %v790_v38 }
  0x92   : > { %903 = vst.msk [vmem:[%s1355_s20] sm:$0xf] %vm902_vm3, %v838_v39 }
  0x93   : > { %919 = vst.msk [vmem:[%s1355_s20 + $0x40] sm:$0xf] %vm902_vm3, %v854_v40 }
  0x94   : > { %v566_v41 = vpop.f32.mrf.mxu2  ;;  %v488_v45 = vpop.f32.mrf.mxu0 }
  0x95   : > { %v606_v42 = vpop.f32.mrf.mxu3  ;;  %vm678_vm4 = vcmp.gt.f32.partialorder %v566_v41, 0.0  ;;  %v742_v43 = vmul.f32 0.2, %v566_v41  ;;  %v528_v46 = vpop.f32.mrf.mxu1  ;;  %vm647_vm6 = vcmp.gt.f32.partialorder %v488_v45, 0.0  ;;  %v711_v47 = vmul.f32 0.2, %v488_v45 }
  0x96   : > { %vm694_vm5 = vcmp.gt.f32.partialorder %v606_v42, 0.0  ;;  %v758_v44 = vmul.f32 0.2, %v606_v42  ;;  %vm663_vm7 = vcmp.gt.f32.partialorder %v528_v46, 0.0  ;;  %v727_v48 = vmul.f32 0.2, %v528_v46 }
  0x97   : > { %v806_v49 = vsel %vm678_vm4, %v566_v41, %v742_v43  ;;  %v775_v53 = vsel %vm647_vm6, %v488_v45, %v711_v47 }
  0x98   : > { %v822_v50 = vsel %vm694_vm5, %v606_v42, %v758_v44  ;;  %v870_v51 = vpack.c.bf16 %v806_v49, %v806_v49  ;;  %v791_v54 = vsel %vm663_vm7, %v528_v46, %v727_v48  ;;  %v839_v55 = vpack.c.bf16 %v775_v53, %v775_v53 }
  0x99   : > { %v886_v52 = vpack.c.bf16 %v822_v50, %v822_v50  ;;  %v855_v56 = vpack.c.bf16 %v791_v54, %v791_v54 }
  0x9a   : > { %935 = vst.msk [vmem:[%s1355_s20 + $0x80] sm:$0xf] %vm902_vm3, %v870_v51 }
  0x9b   : > { %951 = vst.msk [vmem:[%s1355_s20 + $0xc0] sm:$0xf] %vm902_vm3, %v886_v52 }
  0x9c   : > { %904 = vst.msk [vmem:[%s1355_s20 + $0x4] sm:$0xf] %vm902_vm3, %v839_v55  ;;  %v568_v57 = vpop.f32.mrf.mxu2  ;;  %v491_v60 = vpop.f32.mrf.mxu0 }
  0x9d   : > { %v608_v58 = vpop.f32.mrf.mxu3  ;;  %920 = vst.msk [vmem:[%s1355_s20 + $0x44] sm:$0xf] %vm902_vm3, %v855_v56  ;;  %vm679_vm8 = vcmp.gt.f32.partialorder %v568_v57, 0.0  ;;  %v743_v59 = vmul.f32 0.2, %v568_v57  ;;  %v531_v61 = vpop.f32.mrf.mxu1  ;;  %vm648_vm10 = vcmp.gt.f32.partialorder %v491_v60, 0.0 }
  0x9e   : > { %vm695_vm9 = vcmp.gt.f32.partialorder %v608_v58, 0.0  ;;  %v759_v62 = vmul.f32 0.2, %v608_v58  ;;  %v712_v63 = vmul.f32 0.2, %v491_v60  ;;  %vm664_vm11 = vcmp.gt.f32.partialorder %v531_v61, 0.0 }
  0x9f   : > { %v807_v0 = vsel %vm679_vm8, %v568_v57, %v743_v59  ;;  %v728_v1 = vmul.f32 0.2, %v531_v61 }
  0xa0   : > { %v871_v2 = vpack.c.bf16 %v807_v0, %v807_v0  ;;  %v823_v3 = vsel %vm695_vm9, %v608_v58, %v759_v62  ;;  %v776_v4 = vsel %vm648_vm10, %v491_v60, %v712_v63 }
  0xa1   : > { %v887_v5 = vpack.c.bf16 %v823_v3, %v823_v3  ;;  %v840_v6 = vpack.c.bf16 %v776_v4, %v776_v4  ;;  %v792_v7 = vsel %vm664_vm11, %v531_v61, %v728_v1 }
  0xa2   : > { %936 = vst.msk [vmem:[%s1355_s20 + $0x84] sm:$0xf] %vm902_vm3, %v871_v2  ;;  %v856_v8 = vpack.c.bf16 %v792_v7, %v792_v7 }
  0xa3   : > { %952 = vst.msk [vmem:[%s1355_s20 + $0xc4] sm:$0xf] %vm902_vm3, %v887_v5 }
  0xa4   : > { %905 = vst.msk [vmem:[%s1355_s20 + $0x8] sm:$0xf] %vm902_vm3, %v840_v6  ;;  %v571_v9 = vpop.f32.mrf.mxu2  ;;  %v493_v12 = vpop.f32.mrf.mxu0 }
  0xa5   : > { %v611_v10 = vpop.f32.mrf.mxu3  ;;  %921 = vst.msk [vmem:[%s1355_s20 + $0x48] sm:$0xf] %vm902_vm3, %v856_v8  ;;  %vm680_vm12 = vcmp.gt.f32.partialorder %v571_v9, 0.0  ;;  %v744_v11 = vmul.f32 0.2, %v571_v9  ;;  %v533_v13 = vpop.f32.mrf.mxu1  ;;  %vm649_vm14 = vcmp.gt.f32.partialorder %v493_v12, 0.0 }
  0xa6   : > { %vm696_vm13 = vcmp.gt.f32.partialorder %v611_v10, 0.0  ;;  %v760_v14 = vmul.f32 0.2, %v611_v10  ;;  %v713_v15 = vmul.f32 0.2, %v493_v12  ;;  %vm665_vm15 = vcmp.gt.f32.partialorder %v533_v13, 0.0 }
  0xa7   : > { %v808_v16 = vsel %vm680_vm12, %v571_v9, %v744_v11  ;;  %v729_v17 = vmul.f32 0.2, %v533_v13 }
  0xa8   : > { %v872_v18 = vpack.c.bf16 %v808_v16, %v808_v16  ;;  %v824_v19 = vsel %vm696_vm13, %v611_v10, %v760_v14  ;;  %v777_v20 = vsel %vm649_vm14, %v493_v12, %v713_v15 }
  0xa9   : > { %v888_v21 = vpack.c.bf16 %v824_v19, %v824_v19  ;;  %v841_v22 = vpack.c.bf16 %v777_v20, %v777_v20  ;;  %v793_v23 = vsel %vm665_vm15, %v533_v13, %v729_v17 }
  0xaa   : > { %937 = vst.msk [vmem:[%s1355_s20 + $0x88] sm:$0xf] %vm902_vm3, %v872_v18  ;;  %v857_v24 = vpack.c.bf16 %v793_v23, %v793_v23 }
  0xab   : > { %953 = vst.msk [vmem:[%s1355_s20 + $0xc8] sm:$0xf] %vm902_vm3, %v888_v21 }
  0xac   : > { %906 = vst.msk [vmem:[%s1355_s20 + $0xc] sm:$0xf] %vm902_vm3, %v841_v22  ;;  %v573_v25 = vpop.f32.mrf.mxu2  ;;  %v496_v28 = vpop.f32.mrf.mxu0 }
  0xad   : > { %v613_v26 = vpop.f32.mrf.mxu3  ;;  %922 = vst.msk [vmem:[%s1355_s20 + $0x4c] sm:$0xf] %vm902_vm3, %v857_v24  ;;  %vm681_vm0 = vcmp.gt.f32.partialorder %v573_v25, 0.0  ;;  %v745_v27 = vmul.f32 0.2, %v573_v25  ;;  %v536_v29 = vpop.f32.mrf.mxu1  ;;  %vm650_vm2 = vcmp.gt.f32.partialorder %v496_v28, 0.0 }
  0xae   : > { %vm697_vm1 = vcmp.gt.f32.partialorder %v613_v26, 0.0  ;;  %v761_v30 = vmul.f32 0.2, %v613_v26  ;;  %v714_v31 = vmul.f32 0.2, %v496_v28  ;;  %vm666_vm4 = vcmp.gt.f32.partialorder %v536_v29, 0.0 }
  0xaf   : > { %v809_v32 = vsel %vm681_vm0, %v573_v25, %v745_v27  ;;  %v730_v33 = vmul.f32 0.2, %v536_v29 }
  0xb0   : > { %v873_v34 = vpack.c.bf16 %v809_v32, %v809_v32  ;;  %v825_v35 = vsel %vm697_vm1, %v613_v26, %v761_v30  ;;  %v778_v36 = vsel %vm650_vm2, %v496_v28, %v714_v31 }
  0xb1   : > { %v889_v37 = vpack.c.bf16 %v825_v35, %v825_v35  ;;  %v842_v38 = vpack.c.bf16 %v778_v36, %v778_v36  ;;  %v794_v39 = vsel %vm666_vm4, %v536_v29, %v730_v33 }
  0xb2   : > { %938 = vst.msk [vmem:[%s1355_s20 + $0x8c] sm:$0xf] %vm902_vm3, %v873_v34  ;;  %v858_v40 = vpack.c.bf16 %v794_v39, %v794_v39 }
  0xb3   : > { %954 = vst.msk [vmem:[%s1355_s20 + $0xcc] sm:$0xf] %vm902_vm3, %v889_v37 }
  0xb4   : > { %907 = vst.msk [vmem:[%s1355_s20 + $0x10] sm:$0xf] %vm902_vm3, %v842_v38  ;;  %v576_v41 = vpop.f32.mrf.mxu2  ;;  %v498_v44 = vpop.f32.mrf.mxu0 }
  0xb5   : > { %v616_v42 = vpop.f32.mrf.mxu3  ;;  %923 = vst.msk [vmem:[%s1355_s20 + $0x50] sm:$0xf] %vm902_vm3, %v858_v40  ;;  %vm682_vm5 = vcmp.gt.f32.partialorder %v576_v41, 0.0  ;;  %v746_v43 = vmul.f32 0.2, %v576_v41  ;;  %v538_v45 = vpop.f32.mrf.mxu1  ;;  %vm651_vm7 = vcmp.gt.f32.partialorder %v498_v44, 0.0 }
  0xb6   : > { %vm698_vm6 = vcmp.gt.f32.partialorder %v616_v42, 0.0  ;;  %v762_v46 = vmul.f32 0.2, %v616_v42  ;;  %v715_v47 = vmul.f32 0.2, %v498_v44  ;;  %vm667_vm8 = vcmp.gt.f32.partialorder %v538_v45, 0.0 }
  0xb7   : > { %v810_v48 = vsel %vm682_vm5, %v576_v41, %v746_v43  ;;  %v731_v49 = vmul.f32 0.2, %v538_v45 }
  0xb8   : > { %v874_v50 = vpack.c.bf16 %v810_v48, %v810_v48  ;;  %v826_v51 = vsel %vm698_vm6, %v616_v42, %v762_v46  ;;  %v779_v52 = vsel %vm651_vm7, %v498_v44, %v715_v47 }
  0xb9   : > { %v890_v53 = vpack.c.bf16 %v826_v51, %v826_v51  ;;  %v843_v54 = vpack.c.bf16 %v779_v52, %v779_v52  ;;  %v795_v55 = vsel %vm667_vm8, %v538_v45, %v731_v49 }
  0xba   : > { %939 = vst.msk [vmem:[%s1355_s20 + $0x90] sm:$0xf] %vm902_vm3, %v874_v50  ;;  %v859_v56 = vpack.c.bf16 %v795_v55, %v795_v55 }
  0xbb   : > { %955 = vst.msk [vmem:[%s1355_s20 + $0xd0] sm:$0xf] %vm902_vm3, %v890_v53 }
  0xbc   : > { %908 = vst.msk [vmem:[%s1355_s20 + $0x14] sm:$0xf] %vm902_vm3, %v843_v54  ;;  %v578_v57 = vpop.f32.mrf.mxu2  ;;  %v501_v60 = vpop.f32.mrf.mxu0 }
  0xbd   : > { %v618_v58 = vpop.f32.mrf.mxu3  ;;  %924 = vst.msk [vmem:[%s1355_s20 + $0x54] sm:$0xf] %vm902_vm3, %v859_v56  ;;  %vm683_vm9 = vcmp.gt.f32.partialorder %v578_v57, 0.0  ;;  %v747_v59 = vmul.f32 0.2, %v578_v57  ;;  %v541_v61 = vpop.f32.mrf.mxu1  ;;  %vm652_vm11 = vcmp.gt.f32.partialorder %v501_v60, 0.0 }
  0xbe   : > { %vm699_vm10 = vcmp.gt.f32.partialorder %v618_v58, 0.0  ;;  %v763_v62 = vmul.f32 0.2, %v618_v58  ;;  %v716_v63 = vmul.f32 0.2, %v501_v60  ;;  %vm668_vm12 = vcmp.gt.f32.partialorder %v541_v61, 0.0 }
  0xbf   : > { %v811_v0 = vsel %vm683_vm9, %v578_v57, %v747_v59  ;;  %v732_v1 = vmul.f32 0.2, %v541_v61 }
  0xc0   : > { %v875_v2 = vpack.c.bf16 %v811_v0, %v811_v0  ;;  %v827_v3 = vsel %vm699_vm10, %v618_v58, %v763_v62  ;;  %v780_v4 = vsel %vm652_vm11, %v501_v60, %v716_v63 }
  0xc1   : > { %v891_v5 = vpack.c.bf16 %v827_v3, %v827_v3  ;;  %v844_v6 = vpack.c.bf16 %v780_v4, %v780_v4  ;;  %v796_v7 = vsel %vm668_vm12, %v541_v61, %v732_v1 }
  0xc2   : > { %940 = vst.msk [vmem:[%s1355_s20 + $0x94] sm:$0xf] %vm902_vm3, %v875_v2  ;;  %v860_v8 = vpack.c.bf16 %v796_v7, %v796_v7 }
  0xc3   : > { %956 = vst.msk [vmem:[%s1355_s20 + $0xd4] sm:$0xf] %vm902_vm3, %v891_v5 }
  0xc4   : > { %909 = vst.msk [vmem:[%s1355_s20 + $0x18] sm:$0xf] %vm902_vm3, %v844_v6  ;;  %v581_v9 = vpop.f32.mrf.mxu2  ;;  %v503_v12 = vpop.f32.mrf.mxu0 }
  0xc5   : > { %v621_v10 = vpop.f32.mrf.mxu3  ;;  %925 = vst.msk [vmem:[%s1355_s20 + $0x58] sm:$0xf] %vm902_vm3, %v860_v8  ;;  %vm684_vm13 = vcmp.gt.f32.partialorder %v581_v9, 0.0  ;;  %v748_v11 = vmul.f32 0.2, %v581_v9  ;;  %v543_v13 = vpop.f32.mrf.mxu1  ;;  %vm653_vm15 = vcmp.gt.f32.partialorder %v503_v12, 0.0 }
  0xc6   : > { %vm700_vm14 = vcmp.gt.f32.partialorder %v621_v10, 0.0  ;;  %v764_v14 = vmul.f32 0.2, %v621_v10  ;;  %v717_v15 = vmul.f32 0.2, %v503_v12  ;;  %vm669_vm0 = vcmp.gt.f32.partialorder %v543_v13, 0.0 }
  0xc7   : > { %v812_v16 = vsel %vm684_vm13, %v581_v9, %v748_v11  ;;  %v733_v17 = vmul.f32 0.2, %v543_v13 }
  0xc8   : > { %v876_v18 = vpack.c.bf16 %v812_v16, %v812_v16  ;;  %v828_v19 = vsel %vm700_vm14, %v621_v10, %v764_v14  ;;  %v781_v20 = vsel %vm653_vm15, %v503_v12, %v717_v15 }
  0xc9   : > { %v892_v21 = vpack.c.bf16 %v828_v19, %v828_v19  ;;  %v845_v22 = vpack.c.bf16 %v781_v20, %v781_v20  ;;  %v797_v23 = vsel %vm669_vm0, %v543_v13, %v733_v17 }
  0xca   : > { %941 = vst.msk [vmem:[%s1355_s20 + $0x98] sm:$0xf] %vm902_vm3, %v876_v18  ;;  %v861_v24 = vpack.c.bf16 %v797_v23, %v797_v23 }
  0xcb   : > { %957 = vst.msk [vmem:[%s1355_s20 + $0xd8] sm:$0xf] %vm902_vm3, %v892_v21 }
  0xcc   : > { %910 = vst.msk [vmem:[%s1355_s20 + $0x1c] sm:$0xf] %vm902_vm3, %v845_v22  ;;  %v583_v25 = vpop.f32.mrf.mxu2  ;;  %v506_v28 = vpop.f32.mrf.mxu0 }
  0xcd   : > { %v623_v26 = vpop.f32.mrf.mxu3  ;;  %926 = vst.msk [vmem:[%s1355_s20 + $0x5c] sm:$0xf] %vm902_vm3, %v861_v24  ;;  %vm685_vm1 = vcmp.gt.f32.partialorder %v583_v25, 0.0  ;;  %v749_v27 = vmul.f32 0.2, %v583_v25  ;;  %v546_v29 = vpop.f32.mrf.mxu1  ;;  %vm654_vm4 = vcmp.gt.f32.partialorder %v506_v28, 0.0 }
  0xce   : > { %vm701_vm2 = vcmp.gt.f32.partialorder %v623_v26, 0.0  ;;  %v765_v30 = vmul.f32 0.2, %v623_v26  ;;  %v718_v31 = vmul.f32 0.2, %v506_v28  ;;  %vm670_vm5 = vcmp.gt.f32.partialorder %v546_v29, 0.0 }
  0xcf   : > { %v813_v32 = vsel %vm685_vm1, %v583_v25, %v749_v27  ;;  %v734_v33 = vmul.f32 0.2, %v546_v29 }
  0xd0   : > { %v877_v34 = vpack.c.bf16 %v813_v32, %v813_v32  ;;  %v829_v35 = vsel %vm701_vm2, %v623_v26, %v765_v30  ;;  %v782_v36 = vsel %vm654_vm4, %v506_v28, %v718_v31 }
  0xd1   : > { %v893_v37 = vpack.c.bf16 %v829_v35, %v829_v35  ;;  %v846_v38 = vpack.c.bf16 %v782_v36, %v782_v36  ;;  %v798_v39 = vsel %vm670_vm5, %v546_v29, %v734_v33 }
  0xd2   : > { %942 = vst.msk [vmem:[%s1355_s20 + $0x9c] sm:$0xf] %vm902_vm3, %v877_v34  ;;  %v862_v40 = vpack.c.bf16 %v798_v39, %v798_v39 }
  0xd3   : > { %958 = vst.msk [vmem:[%s1355_s20 + $0xdc] sm:$0xf] %vm902_vm3, %v893_v37 }
  0xd4   : > { %911 = vst.msk [vmem:[%s1355_s20 + $0x20] sm:$0xf] %vm902_vm3, %v846_v38  ;;  %v586_v41 = vpop.f32.mrf.mxu2  ;;  %v508_v44 = vpop.f32.mrf.mxu0 }
  0xd5   : > { %v626_v42 = vpop.f32.mrf.mxu3  ;;  %927 = vst.msk [vmem:[%s1355_s20 + $0x60] sm:$0xf] %vm902_vm3, %v862_v40  ;;  %vm686_vm6 = vcmp.gt.f32.partialorder %v586_v41, 0.0  ;;  %v750_v43 = vmul.f32 0.2, %v586_v41  ;;  %v548_v45 = vpop.f32.mrf.mxu1  ;;  %vm655_vm8 = vcmp.gt.f32.partialorder %v508_v44, 0.0 }
  0xd6   : > { %vm702_vm7 = vcmp.gt.f32.partialorder %v626_v42, 0.0  ;;  %v766_v46 = vmul.f32 0.2, %v626_v42  ;;  %v719_v47 = vmul.f32 0.2, %v508_v44  ;;  %vm671_vm9 = vcmp.gt.f32.partialorder %v548_v45, 0.0 }
  0xd7   : > { %v814_v48 = vsel %vm686_vm6, %v586_v41, %v750_v43  ;;  %v735_v49 = vmul.f32 0.2, %v548_v45 }
  0xd8   : > { %v878_v50 = vpack.c.bf16 %v814_v48, %v814_v48  ;;  %v830_v51 = vsel %vm702_vm7, %v626_v42, %v766_v46  ;;  %v783_v52 = vsel %vm655_vm8, %v508_v44, %v719_v47 }
  0xd9   : > { %v894_v53 = vpack.c.bf16 %v830_v51, %v830_v51  ;;  %v847_v54 = vpack.c.bf16 %v783_v52, %v783_v52  ;;  %v799_v55 = vsel %vm671_vm9, %v548_v45, %v735_v49 }
  0xda   : > { %943 = vst.msk [vmem:[%s1355_s20 + $0xa0] sm:$0xf] %vm902_vm3, %v878_v50  ;;  %v863_v56 = vpack.c.bf16 %v799_v55, %v799_v55 }
  0xdb   : > { %959 = vst.msk [vmem:[%s1355_s20 + $0xe0] sm:$0xf] %vm902_vm3, %v894_v53 }
  0xdc   : > { %912 = vst.msk [vmem:[%s1355_s20 + $0x24] sm:$0xf] %vm902_vm3, %v847_v54  ;;  %v588_v57 = vpop.f32.mrf.mxu2  ;;  %v511_v60 = vpop.f32.mrf.mxu0 }
  0xdd   : > { %v628_v58 = vpop.f32.mrf.mxu3  ;;  %928 = vst.msk [vmem:[%s1355_s20 + $0x64] sm:$0xf] %vm902_vm3, %v863_v56  ;;  %vm687_vm10 = vcmp.gt.f32.partialorder %v588_v57, 0.0  ;;  %v751_v59 = vmul.f32 0.2, %v588_v57  ;;  %v551_v61 = vpop.f32.mrf.mxu1  ;;  %vm656_vm12 = vcmp.gt.f32.partialorder %v511_v60, 0.0 }
  0xde   : > { %vm703_vm11 = vcmp.gt.f32.partialorder %v628_v58, 0.0  ;;  %v767_v62 = vmul.f32 0.2, %v628_v58  ;;  %v720_v63 = vmul.f32 0.2, %v511_v60  ;;  %vm672_vm13 = vcmp.gt.f32.partialorder %v551_v61, 0.0 }
  0xdf   : > { %v815_v0 = vsel %vm687_vm10, %v588_v57, %v751_v59  ;;  %v736_v1 = vmul.f32 0.2, %v551_v61 }
  0xe0   : > { %v879_v2 = vpack.c.bf16 %v815_v0, %v815_v0  ;;  %v831_v3 = vsel %vm703_vm11, %v628_v58, %v767_v62  ;;  %v784_v4 = vsel %vm656_vm12, %v511_v60, %v720_v63 }
  0xe1   : > { %v895_v5 = vpack.c.bf16 %v831_v3, %v831_v3  ;;  %v848_v6 = vpack.c.bf16 %v784_v4, %v784_v4  ;;  %v800_v7 = vsel %vm672_vm13, %v551_v61, %v736_v1 }
  0xe2   : > { %944 = vst.msk [vmem:[%s1355_s20 + $0xa4] sm:$0xf] %vm902_vm3, %v879_v2  ;;  %v864_v8 = vpack.c.bf16 %v800_v7, %v800_v7 }
  0xe3   : > { %960 = vst.msk [vmem:[%s1355_s20 + $0xe4] sm:$0xf] %vm902_vm3, %v895_v5 }
  0xe4   : > { %913 = vst.msk [vmem:[%s1355_s20 + $0x28] sm:$0xf] %vm902_vm3, %v848_v6  ;;  %v591_v9 = vpop.f32.mrf.mxu2  ;;  %v513_v12 = vpop.f32.mrf.mxu0 }
  0xe5   : > { %v631_v10 = vpop.f32.mrf.mxu3  ;;  %929 = vst.msk [vmem:[%s1355_s20 + $0x68] sm:$0xf] %vm902_vm3, %v864_v8  ;;  %vm688_vm14 = vcmp.gt.f32.partialorder %v591_v9, 0.0  ;;  %v752_v11 = vmul.f32 0.2, %v591_v9  ;;  %v553_v13 = vpop.f32.mrf.mxu1  ;;  %vm657_vm0 = vcmp.gt.f32.partialorder %v513_v12, 0.0 }
  0xe6   : > { %vm704_vm15 = vcmp.gt.f32.partialorder %v631_v10, 0.0  ;;  %v768_v14 = vmul.f32 0.2, %v631_v10  ;;  %v721_v15 = vmul.f32 0.2, %v513_v12  ;;  %vm673_vm1 = vcmp.gt.f32.partialorder %v553_v13, 0.0 }
  0xe7   : > { %v816_v16 = vsel %vm688_vm14, %v591_v9, %v752_v11  ;;  %v737_v17 = vmul.f32 0.2, %v553_v13 }
  0xe8   : > { %v880_v18 = vpack.c.bf16 %v816_v16, %v816_v16  ;;  %v832_v19 = vsel %vm704_vm15, %v631_v10, %v768_v14  ;;  %v785_v20 = vsel %vm657_vm0, %v513_v12, %v721_v15 }
  0xe9   : > { %v896_v21 = vpack.c.bf16 %v832_v19, %v832_v19  ;;  %v849_v22 = vpack.c.bf16 %v785_v20, %v785_v20  ;;  %v801_v23 = vsel %vm673_vm1, %v553_v13, %v737_v17 }
  0xea   : > { %945 = vst.msk [vmem:[%s1355_s20 + $0xa8] sm:$0xf] %vm902_vm3, %v880_v18  ;;  %v865_v24 = vpack.c.bf16 %v801_v23, %v801_v23 }
  0xeb   : > { %961 = vst.msk [vmem:[%s1355_s20 + $0xe8] sm:$0xf] %vm902_vm3, %v896_v21 }
  0xec   : > { %914 = vst.msk [vmem:[%s1355_s20 + $0x2c] sm:$0xf] %vm902_vm3, %v849_v22  ;;  %v593_v25 = vpop.f32.mrf.mxu2  ;;  %v516_v28 = vpop.f32.mrf.mxu0 }
  0xed   : > { %v633_v26 = vpop.f32.mrf.mxu3  ;;  %930 = vst.msk [vmem:[%s1355_s20 + $0x6c] sm:$0xf] %vm902_vm3, %v865_v24  ;;  %vm689_vm2 = vcmp.gt.f32.partialorder %v593_v25, 0.0  ;;  %v753_v27 = vmul.f32 0.2, %v593_v25  ;;  %v556_v29 = vpop.f32.mrf.mxu1  ;;  %vm658_vm5 = vcmp.gt.f32.partialorder %v516_v28, 0.0 }
  0xee   : > { %vm705_vm4 = vcmp.gt.f32.partialorder %v633_v26, 0.0  ;;  %v769_v30 = vmul.f32 0.2, %v633_v26  ;;  %v722_v31 = vmul.f32 0.2, %v516_v28  ;;  %vm674_vm6 = vcmp.gt.f32.partialorder %v556_v29, 0.0 }
  0xef   : > { %v817_v32 = vsel %vm689_vm2, %v593_v25, %v753_v27  ;;  %v738_v33 = vmul.f32 0.2, %v556_v29 }
  0xf0   : > { %v881_v34 = vpack.c.bf16 %v817_v32, %v817_v32  ;;  %v833_v35 = vsel %vm705_vm4, %v633_v26, %v769_v30  ;;  %v786_v36 = vsel %vm658_vm5, %v516_v28, %v722_v31 }
  0xf1   : > { %v897_v37 = vpack.c.bf16 %v833_v35, %v833_v35  ;;  %v850_v38 = vpack.c.bf16 %v786_v36, %v786_v36  ;;  %v802_v39 = vsel %vm674_vm6, %v556_v29, %v738_v33 }
  0xf2   : > { %946 = vst.msk [vmem:[%s1355_s20 + $0xac] sm:$0xf] %vm902_vm3, %v881_v34  ;;  %v866_v40 = vpack.c.bf16 %v802_v39, %v802_v39 }
  0xf3   : > { %962 = vst.msk [vmem:[%s1355_s20 + $0xec] sm:$0xf] %vm902_vm3, %v897_v37 }
  0xf4   : > { %915 = vst.msk [vmem:[%s1355_s20 + $0x30] sm:$0xf] %vm902_vm3, %v850_v38  ;;  %v596_v41 = vpop.f32.mrf.mxu2  ;;  %v518_v44 = vpop.f32.mrf.mxu0 }
  0xf5   : > { %v636_v42 = vpop.f32.mrf.mxu3  ;;  %931 = vst.msk [vmem:[%s1355_s20 + $0x70] sm:$0xf] %vm902_vm3, %v866_v40  ;;  %vm690_vm7 = vcmp.gt.f32.partialorder %v596_v41, 0.0  ;;  %v754_v43 = vmul.f32 0.2, %v596_v41  ;;  %v558_v45 = vpop.f32.mrf.mxu1  ;;  %vm659_vm9 = vcmp.gt.f32.partialorder %v518_v44, 0.0 }
  0xf6   : > { %vm706_vm8 = vcmp.gt.f32.partialorder %v636_v42, 0.0  ;;  %v770_v46 = vmul.f32 0.2, %v636_v42  ;;  %v723_v47 = vmul.f32 0.2, %v518_v44  ;;  %vm675_vm10 = vcmp.gt.f32.partialorder %v558_v45, 0.0 }
  0xf7   : > { %v818_v48 = vsel %vm690_vm7, %v596_v41, %v754_v43  ;;  %v739_v49 = vmul.f32 0.2, %v558_v45 }
  0xf8   : > { %v882_v50 = vpack.c.bf16 %v818_v48, %v818_v48  ;;  %v834_v51 = vsel %vm706_vm8, %v636_v42, %v770_v46  ;;  %v787_v52 = vsel %vm659_vm9, %v518_v44, %v723_v47 }
  0xf9   : > { %v898_v53 = vpack.c.bf16 %v834_v51, %v834_v51  ;;  %v851_v54 = vpack.c.bf16 %v787_v52, %v787_v52  ;;  %v803_v55 = vsel %vm675_vm10, %v558_v45, %v739_v49 }
  0xfa   : > { %947 = vst.msk [vmem:[%s1355_s20 + $0xb0] sm:$0xf] %vm902_vm3, %v882_v50  ;;  %v867_v56 = vpack.c.bf16 %v803_v55, %v803_v55 }
  0xfb   : > { %963 = vst.msk [vmem:[%s1355_s20 + $0xf0] sm:$0xf] %vm902_vm3, %v898_v53 }
  0xfc   : > { %916 = vst.msk [vmem:[%s1355_s20 + $0x34] sm:$0xf] %vm902_vm3, %v851_v54  ;;  %v598_v57 = vpop.f32.mrf.mxu2  ;;  %v521_v60 = vpop.f32.mrf.mxu0 }
  0xfd   : > { %v638_v58 = vpop.f32.mrf.mxu3  ;;  %932 = vst.msk [vmem:[%s1355_s20 + $0x74] sm:$0xf] %vm902_vm3, %v867_v56  ;;  %vm691_vm11 = vcmp.gt.f32.partialorder %v598_v57, 0.0  ;;  %v755_v59 = vmul.f32 0.2, %v598_v57  ;;  %v561_v61 = vpop.f32.mrf.mxu1  ;;  %vm660_vm13 = vcmp.gt.f32.partialorder %v521_v60, 0.0 }
  0xfe   : > { %vm707_vm12 = vcmp.gt.f32.partialorder %v638_v58, 0.0  ;;  %v771_v62 = vmul.f32 0.2, %v638_v58  ;;  %v724_v63 = vmul.f32 0.2, %v521_v60  ;;  %vm676_vm14 = vcmp.gt.f32.partialorder %v561_v61, 0.0 }
  0xff   : > { %v819_v0 = vsel %vm691_vm11, %v598_v57, %v755_v59  ;;  %v740_v1 = vmul.f32 0.2, %v561_v61 }
 0x100   : > { %v883_v2 = vpack.c.bf16 %v819_v0, %v819_v0  ;;  %v835_v3 = vsel %vm707_vm12, %v638_v58, %v771_v62  ;;  %v788_v4 = vsel %vm660_vm13, %v521_v60, %v724_v63 }
 0x101   : > { %v899_v5 = vpack.c.bf16 %v835_v3, %v835_v3  ;;  %v852_v6 = vpack.c.bf16 %v788_v4, %v788_v4  ;;  %v804_v7 = vsel %vm676_vm14, %v561_v61, %v740_v1 }
 0x102   : > { %948 = vst.msk [vmem:[%s1355_s20 + $0xb4] sm:$0xf] %vm902_vm3, %v883_v2  ;;  %v868_v8 = vpack.c.bf16 %v804_v7, %v804_v7 }
 0x103   : > { %964 = vst.msk [vmem:[%s1355_s20 + $0xf4] sm:$0xf] %vm902_vm3, %v899_v5 }
 0x104   : > { %917 = vst.msk [vmem:[%s1355_s20 + $0x38] sm:$0xf] %vm902_vm3, %v852_v6  ;;  %v601_v9 = vpop.f32.mrf.mxu2  ;;  %v523_v12 = vpop.f32.mrf.mxu0 }
 0x105   : > { %v641_v10 = vpop.f32.mrf.mxu3  ;;  %933 = vst.msk [vmem:[%s1355_s20 + $0x78] sm:$0xf] %vm902_vm3, %v868_v8  ;;  %vm692_vm15 = vcmp.gt.f32.partialorder %v601_v9, 0.0  ;;  %v756_v11 = vmul.f32 0.2, %v601_v9  ;;  %v563_v13 = vpop.f32.mrf.mxu1  ;;  %vm661_vm1 = vcmp.gt.f32.partialorder %v523_v12, 0.0 }
 0x106   : > { %vm708_vm0 = vcmp.gt.f32.partialorder %v641_v10, 0.0  ;;  %v772_v14 = vmul.f32 0.2, %v641_v10  ;;  %v725_v15 = vmul.f32 0.2, %v523_v12  ;;  %vm677_vm2 = vcmp.gt.f32.partialorder %v563_v13, 0.0 }
 0x107   : > { %v820_v16 = vsel %vm692_vm15, %v601_v9, %v756_v11  ;;  %v741_v17 = vmul.f32 0.2, %v563_v13 }
 0x108   : > { %v884_v18 = vpack.c.bf16 %v820_v16, %v820_v16  ;;  %v836_v19 = vsel %vm708_vm0, %v641_v10, %v772_v14  ;;  %v789_v20 = vsel %vm661_vm1, %v523_v12, %v725_v15 }
 0x109   : > { %v900_v21 = vpack.c.bf16 %v836_v19, %v836_v19  ;;  %v853_v22 = vpack.c.bf16 %v789_v20, %v789_v20  ;;  %v805_v23 = vsel %vm677_vm2, %v563_v13, %v741_v17 }
 0x10a   : > { %949 = vst.msk [vmem:[%s1355_s20 + $0xb8] sm:$0xf] %vm902_vm3, %v884_v18  ;;  %v869_v24 = vpack.c.bf16 %v805_v23, %v805_v23 }
 0x10b   : > { %965 = vst.msk [vmem:[%s1355_s20 + $0xf8] sm:$0xf] %vm902_vm3, %v900_v21 }
 0x10c   : > { %918 = vst.msk [vmem:[%s1355_s20 + $0x3c] sm:$0xf] %vm902_vm3, %v853_v22  ;;  %v603_v25 = vpop.f32.mrf.mxu2 }
 0x10d   : > { %v643_v26 = vpop.f32.mrf.mxu3  ;;  %934 = vst.msk [vmem:[%s1355_s20 + $0x7c] sm:$0xf] %vm902_vm3, %v869_v24  ;;  %vm693_vm4 = vcmp.gt.f32.partialorder %v603_v25, 0.0  ;;  %v757_v27 = vmul.f32 0.2, %v603_v25 }
 0x10e   : > { %vm709_vm5 = vcmp.gt.f32.partialorder %v643_v26, 0.0  ;;  %v773_v28 = vmul.f32 0.2, %v643_v26 }
 0x10f   : > { %v821_v29 = vsel %vm693_vm4, %v603_v25, %v757_v27 }
 0x110   : > { %v885_v30 = vpack.c.bf16 %v821_v29, %v821_v29  ;;  %v837_v31 = vsel %vm709_vm5, %v643_v26, %v773_v28 }
 0x111   : > { %v901_v32 = vpack.c.bf16 %v837_v31, %v837_v31 }
 0x112   : > { %950 = vst.msk [vmem:[%s1355_s20 + $0xbc] sm:$0xf] %vm902_vm3, %v885_v30 }
 0x113   : > { %966 = vst.msk [vmem:[%s1355_s20 + $0xfc] sm:$0xf] %vm902_vm3, %v901_v32 }
 0x114 PF: > { %s12_s9 = sadd.s32 1, %s1248_s9  }
 0x115   : > { %p9_p4 = scmp.ge.s32.totalorder %s12_s9, 6  }
 0x117   :  { %11 = sbr.rel (!%p9_p4) target bundleno = 1 (0x1), region = 58 }

// kernel: discriminator_forward.9
= control target key start
LH: loop header
LB: loop body
LE: loop exit
PB: predicated region body
PF: predicated region fallthrough
CT: control target
= control target key end

     0   :  { %vm470_vm0 = vcmask 125952   ;;  %s1149_s0 = inlined_call_operand.vmem [shape: f32[512,16], index: 0, kind: input, shape index: {}]   ;;  %s1150_s1 = inlined_call_operand.vmem [shape: f32[1,16], index: 1, kind: input, shape index: {}]   ;;  %s1151_s2 = inlined_call_operand.vmem [shape: f32[1,16], index: 2, kind: input, shape index: {}]   ;;  %s1152_s3 = inlined_call_operand.vmem [shape: bf16[512,16], index: 3, kind: output, shape index: {}]  }
   0x1   :  { %v14_v0 = vld [vmem:[%s1149_s0] sm:$0xff]  ;;  %v15_v3 = vld [vmem:[%s1149_s0 + $0x8] sm:$0xff]  ;;  %v16_v6 = vld [vmem:[%s1149_s0 + $0x10] sm:$0xff] }
   0x2   :  { %v567_v1 = vld [vmem:[%s1150_s1] ss:$0 sm:$0xff]  ;;  %v17_v7 = vld [vmem:[%s1149_s0 + $0x18] sm:$0xff]  ;;  %v19_v12 = vld [vmem:[%s1149_s0 + $0x28] sm:$0xff] }
   0x3   :  { %v572_v2 = vld [vmem:[%s1151_s2] ss:$0 sm:$0xff]  ;;  %v82_v4 = vmul.f32 %v567_v1, %v14_v0  ;;  %v83_v5 = vmul.f32 %v567_v1, %v15_v3  ;;  %v84_v9 = vmul.f32 %v567_v1, %v16_v6  ;;  %v85_v10 = vmul.f32 %v567_v1, %v17_v7  ;;  %v20_v13 = vld [vmem:[%s1149_s0 + $0x30] sm:$0xff]  ;;  %v21_v14 = vld [vmem:[%s1149_s0 + $0x38] sm:$0xff] }
   0x4   :  { %v18_v8 = vld [vmem:[%s1149_s0 + $0x20] sm:$0xff]  ;;  %v87_v17 = vmul.f32 %v567_v1, %v19_v12  ;;  %v88_v18 = vmul.f32 %v567_v1, %v20_v13  ;;  %v89_v22 = vmul.f32 %v567_v1, %v21_v14  ;;  %v23_v35 = vld [vmem:[%s1149_s0 + $0x48] sm:$0xff]  ;;  %v24_v36 = vld [vmem:[%s1149_s0 + $0x50] sm:$0xff] }
   0x5   :  { %v86_v11 = vmul.f32 %v567_v1, %v18_v8  ;;  %v150_v15 = vadd.f32 %v572_v2, %v82_v4  ;;  %v151_v16 = vadd.f32 %v572_v2, %v83_v5  ;;  %v152_v19 = vadd.f32 %v572_v2, %v84_v9  ;;  %v22_v30 = vld [vmem:[%s1149_s0 + $0x40] sm:$0xff]  ;;  %v25_v54 = vld [vmem:[%s1149_s0 + $0x58] sm:$0xff]  ;;  %v27_v62 = vld [vmem:[%s1149_s0 + $0x68] sm:$0xff] }
   0x6   :  { %v153_v20 = vadd.f32 %v572_v2, %v85_v10  ;;  %v155_v40 = vadd.f32 %v572_v2, %v87_v17  ;;  %v156_v42 = vadd.f32 %v572_v2, %v88_v18  ;;  %v157_v43 = vadd.f32 %v572_v2, %v89_v22  ;;  %v26_v58 = vld [vmem:[%s1149_s0 + $0x60] sm:$0xff]  ;;  %v28_v63 = vld [vmem:[%s1149_s0 + $0x70] sm:$0xff]  ;;  %v29_v5 = vld [vmem:[%s1149_s0 + $0x78] sm:$0xff] }
   0x7   :  { %v154_v21 = vadd.f32 %v572_v2, %v86_v11  ;;  %vm214_vm1 = vcmp.gt.f32.partialorder %v150_v15, 0.0  ;;  %v278_v23 = vmul.f32 0.2, %v150_v15  ;;  %vm215_vm2 = vcmp.gt.f32.partialorder %v151_v16, 0.0  ;;  %v30_v10 = vld [vmem:[%s1149_s0 + $0x80] sm:$0xff]  ;;  %v31_v11 = vld [vmem:[%s1149_s0 + $0x88] sm:$0xff] }
   0x8   :  { %v279_v24 = vmul.f32 0.2, %v151_v16  ;;  %vm216_vm3 = vcmp.gt.f32.partialorder %v152_v19, 0.0  ;;  %v280_v25 = vmul.f32 0.2, %v152_v19  ;;  %vm217_vm4 = vcmp.gt.f32.partialorder %v153_v20, 0.0 }
   0x9   :  { %v281_v26 = vmul.f32 0.2, %v153_v20  ;;  %v342_v27 = vsel %vm214_vm1, %v150_v15, %v278_v23  ;;  %vm218_vm5 = vcmp.gt.f32.partialorder %v154_v21, 0.0  ;;  %v282_v29 = vmul.f32 0.2, %v154_v21 }
   0xa   :  { %v343_v28 = vsel %vm215_vm2, %v151_v16, %v279_v24  ;;  %v406_v31 = vpack.c.bf16 %v342_v27, %v342_v27  ;;  %v344_v33 = vsel %vm216_vm3, %v152_v19, %v280_v25  ;;  %v90_v44 = vmul.f32 %v567_v1, %v22_v30 }
   0xb   :  { %v407_v32 = vpack.c.bf16 %v343_v28, %v343_v28  ;;  %v345_v34 = vsel %vm217_vm4, %v153_v20, %v281_v26  ;;  %v408_v37 = vpack.c.bf16 %v344_v33, %v344_v33  ;;  %v346_v39 = vsel %vm218_vm5, %v154_v21, %v282_v29 }
   0xc   :  { %v409_v38 = vpack.c.bf16 %v345_v34, %v345_v34  ;;  %471 = vst.msk [vmem:[%s1152_s3] sm:$0xf] %vm470_vm0, %v406_v31  ;;  %v410_v41 = vpack.c.bf16 %v346_v39, %v346_v39  ;;  %vm219_vm6 = vcmp.gt.f32.partialorder %v155_v40, 0.0  ;;  %v283_v45 = vmul.f32 0.2, %v155_v40 }
   0xd   :  { %472 = vst.msk [vmem:[%s1152_s3 + $0x4] sm:$0xf] %vm470_vm0, %v407_v32  ;;  %v91_v46 = vmul.f32 %v567_v1, %v23_v35  ;;  %v92_v47 = vmul.f32 %v567_v1, %v24_v36  ;;  %vm220_vm7 = vcmp.gt.f32.partialorder %v156_v42, 0.0  ;;  %v284_v48 = vmul.f32 0.2, %v156_v42  ;;  %v32_v35 = vld [vmem:[%s1149_s0 + $0x90] sm:$0xff] }
   0xe   :  { %473 = vst.msk [vmem:[%s1152_s3 + $0x8] sm:$0xf] %vm470_vm0, %v408_v37  ;;  %vm221_vm8 = vcmp.gt.f32.partialorder %v157_v43, 0.0  ;;  %v158_v49 = vadd.f32 %v572_v2, %v90_v44  ;;  %v347_v50 = vsel %vm219_vm6, %v155_v40, %v283_v45  ;;  %v285_v51 = vmul.f32 0.2, %v157_v43  ;;  %v33_v36 = vld [vmem:[%s1149_s0 + $0x98] sm:$0xff] }
   0xf   :  { %474 = vst.msk [vmem:[%s1152_s3 + $0xc] sm:$0xf] %vm470_vm0, %v409_v38  ;;  %v159_v52 = vadd.f32 %v572_v2, %v91_v46  ;;  %v160_v53 = vadd.f32 %v572_v2, %v92_v47  ;;  %v411_v55 = vpack.c.bf16 %v347_v50, %v347_v50  ;;  %v348_v56 = vsel %vm220_vm7, %v156_v42, %v284_v48  ;;  %v34_v37 = vld [vmem:[%s1149_s0 + $0xa0] sm:$0xff]  ;;  %v35_v42 = vld [vmem:[%s1149_s0 + $0xa8] sm:$0xff]  ;;  %v37_v44 = vld [vmem:[%s1149_s0 + $0xb8] sm:$0xff] }
  0x10   :  { %475 = vst.msk [vmem:[%s1152_s3 + $0x10] sm:$0xf] %vm470_vm0, %v410_v41  ;;  %vm222_vm9 = vcmp.gt.f32.partialorder %v158_v49, 0.0  ;;  %v286_v57 = vmul.f32 0.2, %v158_v49  ;;  %v412_v59 = vpack.c.bf16 %v348_v56, %v348_v56  ;;  %v349_v60 = vsel %vm221_vm8, %v157_v43, %v285_v51  ;;  %v36_v43 = vld [vmem:[%s1149_s0 + $0xb0] sm:$0xff] }
  0x11   :  { %vm223_vm10 = vcmp.gt.f32.partialorder %v159_v52, 0.0  ;;  %v287_v61 = vmul.f32 0.2, %v159_v52  ;;  %476 = vst.msk [vmem:[%s1152_s3 + $0x14] sm:$0xf] %vm470_vm0, %v411_v55  ;;  %v413_v0 = vpack.c.bf16 %v349_v60, %v349_v60  ;;  %vm224_vm11 = vcmp.gt.f32.partialorder %v160_v53, 0.0 }
  0x12   :  { %v350_v3 = vsel %vm222_vm9, %v158_v49, %v286_v57  ;;  %v288_v4 = vmul.f32 0.2, %v160_v53  ;;  %477 = vst.msk [vmem:[%s1152_s3 + $0x18] sm:$0xf] %vm470_vm0, %v412_v59  ;;  %v93_v8 = vmul.f32 %v567_v1, %v25_v54  ;;  %v94_v9 = vmul.f32 %v567_v1, %v26_v58 }
  0x13   :  { %v414_v6 = vpack.c.bf16 %v350_v3, %v350_v3  ;;  %v351_v7 = vsel %vm223_vm10, %v159_v52, %v287_v61  ;;  %478 = vst.msk [vmem:[%s1152_s3 + $0x1c] sm:$0xf] %vm470_vm0, %v413_v0  ;;  %v95_v14 = vmul.f32 %v567_v1, %v27_v62  ;;  %v96_v15 = vmul.f32 %v567_v1, %v28_v63 }
  0x14   :  { %v415_v12 = vpack.c.bf16 %v351_v7, %v351_v7  ;;  %v352_v13 = vsel %vm224_vm11, %v160_v53, %v288_v4  ;;  %v161_v17 = vadd.f32 %v572_v2, %v93_v8  ;;  %v162_v18 = vadd.f32 %v572_v2, %v94_v9 }
  0x15   :  { %479 = vst.msk [vmem:[%s1152_s3 + $0x20] sm:$0xf] %vm470_vm0, %v414_v6  ;;  %v416_v16 = vpack.c.bf16 %v352_v13, %v352_v13  ;;  %v97_v19 = vmul.f32 %v567_v1, %v29_v5  ;;  %v163_v20 = vadd.f32 %v572_v2, %v95_v14  ;;  %v164_v21 = vadd.f32 %v572_v2, %v96_v15  ;;  %v38_v6 = vld [vmem:[%s1149_s0 + $0xc0] sm:$0xff]  ;;  %v40_v14 = vld [vmem:[%s1149_s0 + $0xd0] sm:$0xff] }
  0x16   :  { %480 = vst.msk [vmem:[%s1152_s3 + $0x24] sm:$0xf] %vm470_vm0, %v415_v12  ;;  %v98_v22 = vmul.f32 %v567_v1, %v30_v10  ;;  %v99_v23 = vmul.f32 %v567_v1, %v31_v11  ;;  %vm225_vm12 = vcmp.gt.f32.partialorder %v161_v17, 0.0  ;;  %v289_v24 = vmul.f32 0.2, %v161_v17  ;;  %v39_v10 = vld [vmem:[%s1149_s0 + $0xc8] sm:$0xff] }
  0x17   :  { %481 = vst.msk [vmem:[%s1152_s3 + $0x28] sm:$0xf] %vm470_vm0, %v416_v16  ;;  %vm226_vm13 = vcmp.gt.f32.partialorder %v162_v18, 0.0  ;;  %v165_v25 = vadd.f32 %v572_v2, %v97_v19  ;;  %v290_v26 = vmul.f32 0.2, %v162_v18  ;;  %vm227_vm14 = vcmp.gt.f32.partialorder %v163_v20, 0.0 }
  0x18   :  { %v291_v27 = vmul.f32 0.2, %v163_v20  ;;  %vm228_vm15 = vcmp.gt.f32.partialorder %v164_v21, 0.0  ;;  %v353_v28 = vsel %vm225_vm12, %v161_v17, %v289_v24  ;;  %v292_v29 = vmul.f32 0.2, %v164_v21  ;;  %v42_v19 = vld [vmem:[%s1149_s0 + $0xe0] sm:$0xff] }
  0x19   :  { %vm229_vm1 = vcmp.gt.f32.partialorder %v165_v25, 0.0  ;;  %v293_v30 = vmul.f32 0.2, %v165_v25  ;;  %v417_v31 = vpack.c.bf16 %v353_v28, %v353_v28  ;;  %v354_v32 = vsel %vm226_vm13, %v162_v18, %v290_v26  ;;  %v41_v18 = vld [vmem:[%s1149_s0 + $0xd8] sm:$0xff] }
  0x1a   :  { %v355_v33 = vsel %vm227_vm14, %v163_v20, %v291_v27  ;;  %v166_v34 = vadd.f32 %v572_v2, %v98_v22  ;;  %v418_v38 = vpack.c.bf16 %v354_v32, %v354_v32  ;;  %v356_v40 = vsel %vm228_vm15, %v164_v21, %v292_v29  ;;  %v43_v20 = vld [vmem:[%s1149_s0 + $0xe8] sm:$0xff]  ;;  %v44_v29 = vld [vmem:[%s1149_s0 + $0xf0] sm:$0xff] }
  0x1b   :  { %v419_v39 = vpack.c.bf16 %v355_v33, %v355_v33  ;;  %v357_v41 = vsel %vm229_vm1, %v165_v25, %v293_v30  ;;  %482 = vst.msk [vmem:[%s1152_s3 + $0x2c] sm:$0xf] %vm470_vm0, %v417_v31  ;;  %v420_v45 = vpack.c.bf16 %v356_v40, %v356_v40  ;;  %v167_v48 = vadd.f32 %v572_v2, %v99_v23 }
  0x1c   :  { %v421_v46 = vpack.c.bf16 %v357_v41, %v357_v41  ;;  %vm230_vm2 = vcmp.gt.f32.partialorder %v166_v34, 0.0  ;;  %v294_v47 = vmul.f32 0.2, %v166_v34  ;;  %483 = vst.msk [vmem:[%s1152_s3 + $0x30] sm:$0xf] %vm470_vm0, %v418_v38  ;;  %v100_v49 = vmul.f32 %v567_v1, %v32_v35 }
  0x1d   :  { %v101_v50 = vmul.f32 %v567_v1, %v33_v36  ;;  %v102_v51 = vmul.f32 %v567_v1, %v34_v37  ;;  %484 = vst.msk [vmem:[%s1152_s3 + $0x34] sm:$0xf] %vm470_vm0, %v419_v39  ;;  %v103_v53 = vmul.f32 %v567_v1, %v35_v42  ;;  %v104_v54 = vmul.f32 %v567_v1, %v36_v43 }
  0x1e   :  { %v358_v52 = vsel %vm230_vm2, %v166_v34, %v294_v47  ;;  %v105_v55 = vmul.f32 %v567_v1, %v37_v44  ;;  %485 = vst.msk [vmem:[%s1152_s3 + $0x38] sm:$0xf] %vm470_vm0, %v420_v45  ;;  %vm231_vm3 = vcmp.gt.f32.partialorder %v167_v48, 0.0  ;;  %v295_v57 = vmul.f32 0.2, %v167_v48  ;;  %v45_v34 = vld [vmem:[%s1149_s0 + $0xf8] sm:$0xff] }
  0x1f   :  { %v422_v56 = vpack.c.bf16 %v358_v52, %v358_v52  ;;  %v168_v58 = vadd.f32 %v572_v2, %v100_v49  ;;  %486 = vst.msk [vmem:[%s1152_s3 + $0x3c] sm:$0xf] %vm470_vm0, %v421_v46  ;;  %v169_v59 = vadd.f32 %v572_v2, %v101_v50  ;;  %v170_v60 = vadd.f32 %v572_v2, %v102_v51 }
  0x20   :  { %v171_v61 = vadd.f32 %v572_v2, %v103_v53  ;;  %v172_v62 = vadd.f32 %v572_v2, %v104_v54  ;;  %v359_v63 = vsel %vm231_vm3, %v167_v48, %v295_v57  ;;  %v173_v3 = vadd.f32 %v572_v2, %v105_v55  ;;  %v46_v53 = vld [vmem:[%s1149_s0 + $0x100] sm:$0xff]  ;;  %v47_v54 = vld [vmem:[%s1149_s0 + $0x108] sm:$0xff]  ;;  %v48_v55 = vld [vmem:[%s1149_s0 + $0x110] sm:$0xff] }
  0x21   :  { %487 = vst.msk [vmem:[%s1152_s3 + $0x40] sm:$0xf] %vm470_vm0, %v422_v56  ;;  %vm232_vm4 = vcmp.gt.f32.partialorder %v168_v58, 0.0  ;;  %v296_v0 = vmul.f32 0.2, %v168_v58  ;;  %v423_v4 = vpack.c.bf16 %v359_v63, %v359_v63  ;;  %vm233_vm5 = vcmp.gt.f32.partialorder %v169_v59, 0.0 }
  0x22   :  { %v297_v5 = vmul.f32 0.2, %v169_v59  ;;  %vm234_vm6 = vcmp.gt.f32.partialorder %v170_v60, 0.0  ;;  %v298_v8 = vmul.f32 0.2, %v170_v60  ;;  %vm235_vm7 = vcmp.gt.f32.partialorder %v171_v61, 0.0 }
  0x23   :  { %v360_v7 = vsel %vm232_vm4, %v168_v58, %v296_v0  ;;  %v299_v9 = vmul.f32 0.2, %v171_v61  ;;  %488 = vst.msk [vmem:[%s1152_s3 + $0x44] sm:$0xf] %vm470_vm0, %v423_v4  ;;  %vm236_vm8 = vcmp.gt.f32.partialorder %v172_v62, 0.0  ;;  %vm237_vm9 = vcmp.gt.f32.partialorder %v173_v3, 0.0 }
  0x24   :  { %v424_v11 = vpack.c.bf16 %v360_v7, %v360_v7  ;;  %v361_v12 = vsel %vm233_vm5, %v169_v59, %v297_v5  ;;  %v300_v13 = vmul.f32 0.2, %v172_v62  ;;  %v362_v16 = vsel %vm234_vm6, %v170_v60, %v298_v8  ;;  %v49_v60 = vld [vmem:[%s1149_s0 + $0x118] sm:$0xff] }
  0x25   :  { %v425_v15 = vpack.c.bf16 %v361_v12, %v361_v12  ;;  %v363_v17 = vsel %vm235_vm7, %v171_v61, %v299_v9  ;;  %v426_v21 = vpack.c.bf16 %v362_v16, %v362_v16  ;;  %v301_v24 = vmul.f32 0.2, %v173_v3 }
  0x26   :  { %489 = vst.msk [vmem:[%s1152_s3 + $0x48] sm:$0xf] %vm470_vm0, %v424_v11  ;;  %v427_v22 = vpack.c.bf16 %v363_v17, %v363_v17  ;;  %v364_v23 = vsel %vm236_vm8, %v172_v62, %v300_v13  ;;  %v106_v26 = vmul.f32 %v567_v1, %v38_v6  ;;  %v107_v27 = vmul.f32 %v567_v1, %v39_v10  ;;  %v50_v17 = vld [vmem:[%s1149_s0 + $0x120] sm:$0xff] }
  0x27   :  { %490 = vst.msk [vmem:[%s1152_s3 + $0x4c] sm:$0xf] %vm470_vm0, %v425_v15  ;;  %v428_v25 = vpack.c.bf16 %v364_v23, %v364_v23  ;;  %v108_v28 = vmul.f32 %v567_v1, %v40_v14  ;;  %v365_v30 = vsel %vm237_vm9, %v173_v3, %v301_v24  ;;  %v109_v31 = vmul.f32 %v567_v1, %v41_v18  ;;  %v52_v24 = vld [vmem:[%s1149_s0 + $0x130] sm:$0xff] }
  0x28   :  { %491 = vst.msk [vmem:[%s1152_s3 + $0x50] sm:$0xf] %vm470_vm0, %v426_v21  ;;  %v110_v32 = vmul.f32 %v567_v1, %v42_v19  ;;  %v111_v33 = vmul.f32 %v567_v1, %v43_v20  ;;  %v429_v35 = vpack.c.bf16 %v365_v30, %v365_v30  ;;  %v174_v36 = vadd.f32 %v572_v2, %v106_v26  ;;  %v51_v21 = vld [vmem:[%s1149_s0 + $0x128] sm:$0xff] }
  0x29   :  { %492 = vst.msk [vmem:[%s1152_s3 + $0x54] sm:$0xf] %vm470_vm0, %v427_v22  ;;  %v175_v37 = vadd.f32 %v572_v2, %v107_v27  ;;  %v176_v38 = vadd.f32 %v572_v2, %v108_v28  ;;  %v177_v39 = vadd.f32 %v572_v2, %v109_v31  ;;  %v112_v42 = vmul.f32 %v567_v1, %v44_v29  ;;  %v53_v28 = vld [vmem:[%s1149_s0 + $0x138] sm:$0xff] }
  0x2a   :  { %493 = vst.msk [vmem:[%s1152_s3 + $0x58] sm:$0xf] %vm470_vm0, %v428_v25  ;;  %v178_v40 = vadd.f32 %v572_v2, %v110_v32  ;;  %v179_v41 = vadd.f32 %v572_v2, %v111_v33  ;;  %vm238_vm10 = vcmp.gt.f32.partialorder %v174_v36, 0.0  ;;  %v302_v43 = vmul.f32 0.2, %v174_v36 }
  0x2b   :  { %494 = vst.msk [vmem:[%s1152_s3 + $0x5c] sm:$0xf] %vm470_vm0, %v429_v35  ;;  %vm239_vm11 = vcmp.gt.f32.partialorder %v175_v37, 0.0  ;;  %v113_v44 = vmul.f32 %v567_v1, %v45_v34  ;;  %v303_v45 = vmul.f32 0.2, %v175_v37  ;;  %vm240_vm12 = vcmp.gt.f32.partialorder %v176_v38, 0.0 }
  0x2c   :  { %v304_v46 = vmul.f32 0.2, %v176_v38  ;;  %vm241_vm13 = vcmp.gt.f32.partialorder %v177_v39, 0.0  ;;  %v366_v47 = vsel %vm238_vm10, %v174_v36, %v302_v43  ;;  %v305_v48 = vmul.f32 0.2, %v177_v39 }
  0x2d   :  { %vm242_vm14 = vcmp.gt.f32.partialorder %v178_v40, 0.0  ;;  %v306_v49 = vmul.f32 0.2, %v178_v40  ;;  %v430_v50 = vpack.c.bf16 %v366_v47, %v366_v47  ;;  %v367_v51 = vsel %vm239_vm11, %v175_v37, %v303_v45  ;;  %v54_v37 = vld [vmem:[%s1149_s0 + $0x140] sm:$0xff] }
  0x2e   :  { %v368_v52 = vsel %vm240_vm12, %v176_v38, %v304_v46  ;;  %vm243_vm15 = vcmp.gt.f32.partialorder %v179_v41, 0.0  ;;  %v431_v56 = vpack.c.bf16 %v367_v51, %v367_v51  ;;  %v369_v58 = vsel %vm241_vm13, %v177_v39, %v305_v48 }
  0x2f   :  { %v432_v57 = vpack.c.bf16 %v368_v52, %v368_v52  ;;  %v370_v59 = vsel %vm242_vm14, %v178_v40, %v306_v49  ;;  %495 = vst.msk [vmem:[%s1152_s3 + $0x60] sm:$0xf] %vm470_vm0, %v430_v50  ;;  %v433_v61 = vpack.c.bf16 %v369_v58, %v369_v58  ;;  %v307_v63 = vmul.f32 0.2, %v179_v41  ;;  %v56_v49 = vld [vmem:[%s1149_s0 + $0x150] sm:$0xff] }
  0x30   :  { %v434_v62 = vpack.c.bf16 %v370_v59, %v370_v59  ;;  %v180_v0 = vadd.f32 %v572_v2, %v112_v42  ;;  %496 = vst.msk [vmem:[%s1152_s3 + $0x64] sm:$0xf] %vm470_vm0, %v431_v56  ;;  %v181_v3 = vadd.f32 %v572_v2, %v113_v44  ;;  %v114_v4 = vmul.f32 %v567_v1, %v46_v53  ;;  %v55_v42 = vld [vmem:[%s1149_s0 + $0x148] sm:$0xff]  ;;  %v57_v53 = vld [vmem:[%s1149_s0 + $0x158] sm:$0xff] }
  0x31   :  { %v115_v5 = vmul.f32 %v567_v1, %v47_v54  ;;  %v116_v6 = vmul.f32 %v567_v1, %v48_v55  ;;  %497 = vst.msk [vmem:[%s1152_s3 + $0x68] sm:$0xf] %vm470_vm0, %v432_v57  ;;  %v371_v7 = vsel %vm243_vm15, %v179_v41, %v307_v63  ;;  %v117_v9 = vmul.f32 %v567_v1, %v49_v60 }
  0x32   :  { %vm244_vm1 = vcmp.gt.f32.partialorder %v180_v0, 0.0  ;;  %v308_v8 = vmul.f32 0.2, %v180_v0  ;;  %498 = vst.msk [vmem:[%s1152_s3 + $0x6c] sm:$0xf] %vm470_vm0, %v433_v61  ;;  %v435_v10 = vpack.c.bf16 %v371_v7, %v371_v7  ;;  %vm245_vm2 = vcmp.gt.f32.partialorder %v181_v3, 0.0 }
  0x33   :  { %v309_v11 = vmul.f32 0.2, %v181_v3  ;;  %v182_v12 = vadd.f32 %v572_v2, %v114_v4  ;;  %499 = vst.msk [vmem:[%s1152_s3 + $0x70] sm:$0xf] %vm470_vm0, %v434_v62  ;;  %v183_v14 = vadd.f32 %v572_v2, %v115_v5  ;;  %v184_v15 = vadd.f32 %v572_v2, %v116_v6  ;;  %v58_v61 = vld [vmem:[%s1149_s0 + $0x160] sm:$0xff]  ;;  %v59_v4 = vld [vmem:[%s1149_s0 + $0x168] sm:$0xff] }
  0x34   :  { %v372_v13 = vsel %vm244_vm1, %v180_v0, %v308_v8  ;;  %v185_v16 = vadd.f32 %v572_v2, %v117_v9  ;;  %500 = vst.msk [vmem:[%s1152_s3 + $0x74] sm:$0xf] %vm470_vm0, %v435_v10  ;;  %v118_v27 = vmul.f32 %v567_v1, %v50_v17  ;;  %v119_v32 = vmul.f32 %v567_v1, %v51_v21  ;;  %v60_v5 = vld [vmem:[%s1149_s0 + $0x170] sm:$0xff]  ;;  %v61_v6 = vld [vmem:[%s1149_s0 + $0x178] sm:$0xff] }
  0x35   :  { %v436_v18 = vpack.c.bf16 %v372_v13, %v372_v13  ;;  %v373_v19 = vsel %vm245_vm2, %v181_v3, %v309_v11  ;;  %vm246_vm3 = vcmp.gt.f32.partialorder %v182_v12, 0.0  ;;  %v310_v20 = vmul.f32 0.2, %v182_v12 }
  0x36   :  { %v437_v22 = vpack.c.bf16 %v373_v19, %v373_v19  ;;  %vm247_vm4 = vcmp.gt.f32.partialorder %v183_v14, 0.0  ;;  %v311_v23 = vmul.f32 0.2, %v183_v14  ;;  %vm248_vm5 = vcmp.gt.f32.partialorder %v184_v15, 0.0 }
  0x37   :  { %501 = vst.msk [vmem:[%s1152_s3 + $0x78] sm:$0xf] %vm470_vm0, %v436_v18  ;;  %v374_v25 = vsel %vm246_vm3, %v182_v12, %v310_v20  ;;  %v312_v26 = vmul.f32 0.2, %v184_v15  ;;  %vm249_vm6 = vcmp.gt.f32.partialorder %v185_v16, 0.0  ;;  %v186_v35 = vadd.f32 %v572_v2, %v118_v27  ;;  %v62_v27 = vld [vmem:[%s1149_s0 + $0x180] sm:$0xff] }
  0x38   :  { %502 = vst.msk [vmem:[%s1152_s3 + $0x7c] sm:$0xf] %vm470_vm0, %v437_v22  ;;  %v438_v29 = vpack.c.bf16 %v374_v25, %v374_v25  ;;  %v375_v30 = vsel %vm247_vm4, %v183_v14, %v311_v23  ;;  %v313_v31 = vmul.f32 0.2, %v185_v16  ;;  %v120_v36 = vmul.f32 %v567_v1, %v52_v24 }
  0x39   :  { %v439_v33 = vpack.c.bf16 %v375_v30, %v375_v30  ;;  %v376_v34 = vsel %vm248_vm5, %v184_v15, %v312_v26  ;;  %v187_v40 = vadd.f32 %v572_v2, %v119_v32  ;;  %v121_v41 = vmul.f32 %v567_v1, %v53_v28 }
  0x3a   :  { %503 = vst.msk [vmem:[%s1152_s3 + $0x80] sm:$0xf] %vm470_vm0, %v438_v29  ;;  %v440_v38 = vpack.c.bf16 %v376_v34, %v376_v34  ;;  %v377_v39 = vsel %vm249_vm6, %v185_v16, %v313_v31  ;;  %vm250_vm7 = vcmp.gt.f32.partialorder %v186_v35, 0.0  ;;  %v314_v44 = vmul.f32 0.2, %v186_v35  ;;  %v63_v31 = vld [vmem:[%s1149_s0 + $0x188] sm:$0xff] }
  0x3b   :  { %504 = vst.msk [vmem:[%s1152_s3 + $0x84] sm:$0xf] %vm470_vm0, %v439_v33  ;;  %v441_v43 = vpack.c.bf16 %v377_v39, %v377_v39  ;;  %v188_v45 = vadd.f32 %v572_v2, %v120_v36  ;;  %vm251_vm8 = vcmp.gt.f32.partialorder %v187_v40, 0.0  ;;  %v315_v46 = vmul.f32 0.2, %v187_v40  ;;  %v64_v34 = vld [vmem:[%s1149_s0 + $0x190] sm:$0xff] }
  0x3c   :  { %505 = vst.msk [vmem:[%s1152_s3 + $0x88] sm:$0xf] %vm470_vm0, %v440_v38  ;;  %v189_v47 = vadd.f32 %v572_v2, %v121_v41  ;;  %v122_v48 = vmul.f32 %v567_v1, %v54_v37  ;;  %v378_v50 = vsel %vm250_vm7, %v186_v35, %v314_v44  ;;  %v123_v52 = vmul.f32 %v567_v1, %v55_v42  ;;  %v65_v38 = vld [vmem:[%s1149_s0 + $0x198] sm:$0xff] }
  0x3d   :  { %506 = vst.msk [vmem:[%s1152_s3 + $0x8c] sm:$0xf] %vm470_vm0, %v441_v43  ;;  %vm252_vm9 = vcmp.gt.f32.partialorder %v188_v45, 0.0  ;;  %v316_v51 = vmul.f32 0.2, %v188_v45  ;;  %v442_v54 = vpack.c.bf16 %v378_v50, %v378_v50  ;;  %v379_v55 = vsel %vm251_vm8, %v187_v40, %v315_v46 }
  0x3e   :  { %vm253_vm10 = vcmp.gt.f32.partialorder %v189_v47, 0.0  ;;  %v317_v56 = vmul.f32 0.2, %v189_v47  ;;  %v443_v57 = vpack.c.bf16 %v379_v55, %v379_v55  ;;  %v190_v59 = vadd.f32 %v572_v2, %v122_v48 }
  0x3f   :  { %v380_v58 = vsel %vm252_vm9, %v188_v45, %v316_v51  ;;  %v191_v60 = vadd.f32 %v572_v2, %v123_v52  ;;  %507 = vst.msk [vmem:[%s1152_s3 + $0x90] sm:$0xf] %vm470_vm0, %v442_v54  ;;  %v124_v0 = vmul.f32 %v567_v1, %v56_v49  ;;  %v125_v3 = vmul.f32 %v567_v1, %v57_v53  ;;  %v67_v52 = vld [vmem:[%s1149_s0 + $0x1a8] sm:$0xff] }
  0x40   :  { %v444_v62 = vpack.c.bf16 %v380_v58, %v380_v58  ;;  %v381_v63 = vsel %vm253_vm10, %v189_v47, %v317_v56  ;;  %508 = vst.msk [vmem:[%s1152_s3 + $0x94] sm:$0xf] %vm470_vm0, %v443_v57  ;;  %vm254_vm11 = vcmp.gt.f32.partialorder %v190_v59, 0.0  ;;  %v318_v8 = vmul.f32 0.2, %v190_v59  ;;  %v66_v47 = vld [vmem:[%s1149_s0 + $0x1a0] sm:$0xff] }
  0x41   :  { %v445_v7 = vpack.c.bf16 %v381_v63, %v381_v63  ;;  %vm255_vm12 = vcmp.gt.f32.partialorder %v191_v60, 0.0  ;;  %v319_v9 = vmul.f32 0.2, %v191_v60  ;;  %v192_v10 = vadd.f32 %v572_v2, %v124_v0  ;;  %v69_v63 = vld [vmem:[%s1149_s0 + $0x1b8] sm:$0xff] }
  0x42   :  { %509 = vst.msk [vmem:[%s1152_s3 + $0x98] sm:$0xf] %vm470_vm0, %v444_v62  ;;  %v193_v11 = vadd.f32 %v572_v2, %v125_v3  ;;  %v126_v12 = vmul.f32 %v567_v1, %v58_v61  ;;  %v382_v13 = vsel %vm254_vm11, %v190_v59, %v318_v8  ;;  %v127_v14 = vmul.f32 %v567_v1, %v59_v4  ;;  %v68_v59 = vld [vmem:[%s1149_s0 + $0x1b0] sm:$0xff] }
  0x43   :  { %510 = vst.msk [vmem:[%s1152_s3 + $0x9c] sm:$0xf] %vm470_vm0, %v445_v7  ;;  %v128_v15 = vmul.f32 %v567_v1, %v60_v5  ;;  %v129_v16 = vmul.f32 %v567_v1, %v61_v6  ;;  %v446_v17 = vpack.c.bf16 %v382_v13, %v382_v13  ;;  %v383_v18 = vsel %vm255_vm12, %v191_v60, %v319_v9  ;;  %v70_v9 = vld [vmem:[%s1149_s0 + $0x1c0] sm:$0xff] }
  0x44   :  { %vm256_vm13 = vcmp.gt.f32.partialorder %v192_v10, 0.0  ;;  %v320_v19 = vmul.f32 0.2, %v192_v10  ;;  %v447_v20 = vpack.c.bf16 %v383_v18, %v383_v18  ;;  %vm257_vm14 = vcmp.gt.f32.partialorder %v193_v11, 0.0 }
  0x45   :  { %v321_v21 = vmul.f32 0.2, %v193_v11  ;;  %v194_v22 = vadd.f32 %v572_v2, %v126_v12  ;;  %511 = vst.msk [vmem:[%s1152_s3 + $0xa0] sm:$0xf] %vm470_vm0, %v446_v17  ;;  %v195_v24 = vadd.f32 %v572_v2, %v127_v14  ;;  %v196_v25 = vadd.f32 %v572_v2, %v128_v15  ;;  %v71_v14 = vld [vmem:[%s1149_s0 + $0x1c8] sm:$0xff]  ;;  %v72_v15 = vld [vmem:[%s1149_s0 + $0x1d0] sm:$0xff] }
  0x46   :  { %v384_v23 = vsel %vm256_vm13, %v192_v10, %v320_v19  ;;  %v197_v26 = vadd.f32 %v572_v2, %v129_v16  ;;  %512 = vst.msk [vmem:[%s1152_s3 + $0xa4] sm:$0xf] %vm470_vm0, %v447_v20  ;;  %v130_v37 = vmul.f32 %v567_v1, %v62_v27  ;;  %v131_v42 = vmul.f32 %v567_v1, %v63_v31  ;;  %v73_v16 = vld [vmem:[%s1149_s0 + $0x1d8] sm:$0xff] }
  0x47   :  { %v448_v28 = vpack.c.bf16 %v384_v23, %v384_v23  ;;  %v385_v29 = vsel %vm257_vm14, %v193_v11, %v321_v21  ;;  %vm258_vm15 = vcmp.gt.f32.partialorder %v194_v22, 0.0  ;;  %v322_v30 = vmul.f32 0.2, %v194_v22 }
  0x48   :  { %v449_v32 = vpack.c.bf16 %v385_v29, %v385_v29  ;;  %vm259_vm1 = vcmp.gt.f32.partialorder %v195_v24, 0.0  ;;  %v323_v33 = vmul.f32 0.2, %v195_v24  ;;  %vm260_vm2 = vcmp.gt.f32.partialorder %v196_v25, 0.0 }
  0x49   :  { %513 = vst.msk [vmem:[%s1152_s3 + $0xa8] sm:$0xf] %vm470_vm0, %v448_v28  ;;  %v386_v35 = vsel %vm258_vm15, %v194_v22, %v322_v30  ;;  %v324_v36 = vmul.f32 0.2, %v196_v25  ;;  %vm261_vm3 = vcmp.gt.f32.partialorder %v197_v26, 0.0  ;;  %v198_v45 = vadd.f32 %v572_v2, %v130_v37  ;;  %v74_v37 = vld [vmem:[%s1149_s0 + $0x1e0] sm:$0xff] }
  0x4a   :  { %514 = vst.msk [vmem:[%s1152_s3 + $0xac] sm:$0xf] %vm470_vm0, %v449_v32  ;;  %v450_v39 = vpack.c.bf16 %v386_v35, %v386_v35  ;;  %v387_v40 = vsel %vm259_vm1, %v195_v24, %v323_v33  ;;  %v325_v41 = vmul.f32 0.2, %v197_v26  ;;  %v132_v46 = vmul.f32 %v567_v1, %v64_v34 }
  0x4b   :  { %v451_v43 = vpack.c.bf16 %v387_v40, %v387_v40  ;;  %v388_v44 = vsel %vm260_vm2, %v196_v25, %v324_v36  ;;  %v199_v50 = vadd.f32 %v572_v2, %v131_v42  ;;  %v133_v51 = vmul.f32 %v567_v1, %v65_v38 }
  0x4c   :  { %515 = vst.msk [vmem:[%s1152_s3 + $0xb0] sm:$0xf] %vm470_vm0, %v450_v39  ;;  %v452_v48 = vpack.c.bf16 %v388_v44, %v388_v44  ;;  %v389_v49 = vsel %vm261_vm3, %v197_v26, %v325_v41  ;;  %vm262_vm4 = vcmp.gt.f32.partialorder %v198_v45, 0.0  ;;  %v326_v54 = vmul.f32 0.2, %v198_v45  ;;  %v75_v41 = vld [vmem:[%s1149_s0 + $0x1e8] sm:$0xff] }
  0x4d   :  { %516 = vst.msk [vmem:[%s1152_s3 + $0xb4] sm:$0xf] %vm470_vm0, %v451_v43  ;;  %v453_v53 = vpack.c.bf16 %v389_v49, %v389_v49  ;;  %v200_v55 = vadd.f32 %v572_v2, %v132_v46  ;;  %vm263_vm5 = vcmp.gt.f32.partialorder %v199_v50, 0.0  ;;  %v327_v56 = vmul.f32 0.2, %v199_v50  ;;  %v76_v44 = vld [vmem:[%s1149_s0 + $0x1f0] sm:$0xff] }
  0x4e   :  { %517 = vst.msk [vmem:[%s1152_s3 + $0xb8] sm:$0xf] %vm470_vm0, %v452_v48  ;;  %v201_v57 = vadd.f32 %v572_v2, %v133_v51  ;;  %v134_v58 = vmul.f32 %v567_v1, %v66_v47  ;;  %v390_v60 = vsel %vm262_vm4, %v198_v45, %v326_v54  ;;  %v135_v62 = vmul.f32 %v567_v1, %v67_v52  ;;  %v77_v48 = vld [vmem:[%s1149_s0 + $0x1f8] sm:$0xff] }
  0x4f   :  { %518 = vst.msk [vmem:[%s1152_s3 + $0xbc] sm:$0xf] %vm470_vm0, %v453_v53  ;;  %vm264_vm6 = vcmp.gt.f32.partialorder %v200_v55, 0.0  ;;  %v328_v61 = vmul.f32 0.2, %v200_v55  ;;  %v454_v0 = vpack.c.bf16 %v390_v60, %v390_v60  ;;  %v391_v3 = vsel %vm263_vm5, %v199_v50, %v327_v56 }
  0x50   :  { %vm265_vm7 = vcmp.gt.f32.partialorder %v201_v57, 0.0  ;;  %v329_v4 = vmul.f32 0.2, %v201_v57  ;;  %v455_v5 = vpack.c.bf16 %v391_v3, %v391_v3  ;;  %v202_v7 = vadd.f32 %v572_v2, %v134_v58 }
  0x51   :  { %v392_v6 = vsel %vm264_vm6, %v200_v55, %v328_v61  ;;  %v203_v8 = vadd.f32 %v572_v2, %v135_v62  ;;  %519 = vst.msk [vmem:[%s1152_s3 + $0xc0] sm:$0xf] %vm470_vm0, %v454_v0  ;;  %v136_v12 = vmul.f32 %v567_v1, %v68_v59  ;;  %v137_v13 = vmul.f32 %v567_v1, %v69_v63 }
  0x52   :  { %v456_v10 = vpack.c.bf16 %v392_v6, %v392_v6  ;;  %v393_v11 = vsel %vm265_vm7, %v201_v57, %v329_v4  ;;  %520 = vst.msk [vmem:[%s1152_s3 + $0xc4] sm:$0xf] %vm470_vm0, %v455_v5  ;;  %vm266_vm8 = vcmp.gt.f32.partialorder %v202_v7, 0.0  ;;  %v330_v18 = vmul.f32 0.2, %v202_v7 }
  0x53   :  { %v457_v17 = vpack.c.bf16 %v393_v11, %v393_v11  ;;  %vm267_vm9 = vcmp.gt.f32.partialorder %v203_v8, 0.0  ;;  %v331_v19 = vmul.f32 0.2, %v203_v8  ;;  %v204_v20 = vadd.f32 %v572_v2, %v136_v12 }
  0x54   :  { %521 = vst.msk [vmem:[%s1152_s3 + $0xc8] sm:$0xf] %vm470_vm0, %v456_v10  ;;  %v205_v21 = vadd.f32 %v572_v2, %v137_v13  ;;  %v138_v22 = vmul.f32 %v567_v1, %v70_v9  ;;  %v394_v23 = vsel %vm266_vm8, %v202_v7, %v330_v18  ;;  %v139_v24 = vmul.f32 %v567_v1, %v71_v14 }
  0x55   :  { %522 = vst.msk [vmem:[%s1152_s3 + $0xcc] sm:$0xf] %vm470_vm0, %v457_v17  ;;  %v140_v25 = vmul.f32 %v567_v1, %v72_v15  ;;  %v141_v26 = vmul.f32 %v567_v1, %v73_v16  ;;  %v458_v27 = vpack.c.bf16 %v394_v23, %v394_v23  ;;  %v395_v28 = vsel %vm267_vm9, %v203_v8, %v331_v19 }
  0x56   :  { %vm268_vm10 = vcmp.gt.f32.partialorder %v204_v20, 0.0  ;;  %v332_v29 = vmul.f32 0.2, %v204_v20  ;;  %v459_v30 = vpack.c.bf16 %v395_v28, %v395_v28  ;;  %vm269_vm11 = vcmp.gt.f32.partialorder %v205_v21, 0.0 }
  0x57   :  { %v333_v31 = vmul.f32 0.2, %v205_v21  ;;  %v206_v32 = vadd.f32 %v572_v2, %v138_v22  ;;  %523 = vst.msk [vmem:[%s1152_s3 + $0xd0] sm:$0xf] %vm470_vm0, %v458_v27  ;;  %v207_v34 = vadd.f32 %v572_v2, %v139_v24  ;;  %v208_v35 = vadd.f32 %v572_v2, %v140_v25 }
  0x58   :  { %v396_v33 = vsel %vm268_vm10, %v204_v20, %v332_v29  ;;  %v209_v36 = vadd.f32 %v572_v2, %v141_v26  ;;  %524 = vst.msk [vmem:[%s1152_s3 + $0xd4] sm:$0xf] %vm470_vm0, %v459_v30  ;;  %v142_v47 = vmul.f32 %v567_v1, %v74_v37  ;;  %v143_v52 = vmul.f32 %v567_v1, %v75_v41 }
  0x59   :  { %v460_v38 = vpack.c.bf16 %v396_v33, %v396_v33  ;;  %v397_v39 = vsel %vm269_vm11, %v205_v21, %v333_v31  ;;  %vm270_vm12 = vcmp.gt.f32.partialorder %v206_v32, 0.0  ;;  %v334_v40 = vmul.f32 0.2, %v206_v32 }
  0x5a   :  { %v461_v42 = vpack.c.bf16 %v397_v39, %v397_v39  ;;  %vm271_vm13 = vcmp.gt.f32.partialorder %v207_v34, 0.0  ;;  %v335_v43 = vmul.f32 0.2, %v207_v34  ;;  %vm272_vm14 = vcmp.gt.f32.partialorder %v208_v35, 0.0 }
  0x5b   :  { %525 = vst.msk [vmem:[%s1152_s3 + $0xd8] sm:$0xf] %vm470_vm0, %v460_v38  ;;  %v398_v45 = vsel %vm270_vm12, %v206_v32, %v334_v40  ;;  %v336_v46 = vmul.f32 0.2, %v208_v35  ;;  %vm273_vm15 = vcmp.gt.f32.partialorder %v209_v36, 0.0  ;;  %v210_v55 = vadd.f32 %v572_v2, %v142_v47 }
  0x5c   :  { %526 = vst.msk [vmem:[%s1152_s3 + $0xdc] sm:$0xf] %vm470_vm0, %v461_v42  ;;  %v462_v49 = vpack.c.bf16 %v398_v45, %v398_v45  ;;  %v399_v50 = vsel %vm271_vm13, %v207_v34, %v335_v43  ;;  %v337_v51 = vmul.f32 0.2, %v209_v36  ;;  %v144_v56 = vmul.f32 %v567_v1, %v76_v44 }
  0x5d   :  { %v463_v53 = vpack.c.bf16 %v399_v50, %v399_v50  ;;  %v400_v54 = vsel %vm272_vm14, %v208_v35, %v336_v46  ;;  %v211_v59 = vadd.f32 %v572_v2, %v143_v52  ;;  %v145_v60 = vmul.f32 %v567_v1, %v77_v48 }
  0x5e   :  { %527 = vst.msk [vmem:[%s1152_s3 + $0xe0] sm:$0xf] %vm470_vm0, %v462_v49  ;;  %v464_v57 = vpack.c.bf16 %v400_v54, %v400_v54  ;;  %v401_v58 = vsel %vm273_vm15, %v209_v36, %v337_v51  ;;  %vm274_vm1 = vcmp.gt.f32.partialorder %v210_v55, 0.0  ;;  %v338_v62 = vmul.f32 0.2, %v210_v55 }
  0x5f   :  { %528 = vst.msk [vmem:[%s1152_s3 + $0xe4] sm:$0xf] %vm470_vm0, %v463_v53  ;;  %v465_v61 = vpack.c.bf16 %v401_v58, %v401_v58  ;;  %v212_v63 = vadd.f32 %v572_v2, %v144_v56  ;;  %vm275_vm2 = vcmp.gt.f32.partialorder %v211_v59, 0.0  ;;  %v339_v0 = vmul.f32 0.2, %v211_v59 }
  0x60   :  { %529 = vst.msk [vmem:[%s1152_s3 + $0xe8] sm:$0xf] %vm470_vm0, %v464_v57  ;;  %v213_v3 = vadd.f32 %v572_v2, %v145_v60  ;;  %v402_v1 = vsel %vm274_vm1, %v210_v55, %v338_v62 }
  0x61   :  { %530 = vst.msk [vmem:[%s1152_s3 + $0xec] sm:$0xf] %vm470_vm0, %v465_v61  ;;  %vm276_vm3 = vcmp.gt.f32.partialorder %v212_v63, 0.0  ;;  %v340_v4 = vmul.f32 0.2, %v212_v63  ;;  %v466_v5 = vpack.c.bf16 %v402_v1, %v402_v1  ;;  %v403_v6 = vsel %vm275_vm2, %v211_v59, %v339_v0 }
  0x62   :  { %vm277_vm4 = vcmp.gt.f32.partialorder %v213_v3, 0.0  ;;  %v341_v7 = vmul.f32 0.2, %v213_v3  ;;  %v467_v8 = vpack.c.bf16 %v403_v6, %v403_v6 }
  0x63   :  { %v404_v9 = vsel %vm276_vm3, %v212_v63, %v340_v4  ;;  %531 = vst.msk [vmem:[%s1152_s3 + $0xf0] sm:$0xf] %vm470_vm0, %v466_v5 }
  0x64   :  { %v468_v2 = vpack.c.bf16 %v404_v9, %v404_v9  ;;  %v405_v10 = vsel %vm277_vm4, %v213_v3, %v341_v7  ;;  %532 = vst.msk [vmem:[%s1152_s3 + $0xf4] sm:$0xf] %vm470_vm0, %v467_v8 }
  0x65   :  { %v469_v11 = vpack.c.bf16 %v405_v10, %v405_v10 }
  0x66   :  { %533 = vst.msk [vmem:[%s1152_s3 + $0xf8] sm:$0xf] %vm470_vm0, %v468_v2 }
  0x67   :  { %534 = vst.msk [vmem:[%s1152_s3 + $0xfc] sm:$0xf] %vm470_vm0, %v469_v11 }

// kernel: discriminator_forward.8
= control target key start
LH: loop header
LB: loop body
LE: loop exit
PB: predicated region body
PF: predicated region fallthrough
CT: control target
= control target key end

     0   :  { %vm503_vm0 = vcmask 130048   ;;  %vm572_vm1 = vcmask 122880   ;;  %s1995_s1 = inlined_call_operand.vmem [shape: bf16[128,16], index: 1, kind: input, shape index: {}]   ;;  %s1996_s0 = inlined_call_operand.vmem [shape: bf16[512,128], index: 0, kind: input, shape index: {}]   ;;  %s1997_s2 = inlined_call_operand.vmem [shape: f32[512,16], index: 2, kind: output, shape index: {0}]   ;;  %s1998_s3 = inlined_call_operand.vmem [shape: f32[1,16], index: 3, kind: output, shape index: {1}]   ;;  %s1999_s4 = inlined_call_operand.vmem [shape: f32[1,16], index: 4, kind: output, shape index: {2}]  }
   0x1   :  { %v1123_v0 = vld [vmem:[%s1995_s1 + $0x38] sm:$0xff]  ;;  %v1122_v1 = vld [vmem:[%s1995_s1 + $0x30] sm:$0xff]  ;;  %v1121_v2 = vld [vmem:[%s1995_s1 + $0x28] sm:$0xff] }
   0x2   :  { %334 = vmatpush.bf16.msra.mxu0 %v1123_v0  ;;  %1124 = vmatpush.bf16.msra.mxu1 %v1123_v0  ;;  %v1120_v3 = vld [vmem:[%s1995_s1 + $0x20] sm:$0xff]  ;;  %v1119_v4 = vld [vmem:[%s1995_s1 + $0x18] sm:$0xff]  ;;  %v1118_v5 = vld [vmem:[%s1995_s1 + $0x10] sm:$0xff] }
   0x3   :  { %1125 = vmatpush.bf16.msra.mxu2 %v1123_v0  ;;  %1126 = vmatpush.bf16.msra.mxu3 %v1123_v0  ;;  %v1117_v6 = vld [vmem:[%s1995_s1 + $0x8] sm:$0xff]  ;;  %v1116_v7 = vld [vmem:[%s1995_s1] sm:$0xff]  ;;  %v1086_v13 = vld [vmem:[%s1996_s0 + $0x10] sm:$0xff] }
   0x4   :  { %v1084_v8 = vld [vmem:[%s1996_s0] sm:$0xff]  ;;  %v1085_v10 = vld [vmem:[%s1996_s0 + $0x8] sm:$0xff]  ;;  %v1094_v14 = vld [vmem:[%s1996_s0 + $0x50] sm:$0xff] }
   0x5   :  { %v1092_v9 = vld [vmem:[%s1996_s0 + $0x40] sm:$0xff]  ;;  %v1093_v11 = vld [vmem:[%s1996_s0 + $0x48] sm:$0xff]  ;;  %v1087_v16 = vld [vmem:[%s1996_s0 + $0x18] sm:$0xff] }
   0x6   :  { %335 = vmatpush.bf16.msra.mxu0 %v1122_v1  ;;  %1127 = vmatpush.bf16.msra.mxu1 %v1122_v1  ;;  %v1100_v12 = vld [vmem:[%s1996_s0 + $0x80] sm:$0xff]  ;;  %v1101_v15 = vld [vmem:[%s1996_s0 + $0x88] sm:$0xff]  ;;  %v1095_v17 = vld [vmem:[%s1996_s0 + $0x58] sm:$0xff] }
   0x7   :  { %1128 = vmatpush.bf16.msra.mxu2 %v1122_v1  ;;  %1129 = vmatpush.bf16.msra.mxu3 %v1122_v1  ;;  %v1102_v18 = vld [vmem:[%s1996_s0 + $0x90] sm:$0xff]  ;;  %v1108_v19 = vld [vmem:[%s1996_s0 + $0xc0] sm:$0xff]  ;;  %v1103_v22 = vld [vmem:[%s1996_s0 + $0x98] sm:$0xff] }
   0x8   :  { %v1088_v20 = vld [vmem:[%s1996_s0 + $0x20] sm:$0xff]  ;;  %v1109_v23 = vld [vmem:[%s1996_s0 + $0xc8] sm:$0xff]  ;;  %v1110_v27 = vld [vmem:[%s1996_s0 + $0xd0] sm:$0xff] }
   0x9   :  { %v1096_v21 = vld [vmem:[%s1996_s0 + $0x60] sm:$0xff]  ;;  %v1089_v24 = vld [vmem:[%s1996_s0 + $0x28] sm:$0xff]  ;;  %v1090_v28 = vld [vmem:[%s1996_s0 + $0x30] sm:$0xff] }
   0xa   :  { %336 = vmatpush.bf16.msra.mxu0 %v1121_v2  ;;  %1130 = vmatpush.bf16.msra.mxu1 %v1121_v2  ;;  %v1097_v25 = vld [vmem:[%s1996_s0 + $0x68] sm:$0xff]  ;;  %v1104_v26 = vld [vmem:[%s1996_s0 + $0xa0] sm:$0xff]  ;;  %v1098_v29 = vld [vmem:[%s1996_s0 + $0x70] sm:$0xff] }
   0xb   :  { %1131 = vmatpush.bf16.msra.mxu2 %v1121_v2  ;;  %1132 = vmatpush.bf16.msra.mxu3 %v1121_v2  ;;  %v1105_v30 = vld [vmem:[%s1996_s0 + $0xa8] sm:$0xff]  ;;  %v1111_v31 = vld [vmem:[%s1996_s0 + $0xd8] sm:$0xff]  ;;  %v1106_v34 = vld [vmem:[%s1996_s0 + $0xb0] sm:$0xff] }
   0xc   :  { %v1091_v32 = vld [vmem:[%s1996_s0 + $0x38] sm:$0xff]  ;;  %v1112_v35 = vld [vmem:[%s1996_s0 + $0xe0] sm:$0xff]  ;;  %v1113_v39 = vld [vmem:[%s1996_s0 + $0xe8] sm:$0xff] }
   0xd   :  { %v1099_v33 = vld [vmem:[%s1996_s0 + $0x78] sm:$0xff]  ;;  %v1114_v56 = vld [vmem:[%s1996_s0 + $0xf0] sm:$0xff] }
   0xe   :  { %337 = vmatpush.bf16.msra.mxu0 %v1120_v3  ;;  %1133 = vmatpush.bf16.msra.mxu1 %v1120_v3  ;;  %v1107_v38 = vld [vmem:[%s1996_s0 + $0xb8] sm:$0xff] }
   0xf   :  { %1134 = vmatpush.bf16.msra.mxu2 %v1120_v3  ;;  %1135 = vmatpush.bf16.msra.mxu3 %v1120_v3 }
  0x12   :  { %338 = vmatpush.bf16.msra.mxu0 %v1119_v4  ;;  %1136 = vmatpush.bf16.msra.mxu1 %v1119_v4 }
  0x13   :  { %1137 = vmatpush.bf16.msra.mxu2 %v1119_v4  ;;  %1138 = vmatpush.bf16.msra.mxu3 %v1119_v4 }
  0x16   :  { %339 = vmatpush.bf16.msra.mxu0 %v1118_v5  ;;  %1139 = vmatpush.bf16.msra.mxu1 %v1118_v5 }
  0x17   :  { %1140 = vmatpush.bf16.msra.mxu2 %v1118_v5  ;;  %1141 = vmatpush.bf16.msra.mxu3 %v1118_v5 }
  0x1a   :  { %340 = vmatpush.bf16.msra.mxu0 %v1117_v6  ;;  %1142 = vmatpush.bf16.msra.mxu1 %v1117_v6 }
  0x1b   :  { %1143 = vmatpush.bf16.msra.mxu2 %v1117_v6  ;;  %1144 = vmatpush.bf16.msra.mxu3 %v1117_v6 }
  0x1e   :  { %341 = vmatpush.bf16.msra.mxu0 %v1116_v7  ;;  %1145 = vmatpush.bf16.msra.mxu1 %v1116_v7 }
  0x1f   :  { %1146 = vmatpush.bf16.msra.mxu2 %v1116_v7  ;;  %1147 = vmatpush.bf16.msra.mxu3 %v1116_v7 }
  0x21   :  { %342 = vmatmul.bf16.vlgmr.msra.gmra.mxu0 %v1084_v8  ;;  %382 = vmatmul.bf16.vlgmr.msra.gmra.mxu1 %v1092_v9  ;;  %v1115_v9 = vld [vmem:[%s1996_s0 + $0xf8] sm:$0xff] }
  0x22   :  { %422 = vmatmul.bf16.vlgmr.msra.gmra.mxu2 %v1100_v12  ;;  %462 = vmatmul.bf16.vlgmr.msra.gmra.mxu3 %v1108_v19 }
  0x31   :  { %347 = vmatmul.bf16.gmra.mxu0 %v1085_v10  ;;  %387 = vmatmul.bf16.gmra.mxu1 %v1093_v11 }
  0x32   :  { %427 = vmatmul.bf16.gmra.mxu2 %v1101_v15  ;;  %467 = vmatmul.bf16.gmra.mxu3 %v1109_v23 }
  0x41   :  { %352 = vmatmul.bf16.gmra.mxu0 %v1086_v13  ;;  %392 = vmatmul.bf16.gmra.mxu1 %v1094_v14 }
  0x42   :  { %432 = vmatmul.bf16.gmra.mxu2 %v1102_v18  ;;  %472 = vmatmul.bf16.gmra.mxu3 %v1110_v27 }
  0x51   :  { %357 = vmatmul.bf16.gmra.mxu0 %v1087_v16  ;;  %397 = vmatmul.bf16.gmra.mxu1 %v1095_v17 }
  0x52   :  { %437 = vmatmul.bf16.gmra.mxu2 %v1103_v22  ;;  %477 = vmatmul.bf16.gmra.mxu3 %v1111_v31 }
  0x61   :  { %362 = vmatmul.bf16.gmra.mxu0 %v1088_v20  ;;  %402 = vmatmul.bf16.gmra.mxu1 %v1096_v21 }
  0x62   :  { %442 = vmatmul.bf16.gmra.mxu2 %v1104_v26  ;;  %482 = vmatmul.bf16.gmra.mxu3 %v1112_v35 }
  0x71   :  { %367 = vmatmul.bf16.gmra.mxu0 %v1089_v24  ;;  %407 = vmatmul.bf16.gmra.mxu1 %v1097_v25 }
  0x72   :  { %447 = vmatmul.bf16.gmra.mxu2 %v1105_v30  ;;  %487 = vmatmul.bf16.gmra.mxu3 %v1113_v39 }
  0x81   :  { %372 = vmatmul.bf16.gmra.mxu0 %v1090_v28  ;;  %412 = vmatmul.bf16.gmra.mxu1 %v1098_v29 }
  0x82   :  { %452 = vmatmul.bf16.gmra.mxu2 %v1106_v34  ;;  %492 = vmatmul.bf16.gmra.mxu3 %v1114_v56 }
  0x91   :  { %377 = vmatmul.bf16.gmra.mxu0 %v1091_v32  ;;  %417 = vmatmul.bf16.gmra.mxu1 %v1099_v33 }
  0x92   :  { %457 = vmatmul.bf16.gmra.mxu2 %v1107_v38  ;;  %497 = vmatmul.bf16.gmra.mxu3 %v1115_v9 }
  0x9e   :  { %v343_v36 = vpop.f32.mrf.mxu0  ;;  %v1283_v37 = vpop.f32.mrf.mxu1 }
  0x9f   :  { %504 = vst.msk [vmem:[%s1997_s2] sm:$0xff] %vm503_vm0, %v343_v36  ;;  %v713_v40 = vmul.f32 %v343_v36, %v343_v36  ;;  %v576_v43 = vsel %vm503_vm0, %v343_v36, 0.0 }
  0xa0   :  { %520 = vst.msk [vmem:[%s1997_s2 + $0x80] sm:$0xff] %vm503_vm0, %v1283_v37 }
  0xa1   :  { %v777_v47 = vsel %vm503_vm0, %v713_v40, 0.0 }
  0xa5   :  { %v1338_v62 = vpop.f32.mrf.mxu2  ;;  %v1422_v20 = vpop.f32.mrf.mxu3 }
  0xa6   :  { %v345_v41 = vpop.f32.mrf.mxu0  ;;  %v1300_v42 = vpop.f32.mrf.mxu1  ;;  %536 = vst.msk [vmem:[%s1997_s2 + $0x100] sm:$0xff] %vm503_vm0, %v1338_v62 }
  0xa7   :  { %505 = vst.msk [vmem:[%s1997_s2 + $0x8] sm:$0xff] %vm503_vm0, %v345_v41  ;;  %v577_v44 = vsel %vm503_vm0, %v345_v41, 0.0  ;;  %v714_v45 = vmul.f32 %v345_v41, %v345_v41 }
  0xa8   :  { %v578_v46 = vadd.f32 %v577_v44, %v576_v43  ;;  %521 = vst.msk [vmem:[%s1997_s2 + $0x88] sm:$0xff] %vm503_vm0, %v1300_v42 }
  0xa9   :  { %v778_v48 = vsel %vm503_vm0, %v714_v45, 0.0  ;;  %552 = vst.msk [vmem:[%s1997_s2 + $0x180] sm:$0xff] %vm503_vm0, %v1422_v20 }
  0xaa   :  { %v779_v49 = vadd.f32 %v778_v48, %v777_v47 }
  0xad   :  { %v1358_v6 = vpop.f32.mrf.mxu2  ;;  %v1447_v24 = vpop.f32.mrf.mxu3 }
  0xae   :  { %v348_v50 = vpop.f32.mrf.mxu0  ;;  %v1315_v51 = vpop.f32.mrf.mxu1  ;;  %537 = vst.msk [vmem:[%s1997_s2 + $0x108] sm:$0xff] %vm503_vm0, %v1358_v6 }
  0xaf   :  { %506 = vst.msk [vmem:[%s1997_s2 + $0x10] sm:$0xff] %vm503_vm0, %v348_v50  ;;  %v579_v52 = vsel %vm503_vm0, %v348_v50, 0.0  ;;  %v715_v53 = vmul.f32 %v348_v50, %v348_v50 }
  0xb0   :  { %v580_v54 = vadd.f32 %v579_v52, %v578_v46  ;;  %522 = vst.msk [vmem:[%s1997_s2 + $0x90] sm:$0xff] %vm503_vm0, %v1315_v51 }
  0xb1   :  { %v780_v55 = vsel %vm503_vm0, %v715_v53, 0.0  ;;  %553 = vst.msk [vmem:[%s1997_s2 + $0x188] sm:$0xff] %vm503_vm0, %v1447_v24 }
  0xb2   :  { %v781_v57 = vadd.f32 %v780_v55, %v779_v49 }
  0xb5   :  { %v1384_v13 = vpop.f32.mrf.mxu2  ;;  %v1472_v28 = vpop.f32.mrf.mxu3 }
  0xb6   :  { %v350_v58 = vpop.f32.mrf.mxu0  ;;  %v1331_v59 = vpop.f32.mrf.mxu1  ;;  %538 = vst.msk [vmem:[%s1997_s2 + $0x110] sm:$0xff] %vm503_vm0, %v1384_v13 }
  0xb7   :  { %507 = vst.msk [vmem:[%s1997_s2 + $0x18] sm:$0xff] %vm503_vm0, %v350_v58  ;;  %v581_v60 = vsel %vm503_vm0, %v350_v58, 0.0  ;;  %v716_v61 = vmul.f32 %v350_v58, %v350_v58 }
  0xb8   :  { %v582_v63 = vadd.f32 %v581_v60, %v580_v54  ;;  %523 = vst.msk [vmem:[%s1997_s2 + $0x98] sm:$0xff] %vm503_vm0, %v1331_v59 }
  0xb9   :  { %v782_v0 = vsel %vm503_vm0, %v716_v61, 0.0  ;;  %554 = vst.msk [vmem:[%s1997_s2 + $0x190] sm:$0xff] %vm503_vm0, %v1472_v28 }
  0xba   :  { %v783_v1 = vadd.f32 %v782_v0, %v781_v57 }
  0xbd   :  { %v1402_v16 = vpop.f32.mrf.mxu2  ;;  %v1497_v32 = vpop.f32.mrf.mxu3 }
  0xbe   :  { %v353_v2 = vpop.f32.mrf.mxu0  ;;  %v1351_v3 = vpop.f32.mrf.mxu1  ;;  %539 = vst.msk [vmem:[%s1997_s2 + $0x118] sm:$0xff] %vm503_vm0, %v1402_v16 }
  0xbf   :  { %508 = vst.msk [vmem:[%s1997_s2 + $0x20] sm:$0xff] %vm503_vm0, %v353_v2  ;;  %v583_v4 = vsel %vm503_vm0, %v353_v2, 0.0  ;;  %v717_v5 = vmul.f32 %v353_v2, %v353_v2 }
  0xc0   :  { %v1360_v7 = vadd.f32 %v583_v4, %v582_v63  ;;  %524 = vst.msk [vmem:[%s1997_s2 + $0xa0] sm:$0xff] %vm503_vm0, %v1351_v3 }
  0xc1   :  { %v784_v8 = vsel %vm503_vm0, %v717_v5, 0.0  ;;  %555 = vst.msk [vmem:[%s1997_s2 + $0x198] sm:$0xff] %vm503_vm0, %v1497_v32 }
  0xc2   :  { %v1376_v10 = vadd.f32 %v784_v8, %v783_v1 }
  0xc5   :  { %v1420_v19 = vpop.f32.mrf.mxu2  ;;  %v1522_v36 = vpop.f32.mrf.mxu3 }
  0xc6   :  { %v355_v11 = vpop.f32.mrf.mxu0  ;;  %v1378_v12 = vpop.f32.mrf.mxu1  ;;  %540 = vst.msk [vmem:[%s1997_s2 + $0x120] sm:$0xff] %vm503_vm0, %v1420_v19 }
  0xc7   :  { %509 = vst.msk [vmem:[%s1997_s2 + $0x28] sm:$0xff] %vm503_vm0, %v355_v11  ;;  %v718_v40 = vmul.f32 %v355_v11, %v355_v11  ;;  %v585_v44 = vsel %vm503_vm0, %v355_v11, 0.0 }
  0xc8   :  { %525 = vst.msk [vmem:[%s1997_s2 + $0xa8] sm:$0xff] %vm503_vm0, %v1378_v12  ;;  %v586_v49 = vadd.f32 %v585_v44, %v1360_v7 }
  0xc9   :  { %556 = vst.msk [vmem:[%s1997_s2 + $0x1a0] sm:$0xff] %vm503_vm0, %v1522_v36  ;;  %v786_v46 = vsel %vm503_vm0, %v718_v40, 0.0 }
  0xca   :  { %v787_v54 = vadd.f32 %v786_v46, %v1376_v10 }
  0xcd   :  { %v1445_v23 = vpop.f32.mrf.mxu2  ;;  %v1547_v43 = vpop.f32.mrf.mxu3 }
  0xce   :  { %v358_v14 = vpop.f32.mrf.mxu0  ;;  %v1396_v15 = vpop.f32.mrf.mxu1  ;;  %541 = vst.msk [vmem:[%s1997_s2 + $0x128] sm:$0xff] %vm503_vm0, %v1445_v23 }
  0xcf   :  { %510 = vst.msk [vmem:[%s1997_s2 + $0x30] sm:$0xff] %vm503_vm0, %v358_v14  ;;  %v719_v45 = vmul.f32 %v358_v14, %v358_v14  ;;  %v587_v47 = vsel %vm503_vm0, %v358_v14, 0.0 }
  0xd0   :  { %526 = vst.msk [vmem:[%s1997_s2 + $0xb0] sm:$0xff] %vm503_vm0, %v1396_v15  ;;  %v588_v55 = vadd.f32 %v587_v47, %v586_v49 }
  0xd1   :  { %557 = vst.msk [vmem:[%s1997_s2 + $0x1a8] sm:$0xff] %vm503_vm0, %v1547_v43  ;;  %v788_v50 = vsel %vm503_vm0, %v719_v45, 0.0 }
  0xd2   :  { %v789_v1 = vadd.f32 %v788_v50, %v787_v54 }
  0xd5   :  { %v1470_v27 = vpop.f32.mrf.mxu2  ;;  %v1581_v0 = vpop.f32.mrf.mxu3 }
  0xd6   :  { %v360_v17 = vpop.f32.mrf.mxu0  ;;  %v1414_v18 = vpop.f32.mrf.mxu1  ;;  %542 = vst.msk [vmem:[%s1997_s2 + $0x130] sm:$0xff] %vm503_vm0, %v1470_v27 }
  0xd7   :  { %511 = vst.msk [vmem:[%s1997_s2 + $0x38] sm:$0xff] %vm503_vm0, %v360_v17  ;;  %v720_v48 = vmul.f32 %v360_v17, %v360_v17  ;;  %v589_v52 = vsel %vm503_vm0, %v360_v17, 0.0 }
  0xd8   :  { %527 = vst.msk [vmem:[%s1997_s2 + $0xb8] sm:$0xff] %vm503_vm0, %v1414_v18  ;;  %v590_v2 = vadd.f32 %v589_v52, %v588_v55 }
  0xd9   :  { %v790_v58 = vsel %vm503_vm0, %v720_v48, 0.0  ;;  %558 = vst.msk [vmem:[%s1997_s2 + $0x1b0] sm:$0xff] %vm503_vm0, %v1581_v0 }
  0xda   :  { %v791_v8 = vadd.f32 %v790_v58, %v789_v1 }
  0xdd   :  { %v1495_v31 = vpop.f32.mrf.mxu2 }
  0xde   :  { %v363_v21 = vpop.f32.mrf.mxu0  ;;  %v1439_v22 = vpop.f32.mrf.mxu1  ;;  %543 = vst.msk [vmem:[%s1997_s2 + $0x138] sm:$0xff] %vm503_vm0, %v1495_v31 }
  0xdf   :  { %512 = vst.msk [vmem:[%s1997_s2 + $0x40] sm:$0xff] %vm503_vm0, %v363_v21  ;;  %v721_v53 = vmul.f32 %v363_v21, %v363_v21  ;;  %v591_v60 = vsel %vm503_vm0, %v363_v21, 0.0 }
  0xe0   :  { %528 = vst.msk [vmem:[%s1997_s2 + $0xc0] sm:$0xff] %vm503_vm0, %v1439_v22  ;;  %v592_v9 = vadd.f32 %v591_v60, %v590_v2 }
  0xe1   :  { %v792_v4 = vsel %vm503_vm0, %v721_v53, 0.0  ;;  %v1614_v53 = vpop.f32.mrf.mxu3 }
  0xe2   :  { %v793_v17 = vadd.f32 %v792_v4, %v791_v8  ;;  %559 = vst.msk [vmem:[%s1997_s2 + $0x1b8] sm:$0xff] %vm503_vm0, %v1614_v53 }
  0xe5   :  { %v1520_v35 = vpop.f32.mrf.mxu2 }
  0xe6   :  { %v365_v25 = vpop.f32.mrf.mxu0  ;;  %v1464_v26 = vpop.f32.mrf.mxu1  ;;  %544 = vst.msk [vmem:[%s1997_s2 + $0x140] sm:$0xff] %vm503_vm0, %v1520_v35 }
  0xe7   :  { %513 = vst.msk [vmem:[%s1997_s2 + $0x48] sm:$0xff] %vm503_vm0, %v365_v25  ;;  %v722_v61 = vmul.f32 %v365_v25, %v365_v25  ;;  %v593_v5 = vsel %vm503_vm0, %v365_v25, 0.0 }
  0xe8   :  { %529 = vst.msk [vmem:[%s1997_s2 + $0xc8] sm:$0xff] %vm503_vm0, %v1464_v26  ;;  %v594_v21 = vadd.f32 %v593_v5, %v592_v9 }
  0xe9   :  { %v794_v10 = vsel %vm503_vm0, %v722_v61, 0.0 }
  0xea   :  { %v795_v45 = vadd.f32 %v794_v10, %v793_v17 }
  0xed   :  { %v1545_v41 = vpop.f32.mrf.mxu2 }
  0xee   :  { %v368_v29 = vpop.f32.mrf.mxu0  ;;  %v1489_v30 = vpop.f32.mrf.mxu1  ;;  %545 = vst.msk [vmem:[%s1997_s2 + $0x148] sm:$0xff] %vm503_vm0, %v1545_v41 }
  0xef   :  { %514 = vst.msk [vmem:[%s1997_s2 + $0x50] sm:$0xff] %vm503_vm0, %v368_v29  ;;  %v723_v7 = vmul.f32 %v368_v29, %v368_v29  ;;  %v595_v11 = vsel %vm503_vm0, %v368_v29, 0.0 }
  0xf0   :  { %530 = vst.msk [vmem:[%s1997_s2 + $0xd0] sm:$0xff] %vm503_vm0, %v1489_v30  ;;  %v596_v46 = vadd.f32 %v595_v11, %v594_v21  ;;  %v729_v11 = vmul.f32 %v1283_v37, %v1283_v37 }
  0xf1   :  { %v796_v25 = vsel %vm503_vm0, %v723_v7, 0.0 }
  0xf5   :  { %v1579_v63 = vpop.f32.mrf.mxu2 }
  0xf6   :  { %v370_v33 = vpop.f32.mrf.mxu0  ;;  %v1514_v34 = vpop.f32.mrf.mxu1  ;;  %546 = vst.msk [vmem:[%s1997_s2 + $0x150] sm:$0xff] %vm503_vm0, %v1579_v63 }
  0xf7   :  { %515 = vst.msk [vmem:[%s1997_s2 + $0x58] sm:$0xff] %vm503_vm0, %v370_v33  ;;  %v724_v14 = vmul.f32 %v370_v33, %v370_v33  ;;  %v597_v40 = vsel %vm503_vm0, %v370_v33, 0.0  ;;  %v797_v33 = vadd.f32 %v796_v25, %v795_v45  ;;  %v1647_v25 = vpop.f32.mrf.mxu3  ;;  %v607_v45 = vsel %vm503_vm0, %v1283_v37, 0.0 }
  0xf8   :  { %531 = vst.msk [vmem:[%s1997_s2 + $0xd8] sm:$0xff] %vm503_vm0, %v1514_v34  ;;  %v598_v54 = vadd.f32 %v597_v40, %v596_v46  ;;  %v730_v46 = vmul.f32 %v1300_v42, %v1300_v42  ;;  %v808_v37 = vsel %vm503_vm0, %v729_v11, 0.0 }
  0xf9   :  { %v798_v49 = vsel %vm503_vm0, %v724_v14, 0.0  ;;  %560 = vst.msk [vmem:[%s1997_s2 + $0x1c0] sm:$0xff] %vm503_vm0, %v1647_v25 }
  0xfa   :  { %v799_v60 = vadd.f32 %v798_v49, %v797_v33  ;;  %v731_v33 = vmul.f32 %v1315_v51, %v1315_v51 }
  0xfd   :  { %v1612_v29 = vpop.f32.mrf.mxu2 }
  0xfe   :  { %v373_v38 = vpop.f32.mrf.mxu0  ;;  %v1539_v39 = vpop.f32.mrf.mxu1  ;;  %547 = vst.msk [vmem:[%s1997_s2 + $0x158] sm:$0xff] %vm503_vm0, %v1612_v29 }
  0xff   :  { %516 = vst.msk [vmem:[%s1997_s2 + $0x60] sm:$0xff] %vm503_vm0, %v373_v38  ;;  %v725_v44 = vmul.f32 %v373_v38, %v373_v38  ;;  %v599_v50 = vsel %vm503_vm0, %v373_v38, 0.0 }
 0x100   :  { %532 = vst.msk [vmem:[%s1997_s2 + $0xe0] sm:$0xff] %vm503_vm0, %v1539_v39  ;;  %v600_v61 = vadd.f32 %v599_v50, %v598_v54 }
 0x101   :  { %v800_v38 = vsel %vm503_vm0, %v725_v44, 0.0 }
 0x105   :  { %v1645_v21 = vpop.f32.mrf.mxu2 }
 0x106   :  { %v375_v56 = vpop.f32.mrf.mxu0  ;;  %v1571_v57 = vpop.f32.mrf.mxu1  ;;  %548 = vst.msk [vmem:[%s1997_s2 + $0x160] sm:$0xff] %vm503_vm0, %v1645_v21 }
 0x107   :  { %517 = vst.msk [vmem:[%s1997_s2 + $0x68] sm:$0xff] %vm503_vm0, %v375_v56  ;;  %v726_v52 = vmul.f32 %v375_v56, %v375_v56  ;;  %v601_v55 = vsel %vm503_vm0, %v375_v56, 0.0  ;;  %v801_v56 = vadd.f32 %v800_v38, %v799_v60  ;;  %v732_v60 = vmul.f32 %v1331_v59, %v1331_v59 }
 0x108   :  { %533 = vst.msk [vmem:[%s1997_s2 + $0xe8] sm:$0xff] %vm503_vm0, %v1571_v57  ;;  %v602_v4 = vadd.f32 %v601_v55, %v600_v61  ;;  %v810_v55 = vsel %vm503_vm0, %v730_v46, 0.0 }
 0x109   :  { %v802_v1 = vsel %vm503_vm0, %v726_v52, 0.0  ;;  %v609_v52 = vsel %vm503_vm0, %v1300_v42, 0.0  ;;  %v613_v42 = vsel %vm503_vm0, %v1331_v59, 0.0  ;;  %v615_v59 = vsel %vm503_vm0, %v1351_v3, 0.0 }
 0x10a   :  { %v803_v7 = vadd.f32 %v802_v1, %v801_v56  ;;  %v733_v56 = vmul.f32 %v1351_v3, %v1351_v3 }
 0x10e   :  { %v378_v47 = vpop.f32.mrf.mxu0  ;;  %v1604_v48 = vpop.f32.mrf.mxu1 }
 0x10f   :  { %518 = vst.msk [vmem:[%s1997_s2 + $0x70] sm:$0xff] %vm503_vm0, %v378_v47  ;;  %v727_v58 = vmul.f32 %v378_v47, %v378_v47  ;;  %v603_v2 = vsel %vm503_vm0, %v378_v47, 0.0 }
 0x110   :  { %534 = vst.msk [vmem:[%s1997_s2 + $0xf0] sm:$0xff] %vm503_vm0, %v1604_v48  ;;  %v604_v8 = vadd.f32 %v603_v2, %v602_v4  ;;  %v812_v2 = vsel %vm503_vm0, %v731_v33, 0.0  ;;  %v1684_v4 = vpop.f32.mrf.mxu2  ;;  %v737_v33 = vmul.f32 %v1439_v22, %v1439_v22 }
 0x111   :  { %v804_v5 = vsel %vm503_vm0, %v727_v58, 0.0  ;;  %v611_v58 = vsel %vm503_vm0, %v1315_v51, 0.0  ;;  %549 = vst.msk [vmem:[%s1997_s2 + $0x168] sm:$0xff] %vm503_vm0, %v1684_v4  ;;  %v814_v51 = vsel %vm503_vm0, %v732_v60, 0.0  ;;  %v738_v60 = vmul.f32 %v1464_v26, %v1464_v26 }
 0x112   :  { %v805_v40 = vadd.f32 %v804_v5, %v803_v7  ;;  %v1686_v5 = vpop.f32.mrf.mxu3 }
 0x113   :  { %561 = vst.msk [vmem:[%s1997_s2 + $0x1c8] sm:$0xff] %vm503_vm0, %v1686_v5 }
 0x116   :  { %v380_v9 = vpop.f32.mrf.mxu0  ;;  %v1636_v10 = vpop.f32.mrf.mxu1 }
 0x117   :  { %519 = vst.msk [vmem:[%s1997_s2 + $0x78] sm:$0xff] %vm503_vm0, %v380_v9  ;;  %v605_v14 = vsel %vm503_vm0, %v380_v9, 0.0  ;;  %v728_v17 = vmul.f32 %v380_v9, %v380_v9  ;;  %v734_v9 = vmul.f32 %v1378_v12, %v1378_v12 }
 0x118   :  { %v606_v44 = vadd.f32 %v605_v14, %v604_v8  ;;  %535 = vst.msk [vmem:[%s1997_s2 + $0xf8] sm:$0xff] %vm503_vm0, %v1636_v10 }
 0x119   :  { %v806_v47 = vsel %vm503_vm0, %v728_v17, 0.0  ;;  %v816_v17 = vsel %vm503_vm0, %v733_v56, 0.0  ;;  %v818_v46 = vsel %vm503_vm0, %v734_v9, 0.0  ;;  %v739_v56 = vmul.f32 %v1489_v30, %v1489_v30 }
 0x11a   :  { %v608_v49 = vadd.f32 %v607_v45, %v606_v44  ;;  %v807_v50 = vadd.f32 %v806_v47, %v805_v40  ;;  %v617_v40 = vsel %vm503_vm0, %v1378_v12, 0.0  ;;  %v735_v44 = vmul.f32 %v1396_v15, %v1396_v15 }
 0x11b   :  { %v619_v47 = vsel %vm503_vm0, %v1396_v15, 0.0  ;;  %v621_v12 = vsel %vm503_vm0, %v1414_v18, 0.0 }
 0x11c   :  { %v610_v54 = vadd.f32 %v609_v52, %v608_v49  ;;  %v809_v38 = vadd.f32 %v808_v37, %v807_v50  ;;  %v736_v49 = vmul.f32 %v1414_v18, %v1414_v18  ;;  %v820_v52 = vsel %vm503_vm0, %v735_v44, 0.0 }
 0x11d   :  { %v623_v18 = vsel %vm503_vm0, %v1439_v22, 0.0 }
 0x11e   :  { %v612_v61 = vadd.f32 %v611_v58, %v610_v54  ;;  %v811_v1 = vadd.f32 %v810_v55, %v809_v38  ;;  %v1718_v54 = vpop.f32.mrf.mxu2  ;;  %v1720_v38 = vpop.f32.mrf.mxu3  ;;  %v822_v15 = vsel %vm503_vm0, %v736_v49, 0.0 }
 0x11f   :  { %550 = vst.msk [vmem:[%s1997_s2 + $0x170] sm:$0xff] %vm503_vm0, %v1718_v54 }
 0x120   :  { %v614_v7 = vadd.f32 %v613_v42, %v612_v61  ;;  %v813_v8 = vadd.f32 %v812_v2, %v811_v1  ;;  %562 = vst.msk [vmem:[%s1997_s2 + $0x1d0] sm:$0xff] %vm503_vm0, %v1720_v38  ;;  %v824_v2 = vsel %vm503_vm0, %v737_v33, 0.0  ;;  %v625_v42 = vsel %vm503_vm0, %v1464_v26, 0.0 }
 0x121   :  { %v629_v26 = vsel %vm503_vm0, %v1514_v34, 0.0 }
 0x122   :  { %v616_v11 = vadd.f32 %v615_v59, %v614_v7  ;;  %v815_v14 = vadd.f32 %v814_v51, %v813_v8  ;;  %v826_v8 = vsel %vm503_vm0, %v738_v60, 0.0  ;;  %v627_v51 = vsel %vm503_vm0, %v1489_v30, 0.0 }
 0x123   :  { %v740_v59 = vmul.f32 %v1514_v34, %v1514_v34  ;;  %v631_v34 = vsel %vm503_vm0, %v1539_v39, 0.0  ;;  %v745_v60 = vmul.f32 %v1338_v62, %v1338_v62 }
 0x124   :  { %v618_v3 = vadd.f32 %v617_v40, %v616_v11  ;;  %v817_v45 = vadd.f32 %v816_v17, %v815_v14  ;;  %v828_v14 = vsel %vm503_vm0, %v739_v56, 0.0  ;;  %v741_v17 = vmul.f32 %v1539_v39, %v1539_v39 }
 0x125   :  { %v830_v30 = vsel %vm503_vm0, %v740_v59, 0.0  ;;  %v746_v56 = vmul.f32 %v1358_v6, %v1358_v6  ;;  %v747_v59 = vmul.f32 %v1384_v13, %v1384_v13 }
 0x126   :  { %v819_v50 = vadd.f32 %v818_v46, %v817_v45  ;;  %v620_v37 = vadd.f32 %v619_v47, %v618_v3  ;;  %v1752_v40 = vpop.f32.mrf.mxu2  ;;  %v1754_v44 = vpop.f32.mrf.mxu3  ;;  %v742_v46 = vmul.f32 %v1571_v57, %v1571_v57 }
 0x127   :  { %551 = vst.msk [vmem:[%s1997_s2 + $0x178] sm:$0xff] %vm503_vm0, %v1752_v40 }
 0x128   :  { %v622_v55 = vadd.f32 %v621_v12, %v620_v37  ;;  %v821_v58 = vadd.f32 %v820_v52, %v819_v50  ;;  %563 = vst.msk [vmem:[%s1997_s2 + $0x1d8] sm:$0xff] %vm503_vm0, %v1754_v44  ;;  %v832_v50 = vsel %vm503_vm0, %v741_v17, 0.0  ;;  %v633_v37 = vsel %vm503_vm0, %v1571_v57, 0.0 }
 0x129   :  { %v743_v52 = vmul.f32 %v1604_v48, %v1604_v48  ;;  %v834_v33 = vsel %vm503_vm0, %v742_v46, 0.0 }
 0x12a   :  { %v624_v61 = vadd.f32 %v623_v18, %v622_v55  ;;  %v823_v1 = vadd.f32 %v822_v15, %v821_v58  ;;  %v635_v55 = vsel %vm503_vm0, %v1604_v48, 0.0  ;;  %v744_v58 = vmul.f32 %v1636_v10, %v1636_v10 }
 0x12b   :  { %v836_v57 = vsel %vm503_vm0, %v743_v52, 0.0  ;;  %v639_v48 = vsel %vm503_vm0, %v1338_v62, 0.0  ;;  %v643_v62 = vsel %vm503_vm0, %v1384_v13, 0.0 }
 0x12c   :  { %v626_v22 = vadd.f32 %v625_v42, %v624_v61  ;;  %v825_v7 = vadd.f32 %v824_v2, %v823_v1  ;;  %v637_v61 = vsel %vm503_vm0, %v1636_v10, 0.0 }
 0x12e   :  { %v628_v9 = vadd.f32 %v627_v51, %v626_v22  ;;  %v827_v11 = vadd.f32 %v826_v8, %v825_v7  ;;  %v1786_v1 = vpop.f32.mrf.mxu3  ;;  %v838_v22 = vsel %vm503_vm0, %v744_v58, 0.0  ;;  %v840_v8 = vsel %vm503_vm0, %v745_v60, 0.0 }
 0x12f   :  { %564 = vst.msk [vmem:[%s1997_s2 + $0x1e0] sm:$0xff] %vm503_vm0, %v1786_v1  ;;  %v641_v51 = vsel %vm503_vm0, %v1358_v6, 0.0  ;;  %v645_v6 = vsel %vm503_vm0, %v1402_v16, 0.0 }
 0x130   :  { %v630_v3 = vadd.f32 %v629_v26, %v628_v9  ;;  %v829_v45 = vadd.f32 %v828_v14, %v827_v11  ;;  %v842_v14 = vsel %vm503_vm0, %v746_v56, 0.0  ;;  %v748_v26 = vmul.f32 %v1402_v16, %v1402_v16 }
 0x131   :  { %v750_v16 = vmul.f32 %v1445_v23, %v1445_v23  ;;  %v655_v56 = vsel %vm503_vm0, %v1520_v35, 0.0 }
 0x132   :  { %v632_v47 = vadd.f32 %v631_v34, %v630_v3  ;;  %v831_v49 = vadd.f32 %v830_v30, %v829_v45  ;;  %v844_v45 = vsel %vm503_vm0, %v747_v59, 0.0  ;;  %v749_v30 = vmul.f32 %v1420_v19, %v1420_v19 }
 0x133   :  { %v846_v13 = vsel %vm503_vm0, %v748_v26, 0.0  ;;  %v850_v58 = vsel %vm503_vm0, %v750_v16, 0.0  ;;  %v665_v16 = vsel %vm503_vm0, %v1684_v4, 0.0 }
 0x134   :  { %v833_v39 = vadd.f32 %v832_v50, %v831_v49  ;;  %v634_v12 = vadd.f32 %v633_v37, %v632_v47  ;;  %v647_v49 = vsel %vm503_vm0, %v1420_v19, 0.0  ;;  %v848_v52 = vsel %vm503_vm0, %v749_v30, 0.0 }
 0x135   :  { %v651_v19 = vsel %vm503_vm0, %v1470_v27, 0.0 }
 0x136   :  { %v835_v15 = vadd.f32 %v834_v33, %v833_v39  ;;  %v636_v18 = vadd.f32 %v635_v55, %v634_v12  ;;  %v1813_v34 = vpop.f32.mrf.mxu3  ;;  %v649_v39 = vsel %vm503_vm0, %v1445_v23, 0.0  ;;  %v751_v12 = vmul.f32 %v1470_v27, %v1470_v27 }
 0x137   :  { %565 = vst.msk [vmem:[%s1997_s2 + $0x1e8] sm:$0xff] %vm503_vm0, %v1813_v34  ;;  %v653_v23 = vsel %vm503_vm0, %v1495_v31, 0.0 }
 0x138   :  { %v837_v2 = vadd.f32 %v836_v57, %v835_v15  ;;  %v638_v42 = vadd.f32 %v637_v61, %v636_v18  ;;  %v752_v15 = vmul.f32 %v1495_v31, %v1495_v31  ;;  %v852_v57 = vsel %vm503_vm0, %v751_v12, 0.0 }
 0x139   :  { %v753_v61 = vmul.f32 %v1520_v35, %v1520_v35  ;;  %v754_v31 = vmul.f32 %v1545_v41, %v1545_v41  ;;  %v659_v35 = vsel %vm503_vm0, %v1579_v63, 0.0  ;;  %v760_v12 = vmul.f32 %v1752_v40, %v1752_v40 }
 0x13a   :  { %v640_v7 = vadd.f32 %v639_v48, %v638_v42  ;;  %v839_v10 = vadd.f32 %v838_v22, %v837_v2  ;;  %v854_v27 = vsel %vm503_vm0, %v752_v15, 0.0 }
 0x13c   :  { %v642_v9 = vadd.f32 %v641_v51, %v640_v7  ;;  %v841_v11 = vadd.f32 %v840_v8, %v839_v10  ;;  %v856_v10 = vsel %vm503_vm0, %v753_v61, 0.0  ;;  %v657_v8 = vsel %vm503_vm0, %v1545_v41, 0.0 }
 0x13d   :  { %v755_v51 = vmul.f32 %v1579_v63, %v1579_v63  ;;  %v661_v41 = vsel %vm503_vm0, %v1612_v29, 0.0 }
 0x13e   :  { %v644_v17 = vadd.f32 %v643_v62, %v642_v9  ;;  %v843_v3 = vadd.f32 %v842_v14, %v841_v11  ;;  %v1840_v2 = vpop.f32.mrf.mxu3  ;;  %v858_v11 = vsel %vm503_vm0, %v754_v31, 0.0  ;;  %v756_v14 = vmul.f32 %v1612_v29, %v1612_v29 }
 0x13f   :  { %566 = vst.msk [vmem:[%s1997_s2 + $0x1f0] sm:$0xff] %vm503_vm0, %v1840_v2  ;;  %v758_v29 = vmul.f32 %v1684_v4, %v1684_v4 }
 0x140   :  { %v646_v46 = vadd.f32 %v645_v6, %v644_v17  ;;  %v845_v47 = vadd.f32 %v844_v45, %v843_v3  ;;  %v860_v17 = vsel %vm503_vm0, %v755_v51, 0.0  ;;  %v757_v3 = vmul.f32 %v1645_v21, %v1645_v21 }
 0x141   :  { %v862_v63 = vsel %vm503_vm0, %v756_v14, 0.0  ;;  %v766_v14 = vmul.f32 %v1547_v43, %v1547_v43 }
 0x142   :  { %v648_v50 = vadd.f32 %v647_v49, %v646_v46  ;;  %v847_v37 = vadd.f32 %v846_v13, %v845_v47  ;;  %v663_v46 = vsel %vm503_vm0, %v1645_v21, 0.0  ;;  %v864_v49 = vsel %vm503_vm0, %v757_v3, 0.0 }
 0x143   :  { %v667_v21 = vsel %vm503_vm0, %v1718_v54, 0.0 }
 0x144   :  { %v650_v33 = vadd.f32 %v649_v39, %v648_v50  ;;  %v849_v55 = vadd.f32 %v848_v52, %v847_v37  ;;  %v759_v50 = vmul.f32 %v1718_v54, %v1718_v54  ;;  %v866_v39 = vsel %vm503_vm0, %v758_v29, 0.0 }
 0x145   :  { %v762_v54 = vmul.f32 %v1447_v24, %v1447_v24 }
 0x146   :  { %v851_v18 = vadd.f32 %v850_v58, %v849_v55  ;;  %v652_v60 = vadd.f32 %v651_v19, %v650_v33  ;;  %v1867_v45 = vpop.f32.mrf.mxu3  ;;  %v761_v58 = vmul.f32 %v1422_v20, %v1422_v20  ;;  %v868_v4 = vsel %vm503_vm0, %v759_v50, 0.0 }
 0x147   :  { %567 = vst.msk [vmem:[%s1997_s2 + $0x1f8] sm:$0xff] %vm503_vm0, %v1867_v45  ;;  %v669_v19 = vsel %vm503_vm0, %v1752_v40, 0.0  ;;  %v673_v40 = vsel %vm503_vm0, %v1447_v24, 0.0  ;;  %v874_v31 = vsel %vm503_vm0, %v762_v54, 0.0  ;;  %v677_v24 = vsel %vm503_vm0, %v1497_v32, 0.0 }
 0x148   :  { %v654_v42 = vadd.f32 %v653_v23, %v652_v60  ;;  %v853_v48 = vadd.f32 %v852_v57, %v851_v18  ;;  %v671_v60 = vsel %vm503_vm0, %v1422_v20, 0.0  ;;  %v870_v57 = vsel %vm503_vm0, %v760_v12, 0.0 }
 0x149   :  { %v1149_v23 = vmov 0.0   ;;  %v872_v20 = vsel %vm503_vm0, %v761_v58, 0.0  ;;  %v771_v12 = vmul.f32 %v1720_v38, %v1720_v38 }
 0x14a   :  { %v656_v22 = vadd.f32 %v655_v56, %v654_v42  ;;  %v855_v7 = vadd.f32 %v854_v27, %v853_v48  ;;  %573 = vst.msk [vmem:[%s1998_s3] sm:$0x1] %vm572_vm1, %v1149_v23  ;;  %v763_v48 = vmul.f32 %v1472_v28, %v1472_v28 }
 0x14b   :  { %574 = vst.msk [vmem:[%s1999_s4] sm:$0x1] %vm572_vm1, %v1149_v23 }
 0x14c   :  { %v658_v59 = vadd.f32 %v657_v8, %v656_v22  ;;  %v857_v9 = vadd.f32 %v856_v10, %v855_v7  ;;  %v675_v22 = vsel %vm503_vm0, %v1472_v28, 0.0  ;;  %v764_v7 = vmul.f32 %v1497_v32, %v1497_v32 }
 0x14d   :  { %v876_v51 = vsel %vm503_vm0, %v763_v48, 0.0  ;;  %v679_v28 = vsel %vm503_vm0, %v1522_v36, 0.0  ;;  %v681_v32 = vsel %vm503_vm0, %v1547_v43, 0.0  ;;  %v685_v43 = vsel %vm503_vm0, %v1614_v53, 0.0 }
 0x14e   :  { %v660_v62 = vadd.f32 %v659_v35, %v658_v59  ;;  %v859_v26 = vadd.f32 %v858_v11, %v857_v9  ;;  %v765_v59 = vmul.f32 %v1522_v36, %v1522_v36  ;;  %v878_v35 = vsel %vm503_vm0, %v764_v7, 0.0 }
 0x14f   :  { %v683_v36 = vsel %vm503_vm0, %v1581_v0, 0.0  ;;  %v775_v48 = vmul.f32 %v1840_v2, %v1840_v2 }
 0x150   :  { %v662_v6 = vadd.f32 %v661_v41, %v660_v62  ;;  %v861_v30 = vadd.f32 %v860_v17, %v859_v26  ;;  %v880_v17 = vsel %vm503_vm0, %v765_v59, 0.0  ;;  %v767_v41 = vmul.f32 %v1581_v0, %v1581_v0 }
 0x151   :  { %v687_v0 = vsel %vm503_vm0, %v1647_v25, 0.0 }
 0x152   :  { %v863_v47 = vadd.f32 %v862_v63, %v861_v30  ;;  %v664_v13 = vadd.f32 %v663_v46, %v662_v6  ;;  %v882_v30 = vsel %vm503_vm0, %v766_v14, 0.0  ;;  %v768_v63 = vmul.f32 %v1614_v53, %v1614_v53 }
 0x153   :  { %v689_v53 = vsel %vm503_vm0, %v1686_v5, 0.0 }
 0x154   :  { %v865_v37 = vadd.f32 %v864_v49, %v863_v47  ;;  %v666_v52 = vadd.f32 %v665_v16, %v664_v13  ;;  %v884_v47 = vsel %vm503_vm0, %v767_v41, 0.0  ;;  %v769_v13 = vmul.f32 %v1647_v25, %v1647_v25  ;;  %v575_v41 = vld [vmem:[%s1998_s3] sm:$0x1] }
 0x155   :  { %v886_v50 = vsel %vm503_vm0, %v768_v63, 0.0  ;;  %v691_v25 = vsel %vm503_vm0, %v1720_v38, 0.0  ;;  %v695_v38 = vsel %vm503_vm0, %v1786_v1, 0.0 }
 0x156   :  { %v867_v33 = vadd.f32 %v866_v39, %v865_v37  ;;  %v668_v55 = vadd.f32 %v667_v21, %v666_v52  ;;  %v770_v37 = vmul.f32 %v1686_v5, %v1686_v5  ;;  %v888_v21 = vsel %vm503_vm0, %v769_v13, 0.0 }
 0x157   :  { %v693_v5 = vsel %vm503_vm0, %v1754_v44, 0.0 }
 0x158   :  { %v869_v15 = vadd.f32 %v868_v4, %v867_v33  ;;  %v670_v18 = vadd.f32 %v669_v19, %v668_v55  ;;  %v890_v58 = vsel %vm503_vm0, %v770_v37, 0.0  ;;  %v772_v4 = vmul.f32 %v1754_v44, %v1754_v44 }
 0x159   :  { %v697_v44 = vsel %vm503_vm0, %v1813_v34, 0.0 }
 0x15a   :  { %v672_v61 = vadd.f32 %v671_v60, %v670_v18  ;;  %v871_v42 = vadd.f32 %v870_v57, %v869_v15  ;;  %v892_v18 = vsel %vm503_vm0, %v771_v12, 0.0  ;;  %v773_v60 = vmul.f32 %v1786_v1, %v1786_v1 }
 0x15b   :  { %v894_v23 = vsel %vm503_vm0, %v772_v4, 0.0  ;;  %v699_v1 = vsel %vm503_vm0, %v1840_v2, 0.0 }
 0x15c   :  { %v674_v27 = vadd.f32 %v673_v40, %v672_v61  ;;  %v873_v56 = vadd.f32 %v872_v20, %v871_v42  ;;  %v774_v61 = vmul.f32 %v1813_v34, %v1813_v34  ;;  %v896_v40 = vsel %vm503_vm0, %v773_v60, 0.0 }
 0x15d   :  { %v701_v34 = vsel %vm503_vm0, %v1867_v45, 0.0 }
 0x15e   :  { %v676_v10 = vadd.f32 %v675_v22, %v674_v27  ;;  %v875_v8 = vadd.f32 %v874_v31, %v873_v56  ;;  %v898_v31 = vsel %vm503_vm0, %v774_v61, 0.0  ;;  %v776_v22 = vmul.f32 %v1867_v45, %v1867_v45 }
 0x160   :  { %v678_v9 = vadd.f32 %v677_v24, %v676_v10  ;;  %v877_v11 = vadd.f32 %v876_v51, %v875_v8  ;;  %v900_v8 = vsel %vm503_vm0, %v775_v48, 0.0  ;;  %v902_v59 = vsel %vm503_vm0, %v776_v22, 0.0 }
 0x162   :  { %v680_v62 = vadd.f32 %v679_v28, %v678_v9  ;;  %v879_v26 = vadd.f32 %v878_v35, %v877_v11 }
 0x164   :  { %v682_v3 = vadd.f32 %v681_v32, %v680_v62  ;;  %v881_v6 = vadd.f32 %v880_v17, %v879_v26 }
 0x166   :  { %v883_v46 = vadd.f32 %v882_v30, %v881_v6  ;;  %v684_v29 = vadd.f32 %v683_v36, %v682_v3  ;;  %v712_v6 = vld [vmem:[%s1999_s4] sm:$0x1] }
 0x168   :  { %v686_v49 = vadd.f32 %v685_v43, %v684_v29  ;;  %v885_v16 = vadd.f32 %v884_v47, %v883_v46 }
 0x16a   :  { %v688_v52 = vadd.f32 %v687_v0, %v686_v49  ;;  %v887_v39 = vadd.f32 %v886_v50, %v885_v16 }
 0x16c   :  { %v690_v33 = vadd.f32 %v689_v53, %v688_v52  ;;  %v889_v55 = vadd.f32 %v888_v21, %v887_v39 }
 0x16e   :  { %v692_v19 = vadd.f32 %v691_v25, %v690_v33  ;;  %v891_v15 = vadd.f32 %v890_v58, %v889_v55 }
 0x170   :  { %v694_v54 = vadd.f32 %v693_v5, %v692_v19  ;;  %v893_v57 = vadd.f32 %v892_v18, %v891_v15 }
 0x172   :  { %v895_v42 = vadd.f32 %v894_v23, %v893_v57  ;;  %v696_v20 = vadd.f32 %v695_v38, %v694_v54 }
 0x174   :  { %v897_v27 = vadd.f32 %v896_v40, %v895_v42  ;;  %v698_v56 = vadd.f32 %v697_v44, %v696_v20 }
 0x176   :  { %v899_v7 = vadd.f32 %v898_v31, %v897_v27  ;;  %v700_v10 = vadd.f32 %v699_v1, %v698_v56 }
 0x178   :  { %v901_v51 = vadd.f32 %v900_v8, %v899_v7  ;;  %v702_v24 = vadd.f32 %v701_v34, %v700_v10 }
 0x17a   :  { %v703_v9 = vrot.slane %v702_v24, 4  ;;  %v903_v11 = vadd.f32 %v902_v59, %v901_v51 }
 0x17c   :  { %v704_v35 = vadd.f32 %v703_v9, %v702_v24  ;;  %v904_v28 = vrot.slane %v903_v11, 4 }
 0x17e   :  { %v705_v14 = vrot.slane %v704_v35, 2  ;;  %v905_v2 = vadd.f32 %v904_v28, %v903_v11 }
 0x180   :  { %v706_v62 = vadd.f32 %v705_v14, %v704_v35  ;;  %v906_v26 = vrot.slane %v905_v2, 2 }
 0x182   :  { %v707_v17 = vrot.slane %v706_v62, 1  ;;  %v907_v32 = vadd.f32 %v906_v26, %v905_v2 }
 0x184   :  { %v708_v3 = vadd.f32 %v707_v17, %v706_v62  ;;  %v908_v45 = vrot.slane %v907_v32, 1 }
 0x186   :  { %v709_v30 = vadd.f32 %v708_v3, %v575_v41  ;;  %v909_v36 = vadd.f32 %v908_v45, %v907_v32 }
 0x188   :  { %711 = vst.msk [vmem:[%s1998_s3] sm:$0x1] %vm572_vm1, %v709_v30  ;;  %v910_v63 = vadd.f32 %v909_v36, %v712_v6 }
 0x18a   :  { %911 = vst.msk [vmem:[%s1999_s4] sm:$0x1] %vm572_vm1, %v910_v63 }

// kernel: discriminator_forward.11
= control target key start
LH: loop header
LB: loop body
LE: loop exit
PB: predicated region body
PF: predicated region fallthrough
CT: control target
= control target key end

     0   :  { %vm134_vm0 = vcmask 257024   ;;  %s331_s0 = inlined_call_operand.vmem [shape: f32[128,32], index: 0, kind: input, shape index: {}]   ;;  %s332_s1 = inlined_call_operand.vmem [shape: f32[1,32], index: 1, kind: input, shape index: {}]   ;;  %s333_s2 = inlined_call_operand.vmem [shape: f32[1,32], index: 2, kind: input, shape index: {}]   ;;  %s334_s3 = inlined_call_operand.vmem [shape: bf16[128,32], index: 3, kind: output, shape index: {}]  }
   0x1   :  { %v14_v0 = vld [vmem:[%s331_s0] sm:$0xff]  ;;  %v15_v3 = vld [vmem:[%s331_s0 + $0x8] sm:$0xff]  ;;  %v16_v6 = vld [vmem:[%s331_s0 + $0x10] sm:$0xff] }
   0x2   :  { %v183_v1 = vld [vmem:[%s332_s1] ss:$0 sm:$0xff]  ;;  %v17_v7 = vld [vmem:[%s331_s0 + $0x18] sm:$0xff]  ;;  %v19_v12 = vld [vmem:[%s331_s0 + $0x28] sm:$0xff] }
   0x3   :  { %v188_v2 = vld [vmem:[%s333_s2] ss:$0 sm:$0xff]  ;;  %v34_v4 = vmul.f32 %v183_v1, %v14_v0  ;;  %v35_v5 = vmul.f32 %v183_v1, %v15_v3  ;;  %v36_v9 = vmul.f32 %v183_v1, %v16_v6  ;;  %v37_v10 = vmul.f32 %v183_v1, %v17_v7  ;;  %v20_v13 = vld [vmem:[%s331_s0 + $0x30] sm:$0xff]  ;;  %v21_v14 = vld [vmem:[%s331_s0 + $0x38] sm:$0xff] }
   0x4   :  { %v18_v8 = vld [vmem:[%s331_s0 + $0x20] sm:$0xff]  ;;  %v39_v17 = vmul.f32 %v183_v1, %v19_v12  ;;  %v40_v18 = vmul.f32 %v183_v1, %v20_v13  ;;  %v41_v22 = vmul.f32 %v183_v1, %v21_v14  ;;  %v23_v35 = vld [vmem:[%s331_s0 + $0x48] sm:$0xff]  ;;  %v24_v36 = vld [vmem:[%s331_s0 + $0x50] sm:$0xff] }
   0x5   :  { %v38_v11 = vmul.f32 %v183_v1, %v18_v8  ;;  %v54_v15 = vadd.f32 %v188_v2, %v34_v4  ;;  %v55_v16 = vadd.f32 %v188_v2, %v35_v5  ;;  %v56_v19 = vadd.f32 %v188_v2, %v36_v9  ;;  %v22_v30 = vld [vmem:[%s331_s0 + $0x40] sm:$0xff]  ;;  %v25_v54 = vld [vmem:[%s331_s0 + $0x58] sm:$0xff]  ;;  %v27_v62 = vld [vmem:[%s331_s0 + $0x68] sm:$0xff] }
   0x6   :  { %v57_v20 = vadd.f32 %v188_v2, %v37_v10  ;;  %v59_v40 = vadd.f32 %v188_v2, %v39_v17  ;;  %v60_v42 = vadd.f32 %v188_v2, %v40_v18  ;;  %v61_v43 = vadd.f32 %v188_v2, %v41_v22  ;;  %v26_v58 = vld [vmem:[%s331_s0 + $0x60] sm:$0xff]  ;;  %v28_v63 = vld [vmem:[%s331_s0 + $0x70] sm:$0xff]  ;;  %v29_v5 = vld [vmem:[%s331_s0 + $0x78] sm:$0xff] }
   0x7   :  { %v58_v21 = vadd.f32 %v188_v2, %v38_v11  ;;  %vm70_vm1 = vcmp.gt.f32.partialorder %v54_v15, 0.0  ;;  %v86_v23 = vmul.f32 0.2, %v54_v15  ;;  %vm71_vm2 = vcmp.gt.f32.partialorder %v55_v16, 0.0 }
   0x8   :  { %v87_v24 = vmul.f32 0.2, %v55_v16  ;;  %vm72_vm3 = vcmp.gt.f32.partialorder %v56_v19, 0.0  ;;  %v88_v25 = vmul.f32 0.2, %v56_v19  ;;  %vm73_vm4 = vcmp.gt.f32.partialorder %v57_v20, 0.0 }
   0x9   :  { %v89_v26 = vmul.f32 0.2, %v57_v20  ;;  %v102_v27 = vsel %vm70_vm1, %v54_v15, %v86_v23  ;;  %vm74_vm5 = vcmp.gt.f32.partialorder %v58_v21, 0.0  ;;  %v90_v29 = vmul.f32 0.2, %v58_v21 }
   0xa   :  { %v103_v28 = vsel %vm71_vm2, %v55_v16, %v87_v24  ;;  %v118_v31 = vpack.c.bf16 %v102_v27, %v102_v27  ;;  %v104_v33 = vsel %vm72_vm3, %v56_v19, %v88_v25  ;;  %v42_v44 = vmul.f32 %v183_v1, %v22_v30 }
   0xb   :  { %v119_v32 = vpack.c.bf16 %v103_v28, %v103_v28  ;;  %v105_v34 = vsel %vm73_vm4, %v57_v20, %v89_v26  ;;  %v120_v37 = vpack.c.bf16 %v104_v33, %v104_v33  ;;  %v106_v39 = vsel %vm74_vm5, %v58_v21, %v90_v29 }
   0xc   :  { %v121_v38 = vpack.c.bf16 %v105_v34, %v105_v34  ;;  %135 = vst.msk [vmem:[%s334_s3] sm:$0xf] %vm134_vm0, %v118_v31  ;;  %v122_v41 = vpack.c.bf16 %v106_v39, %v106_v39  ;;  %vm75_vm6 = vcmp.gt.f32.partialorder %v59_v40, 0.0  ;;  %v91_v45 = vmul.f32 0.2, %v59_v40 }
   0xd   :  { %136 = vst.msk [vmem:[%s334_s3 + $0x4] sm:$0xf] %vm134_vm0, %v119_v32  ;;  %v43_v46 = vmul.f32 %v183_v1, %v23_v35  ;;  %v44_v47 = vmul.f32 %v183_v1, %v24_v36  ;;  %vm76_vm7 = vcmp.gt.f32.partialorder %v60_v42, 0.0  ;;  %v92_v48 = vmul.f32 0.2, %v60_v42 }
   0xe   :  { %137 = vst.msk [vmem:[%s334_s3 + $0x8] sm:$0xf] %vm134_vm0, %v120_v37  ;;  %vm77_vm8 = vcmp.gt.f32.partialorder %v61_v43, 0.0  ;;  %v62_v49 = vadd.f32 %v188_v2, %v42_v44  ;;  %v107_v50 = vsel %vm75_vm6, %v59_v40, %v91_v45  ;;  %v93_v51 = vmul.f32 0.2, %v61_v43 }
   0xf   :  { %138 = vst.msk [vmem:[%s334_s3 + $0xc] sm:$0xf] %vm134_vm0, %v121_v38  ;;  %v63_v52 = vadd.f32 %v188_v2, %v43_v46  ;;  %v64_v53 = vadd.f32 %v188_v2, %v44_v47  ;;  %v123_v55 = vpack.c.bf16 %v107_v50, %v107_v50  ;;  %v108_v56 = vsel %vm76_vm7, %v60_v42, %v92_v48 }
  0x10   :  { %139 = vst.msk [vmem:[%s334_s3 + $0x10] sm:$0xf] %vm134_vm0, %v122_v41  ;;  %vm78_vm9 = vcmp.gt.f32.partialorder %v62_v49, 0.0  ;;  %v94_v57 = vmul.f32 0.2, %v62_v49  ;;  %v124_v59 = vpack.c.bf16 %v108_v56, %v108_v56  ;;  %v109_v60 = vsel %vm77_vm8, %v61_v43, %v93_v51 }
  0x11   :  { %vm79_vm10 = vcmp.gt.f32.partialorder %v63_v52, 0.0  ;;  %v95_v61 = vmul.f32 0.2, %v63_v52  ;;  %140 = vst.msk [vmem:[%s334_s3 + $0x14] sm:$0xf] %vm134_vm0, %v123_v55  ;;  %v125_v0 = vpack.c.bf16 %v109_v60, %v109_v60  ;;  %vm80_vm11 = vcmp.gt.f32.partialorder %v64_v53, 0.0 }
  0x12   :  { %v110_v3 = vsel %vm78_vm9, %v62_v49, %v94_v57  ;;  %v96_v4 = vmul.f32 0.2, %v64_v53  ;;  %141 = vst.msk [vmem:[%s334_s3 + $0x18] sm:$0xf] %vm134_vm0, %v124_v59  ;;  %v45_v8 = vmul.f32 %v183_v1, %v25_v54  ;;  %v46_v9 = vmul.f32 %v183_v1, %v26_v58 }
  0x13   :  { %v126_v6 = vpack.c.bf16 %v110_v3, %v110_v3  ;;  %v111_v7 = vsel %vm79_vm10, %v63_v52, %v95_v61  ;;  %142 = vst.msk [vmem:[%s334_s3 + $0x1c] sm:$0xf] %vm134_vm0, %v125_v0  ;;  %v47_v12 = vmul.f32 %v183_v1, %v27_v62  ;;  %v48_v13 = vmul.f32 %v183_v1, %v28_v63 }
  0x14   :  { %v127_v10 = vpack.c.bf16 %v111_v7, %v111_v7  ;;  %v112_v11 = vsel %vm80_vm11, %v64_v53, %v96_v4  ;;  %v65_v15 = vadd.f32 %v188_v2, %v45_v8  ;;  %v66_v16 = vadd.f32 %v188_v2, %v46_v9 }
  0x15   :  { %143 = vst.msk [vmem:[%s334_s3 + $0x20] sm:$0xf] %vm134_vm0, %v126_v6  ;;  %v128_v14 = vpack.c.bf16 %v112_v11, %v112_v11  ;;  %v49_v17 = vmul.f32 %v183_v1, %v29_v5  ;;  %v67_v18 = vadd.f32 %v188_v2, %v47_v12  ;;  %v68_v19 = vadd.f32 %v188_v2, %v48_v13 }
  0x16   :  { %144 = vst.msk [vmem:[%s334_s3 + $0x24] sm:$0xf] %vm134_vm0, %v127_v10  ;;  %vm81_vm12 = vcmp.gt.f32.partialorder %v65_v15, 0.0  ;;  %v97_v20 = vmul.f32 0.2, %v65_v15  ;;  %vm82_vm13 = vcmp.gt.f32.partialorder %v66_v16, 0.0 }
  0x17   :  { %145 = vst.msk [vmem:[%s334_s3 + $0x28] sm:$0xf] %vm134_vm0, %v128_v14  ;;  %v69_v21 = vadd.f32 %v188_v2, %v49_v17  ;;  %v98_v1 = vmul.f32 0.2, %v66_v16  ;;  %vm83_vm14 = vcmp.gt.f32.partialorder %v67_v18, 0.0  ;;  %vm84_vm15 = vcmp.gt.f32.partialorder %v68_v19, 0.0 }
  0x18   :  { %v99_v22 = vmul.f32 0.2, %v67_v18  ;;  %v113_v23 = vsel %vm81_vm12, %v65_v15, %v97_v20  ;;  %v100_v24 = vmul.f32 0.2, %v68_v19 }
  0x19   :  { %vm85_vm1 = vcmp.gt.f32.partialorder %v69_v21, 0.0  ;;  %v101_v25 = vmul.f32 0.2, %v69_v21  ;;  %v129_v26 = vpack.c.bf16 %v113_v23, %v113_v23  ;;  %v114_v27 = vsel %vm82_vm13, %v66_v16, %v98_v1 }
  0x1a   :  { %v115_v28 = vsel %vm83_vm14, %v67_v18, %v99_v22  ;;  %v130_v29 = vpack.c.bf16 %v114_v27, %v114_v27  ;;  %v116_v31 = vsel %vm84_vm15, %v68_v19, %v100_v24 }
  0x1b   :  { %v131_v30 = vpack.c.bf16 %v115_v28, %v115_v28  ;;  %v117_v32 = vsel %vm85_vm1, %v69_v21, %v101_v25  ;;  %146 = vst.msk [vmem:[%s334_s3 + $0x2c] sm:$0xf] %vm134_vm0, %v129_v26  ;;  %v132_v2 = vpack.c.bf16 %v116_v31, %v116_v31 }
  0x1c   :  { %v133_v33 = vpack.c.bf16 %v117_v32, %v117_v32  ;;  %147 = vst.msk [vmem:[%s334_s3 + $0x30] sm:$0xf] %vm134_vm0, %v130_v29 }
  0x1d   :  { %148 = vst.msk [vmem:[%s334_s3 + $0x34] sm:$0xf] %vm134_vm0, %v131_v30 }
  0x1e   :  { %149 = vst.msk [vmem:[%s334_s3 + $0x38] sm:$0xf] %vm134_vm0, %v132_v2 }
  0x1f   :  { %150 = vst.msk [vmem:[%s334_s3 + $0x3c] sm:$0xf] %vm134_vm0, %v133_v33 }

// kernel: discriminator_forward.10
= control target key start
LH: loop header
LB: loop body
LE: loop exit
PB: predicated region body
PF: predicated region fallthrough
CT: control target
= control target key end

     0   :  { %vm336_vm0 = vcmask 261120   ;;  %vm357_vm1 = vcmask 253952   ;;  %s970_s1 = inlined_call_operand.vmem [shape: bf16[256,32], index: 1, kind: input, shape index: {}]   ;;  %s971_s0 = inlined_call_operand.vmem [shape: bf16[128,256], index: 0, kind: input, shape index: {}]   ;;  %s972_s2 = inlined_call_operand.vmem [shape: f32[128,32], index: 2, kind: output, shape index: {0}]   ;;  %s973_s3 = inlined_call_operand.vmem [shape: f32[1,32], index: 3, kind: output, shape index: {1}]   ;;  %s974_s4 = inlined_call_operand.vmem [shape: f32[1,32], index: 4, kind: output, shape index: {2}]  }
   0x1   :  { %v620_v0 = vld [vmem:[%s970_s1 + $0x38] sm:$0xff]  ;;  %v619_v2 = vld [vmem:[%s970_s1 + $0x30] sm:$0xff]  ;;  %v618_v4 = vld [vmem:[%s970_s1 + $0x28] sm:$0xff] }
   0x2   :  { %v628_v1 = vld [vmem:[%s970_s1 + $0x78] sm:$0xff]  ;;  %238 = vmatpush.bf16.msra.mxu0 %v620_v0  ;;  %v627_v3 = vld [vmem:[%s970_s1 + $0x70] sm:$0xff]  ;;  %629 = vmatpush.bf16.msra.mxu2 %v620_v0  ;;  %v626_v5 = vld [vmem:[%s970_s1 + $0x68] sm:$0xff] }
   0x3   :  { %287 = vmatpush.bf16.msra.mxu1 %v628_v1  ;;  %637 = vmatpush.bf16.msra.mxu3 %v628_v1  ;;  %v617_v6 = vld [vmem:[%s970_s1 + $0x20] sm:$0xff]  ;;  %v616_v8 = vld [vmem:[%s970_s1 + $0x18] sm:$0xff]  ;;  %v615_v10 = vld [vmem:[%s970_s1 + $0x10] sm:$0xff] }
   0x4   :  { %v625_v7 = vld [vmem:[%s970_s1 + $0x60] sm:$0xff]  ;;  %v624_v9 = vld [vmem:[%s970_s1 + $0x58] sm:$0xff]  ;;  %v623_v11 = vld [vmem:[%s970_s1 + $0x50] sm:$0xff] }
   0x5   :  { %v614_v12 = vld [vmem:[%s970_s1 + $0x8] sm:$0xff]  ;;  %v613_v14 = vld [vmem:[%s970_s1] sm:$0xff]  ;;  %v479_v28 = vld [vmem:[%s971_s0 + $0x10] sm:$0xf] }
   0x6   :  { %239 = vmatpush.bf16.msra.mxu0 %v619_v2  ;;  %630 = vmatpush.bf16.msra.mxu2 %v619_v2  ;;  %v622_v13 = vld [vmem:[%s970_s1 + $0x48] sm:$0xff]  ;;  %v621_v15 = vld [vmem:[%s970_s1 + $0x40] sm:$0xff]  ;;  %v600_v29 = vld [vmem:[%s971_s0 + $0x14] sm:$0xf0] }
   0x7   :  { %288 = vmatpush.bf16.msra.mxu1 %v627_v3  ;;  %638 = vmatpush.bf16.msra.mxu3 %v627_v3  ;;  %v471_v16 = vld [vmem:[%s971_s0] sm:$0xf]  ;;  %v598_v17 = vld [vmem:[%s971_s0 + $0x4] sm:$0xf0]  ;;  %v597_v18 = vld [vmem:[%s971_s0 + $0x4] sm:$0xf]  ;;  %v480_v36 = vor.u32 %v600_v29, %v479_v28 }
   0x8   :  { %v473_v19 = vld [vmem:[%s971_s0 + $0x8] sm:$0xf0]  ;;  %v503_v20 = vld [vmem:[%s971_s0 + $0x40] sm:$0xf]  ;;  %v606_v21 = vld [vmem:[%s971_s0 + $0x44] sm:$0xf0]  ;;  %v472_v24 = vor.u32 %v598_v17, %v471_v16 }
   0x9   :  { %v605_v22 = vld [vmem:[%s971_s0 + $0x44] sm:$0xf]  ;;  %v505_v23 = vld [vmem:[%s971_s0 + $0x48] sm:$0xf0]  ;;  %v476_v25 = vor.u32 %v597_v18, %v473_v19  ;;  %v504_v26 = vor.u32 %v606_v21, %v503_v20  ;;  %v599_v30 = vld [vmem:[%s971_s0 + $0x14] sm:$0xf] }
   0xa   :  { %240 = vmatpush.bf16.msra.mxu0 %v618_v4  ;;  %631 = vmatpush.bf16.msra.mxu2 %v618_v4  ;;  %v508_v27 = vor.u32 %v605_v22, %v505_v23  ;;  %v481_v31 = vld [vmem:[%s971_s0 + $0x18] sm:$0xf0]  ;;  %v511_v32 = vld [vmem:[%s971_s0 + $0x50] sm:$0xf]  ;;  %v608_v33 = vld [vmem:[%s971_s0 + $0x54] sm:$0xf0] }
   0xb   :  { %289 = vmatpush.bf16.msra.mxu1 %v626_v5  ;;  %639 = vmatpush.bf16.msra.mxu3 %v626_v5  ;;  %v607_v34 = vld [vmem:[%s971_s0 + $0x54] sm:$0xf]  ;;  %v513_v35 = vld [vmem:[%s971_s0 + $0x58] sm:$0xf0]  ;;  %v484_v37 = vor.u32 %v599_v30, %v481_v31  ;;  %v512_v38 = vor.u32 %v608_v33, %v511_v32  ;;  %v487_v40 = vld [vmem:[%s971_s0 + $0x20] sm:$0xf] }
   0xc   :  { %v516_v39 = vor.u32 %v607_v34, %v513_v35  ;;  %v602_v41 = vld [vmem:[%s971_s0 + $0x24] sm:$0xf0]  ;;  %v601_v42 = vld [vmem:[%s971_s0 + $0x24] sm:$0xf]  ;;  %v489_v43 = vld [vmem:[%s971_s0 + $0x28] sm:$0xf0] }
   0xd   :  { %v519_v44 = vld [vmem:[%s971_s0 + $0x60] sm:$0xf]  ;;  %v610_v45 = vld [vmem:[%s971_s0 + $0x64] sm:$0xf0]  ;;  %v609_v46 = vld [vmem:[%s971_s0 + $0x64] sm:$0xf]  ;;  %v488_v48 = vor.u32 %v602_v41, %v487_v40  ;;  %v492_v49 = vor.u32 %v601_v42, %v489_v43 }
   0xe   :  { %241 = vmatpush.bf16.msra.mxu0 %v617_v6  ;;  %632 = vmatpush.bf16.msra.mxu2 %v617_v6  ;;  %v521_v47 = vld [vmem:[%s971_s0 + $0x68] sm:$0xf0]  ;;  %v520_v50 = vor.u32 %v610_v45, %v519_v44  ;;  %v495_v52 = vld [vmem:[%s971_s0 + $0x30] sm:$0xf]  ;;  %v604_v53 = vld [vmem:[%s971_s0 + $0x34] sm:$0xf0] }
   0xf   :  { %290 = vmatpush.bf16.msra.mxu1 %v625_v7  ;;  %640 = vmatpush.bf16.msra.mxu3 %v625_v7  ;;  %v524_v51 = vor.u32 %v609_v46, %v521_v47  ;;  %v603_v54 = vld [vmem:[%s971_s0 + $0x34] sm:$0xf]  ;;  %v497_v55 = vld [vmem:[%s971_s0 + $0x38] sm:$0xf0]  ;;  %v527_v56 = vld [vmem:[%s971_s0 + $0x70] sm:$0xf]  ;;  %v496_v60 = vor.u32 %v604_v53, %v495_v52 }
  0x10   :  { %v612_v57 = vld [vmem:[%s971_s0 + $0x74] sm:$0xf0]  ;;  %v611_v58 = vld [vmem:[%s971_s0 + $0x74] sm:$0xf]  ;;  %v529_v59 = vld [vmem:[%s971_s0 + $0x78] sm:$0xf0]  ;;  %v500_v61 = vor.u32 %v603_v54, %v497_v55 }
  0x11   :  { %v528_v62 = vor.u32 %v612_v57, %v527_v56  ;;  %v532_v63 = vor.u32 %v611_v58, %v529_v59 }
  0x12   :  { %242 = vmatpush.bf16.msra.mxu0 %v616_v8  ;;  %633 = vmatpush.bf16.msra.mxu2 %v616_v8 }
  0x13   :  { %291 = vmatpush.bf16.msra.mxu1 %v624_v9  ;;  %641 = vmatpush.bf16.msra.mxu3 %v624_v9 }
  0x16   :  { %243 = vmatpush.bf16.msra.mxu0 %v615_v10  ;;  %634 = vmatpush.bf16.msra.mxu2 %v615_v10 }
  0x17   :  { %292 = vmatpush.bf16.msra.mxu1 %v623_v11  ;;  %642 = vmatpush.bf16.msra.mxu3 %v623_v11 }
  0x1a   :  { %244 = vmatpush.bf16.msra.mxu0 %v614_v12  ;;  %635 = vmatpush.bf16.msra.mxu2 %v614_v12 }
  0x1b   :  { %293 = vmatpush.bf16.msra.mxu1 %v622_v13  ;;  %643 = vmatpush.bf16.msra.mxu3 %v622_v13 }
  0x1e   :  { %245 = vmatpush.bf16.msra.mxu0 %v613_v14  ;;  %636 = vmatpush.bf16.msra.mxu2 %v613_v14 }
  0x1f   :  { %294 = vmatpush.bf16.msra.mxu1 %v621_v15  ;;  %644 = vmatpush.bf16.msra.mxu3 %v621_v15 }
  0x21   :  { %246 = vmatmul.bf16.vlgmr.msra.gmra.mxu0 %v472_v24  ;;  %266 = vmatmul.bf16.vlgmr.msra.gmra.mxu2 %v504_v26 }
  0x22   :  { %295 = vmatmul.bf16.vlgmr.msra.gmra.mxu1 %v476_v25  ;;  %315 = vmatmul.bf16.vlgmr.msra.gmra.mxu3 %v508_v27 }
  0x31   :  { %251 = vmatmul.bf16.gmra.mxu0 %v480_v36  ;;  %271 = vmatmul.bf16.gmra.mxu2 %v512_v38 }
  0x32   :  { %300 = vmatmul.bf16.gmra.mxu1 %v484_v37  ;;  %320 = vmatmul.bf16.gmra.mxu3 %v516_v39  ;;  %v646_v37 = vmov 0.0  }
  0x33   :  { %358 = vst.msk [vmem:[%s973_s3] sm:$0x1] %vm357_vm1, %v646_v37 }
  0x34   :  { %359 = vst.msk [vmem:[%s974_s4] sm:$0x1] %vm357_vm1, %v646_v37 }
  0x41   :  { %256 = vmatmul.bf16.gmra.mxu0 %v488_v48  ;;  %276 = vmatmul.bf16.gmra.mxu2 %v520_v50 }
  0x42   :  { %305 = vmatmul.bf16.gmra.mxu1 %v492_v49  ;;  %325 = vmatmul.bf16.gmra.mxu3 %v524_v51 }
  0x51   :  { %261 = vmatmul.bf16.gmra.mxu0 %v496_v60  ;;  %281 = vmatmul.bf16.gmra.mxu2 %v528_v62 }
  0x52   :  { %310 = vmatmul.bf16.gmra.mxu1 %v500_v61  ;;  %330 = vmatmul.bf16.gmra.mxu3 %v532_v63 }
  0x9e   :  { %v247_v0 = vpop.f32.mrf.mxu0 }
  0x9f   :  { %v296_v1 = vpop.f32.mrf.mxu1 }
  0xa0   :  { %v297_v2 = vadd.f32 %v296_v1, %v247_v0 }
  0xa2   :  { %337 = vst.msk [vmem:[%s972_s2] sm:$0xff] %vm336_vm0, %v297_v2  ;;  %v402_v34 = vmul.f32 %v297_v2, %v297_v2  ;;  %v361_v38 = vsel %vm336_vm0, %v297_v2, 0.0 }
  0xa4   :  { %v267_v3 = vpop.f32.mrf.mxu2  ;;  %v418_v44 = vsel %vm336_vm0, %v402_v34, 0.0 }
  0xa5   :  { %v316_v4 = vpop.f32.mrf.mxu3 }
  0xa6   :  { %v249_v5 = vpop.f32.mrf.mxu0  ;;  %v820_v7 = vadd.f32 %v316_v4, %v267_v3 }
  0xa7   :  { %v298_v6 = vpop.f32.mrf.mxu1 }
  0xa8   :  { %v299_v8 = vadd.f32 %v298_v6, %v249_v5  ;;  %345 = vst.msk [vmem:[%s972_s2 + $0x40] sm:$0xff] %vm336_vm0, %v820_v7 }
  0xaa   :  { %338 = vst.msk [vmem:[%s972_s2 + $0x8] sm:$0xff] %vm336_vm0, %v299_v8  ;;  %v403_v33 = vmul.f32 %v299_v8, %v299_v8  ;;  %v362_v35 = vsel %vm336_vm0, %v299_v8, 0.0 }
  0xab   :  { %v363_v45 = vadd.f32 %v362_v35, %v361_v38 }
  0xac   :  { %v269_v9 = vpop.f32.mrf.mxu2  ;;  %v419_v39 = vsel %vm336_vm0, %v403_v33, 0.0 }
  0xad   :  { %v318_v10 = vpop.f32.mrf.mxu3  ;;  %v420_v53 = vadd.f32 %v419_v39, %v418_v44 }
  0xae   :  { %v252_v11 = vpop.f32.mrf.mxu0  ;;  %v831_v13 = vadd.f32 %v318_v10, %v269_v9 }
  0xaf   :  { %v301_v12 = vpop.f32.mrf.mxu1 }
  0xb0   :  { %v302_v14 = vadd.f32 %v301_v12, %v252_v11  ;;  %346 = vst.msk [vmem:[%s972_s2 + $0x48] sm:$0xff] %vm336_vm0, %v831_v13 }
  0xb2   :  { %339 = vst.msk [vmem:[%s972_s2 + $0x10] sm:$0xff] %vm336_vm0, %v302_v14  ;;  %v404_v36 = vmul.f32 %v302_v14, %v302_v14  ;;  %v364_v40 = vsel %vm336_vm0, %v302_v14, 0.0 }
  0xb3   :  { %v365_v54 = vadd.f32 %v364_v40, %v363_v45 }
  0xb4   :  { %v272_v15 = vpop.f32.mrf.mxu2  ;;  %v421_v49 = vsel %vm336_vm0, %v404_v36, 0.0 }
  0xb5   :  { %v321_v16 = vpop.f32.mrf.mxu3  ;;  %v422_v58 = vadd.f32 %v421_v49, %v420_v53 }
  0xb6   :  { %v254_v17 = vpop.f32.mrf.mxu0  ;;  %v842_v19 = vadd.f32 %v321_v16, %v272_v15  ;;  %v410_v16 = vmul.f32 %v820_v7, %v820_v7 }
  0xb7   :  { %v303_v18 = vpop.f32.mrf.mxu1 }
  0xb8   :  { %v304_v20 = vadd.f32 %v303_v18, %v254_v17  ;;  %347 = vst.msk [vmem:[%s972_s2 + $0x50] sm:$0xff] %vm336_vm0, %v842_v19  ;;  %v380_v37 = vsel %vm336_vm0, %v842_v19, 0.0 }
  0xba   :  { %340 = vst.msk [vmem:[%s972_s2 + $0x18] sm:$0xff] %vm336_vm0, %v304_v20  ;;  %v405_v41 = vmul.f32 %v304_v20, %v304_v20  ;;  %v366_v50 = vsel %vm336_vm0, %v304_v20, 0.0 }
  0xbb   :  { %v367_v59 = vadd.f32 %v366_v50, %v365_v54 }
  0xbc   :  { %v274_v21 = vpop.f32.mrf.mxu2  ;;  %v423_v55 = vsel %vm336_vm0, %v405_v41, 0.0 }
  0xbd   :  { %v323_v22 = vpop.f32.mrf.mxu3  ;;  %v424_v63 = vadd.f32 %v423_v55, %v422_v58 }
  0xbe   :  { %v257_v23 = vpop.f32.mrf.mxu0  ;;  %v853_v25 = vadd.f32 %v323_v22, %v274_v21  ;;  %v376_v22 = vsel %vm336_vm0, %v820_v7, 0.0 }
  0xbf   :  { %v306_v24 = vpop.f32.mrf.mxu1 }
  0xc0   :  { %v307_v26 = vadd.f32 %v306_v24, %v257_v23  ;;  %348 = vst.msk [vmem:[%s972_s2 + $0x58] sm:$0xff] %vm336_vm0, %v853_v25  ;;  %v411_v23 = vmul.f32 %v831_v13, %v831_v13  ;;  %v413_v38 = vmul.f32 %v853_v25, %v853_v25  ;;  %v382_v41 = vsel %vm336_vm0, %v853_v25, 0.0 }
  0xc2   :  { %341 = vst.msk [vmem:[%s972_s2 + $0x20] sm:$0xff] %vm336_vm0, %v307_v26  ;;  %v406_v51 = vmul.f32 %v307_v26, %v307_v26  ;;  %v368_v56 = vsel %vm336_vm0, %v307_v26, 0.0  ;;  %v435_v36 = vsel %vm336_vm0, %v411_v23, 0.0  ;;  %v439_v44 = vsel %vm336_vm0, %v413_v38, 0.0 }
  0xc3   :  { %v369_v0 = vadd.f32 %v368_v56, %v367_v59 }
  0xc4   :  { %v277_v27 = vpop.f32.mrf.mxu2  ;;  %v425_v60 = vsel %vm336_vm0, %v406_v51, 0.0 }
  0xc5   :  { %v326_v28 = vpop.f32.mrf.mxu3  ;;  %v426_v5 = vadd.f32 %v425_v60, %v424_v63 }
  0xc6   :  { %v259_v29 = vpop.f32.mrf.mxu0  ;;  %v864_v31 = vadd.f32 %v326_v28, %v277_v27  ;;  %v433_v28 = vsel %vm336_vm0, %v410_v16, 0.0 }
  0xc7   :  { %v308_v30 = vpop.f32.mrf.mxu1 }
  0xc8   :  { %v309_v32 = vadd.f32 %v308_v30, %v259_v29  ;;  %349 = vst.msk [vmem:[%s972_s2 + $0x60] sm:$0xff] %vm336_vm0, %v864_v31  ;;  %v378_v29 = vsel %vm336_vm0, %v831_v13, 0.0  ;;  %v412_v30 = vmul.f32 %v842_v19, %v842_v19  ;;  %v384_v45 = vsel %vm336_vm0, %v864_v31, 0.0 }
  0xca   :  { %342 = vst.msk [vmem:[%s972_s2 + $0x28] sm:$0xff] %vm336_vm0, %v309_v32  ;;  %v407_v57 = vmul.f32 %v309_v32, %v309_v32  ;;  %v370_v61 = vsel %vm336_vm0, %v309_v32, 0.0  ;;  %v437_v13 = vsel %vm336_vm0, %v412_v30, 0.0 }
  0xcb   :  { %v371_v6 = vadd.f32 %v370_v61, %v369_v0 }
  0xcc   :  { %v279_v42 = vpop.f32.mrf.mxu2  ;;  %v427_v1 = vsel %vm336_vm0, %v407_v57, 0.0 }
  0xcd   :  { %v328_v43 = vpop.f32.mrf.mxu3  ;;  %v428_v14 = vadd.f32 %v427_v1, %v426_v5 }
  0xce   :  { %v262_v46 = vpop.f32.mrf.mxu0  ;;  %v888_v48 = vadd.f32 %v328_v43, %v279_v42  ;;  %v414_v42 = vmul.f32 %v864_v31, %v864_v31 }
  0xcf   :  { %v311_v47 = vpop.f32.mrf.mxu1 }
  0xd0   :  { %v312_v52 = vadd.f32 %v311_v47, %v262_v46  ;;  %350 = vst.msk [vmem:[%s972_s2 + $0x68] sm:$0xff] %vm336_vm0, %v888_v48  ;;  %v415_v46 = vmul.f32 %v888_v48, %v888_v48  ;;  %v441_v50 = vsel %vm336_vm0, %v414_v42, 0.0  ;;  %v386_v25 = vsel %vm336_vm0, %v888_v48, 0.0 }
  0xd2   :  { %343 = vst.msk [vmem:[%s972_s2 + $0x30] sm:$0xff] %vm336_vm0, %v312_v52  ;;  %v408_v62 = vmul.f32 %v312_v52, %v312_v52  ;;  %v372_v2 = vsel %vm336_vm0, %v312_v52, 0.0  ;;  %v443_v54 = vsel %vm336_vm0, %v415_v46, 0.0 }
  0xd3   :  { %v373_v15 = vadd.f32 %v372_v2, %v371_v6 }
  0xd4   :  { %v282_v3 = vpop.f32.mrf.mxu2  ;;  %v429_v11 = vsel %vm336_vm0, %v408_v62, 0.0 }
  0xd5   :  { %v331_v4 = vpop.f32.mrf.mxu3  ;;  %v430_v20 = vadd.f32 %v429_v11, %v428_v14 }
  0xd6   :  { %v264_v8 = vpop.f32.mrf.mxu0  ;;  %v332_v10 = vadd.f32 %v331_v4, %v282_v3 }
  0xd7   :  { %v313_v9 = vpop.f32.mrf.mxu1 }
  0xd8   :  { %v314_v12 = vadd.f32 %v313_v9, %v264_v8  ;;  %351 = vst.msk [vmem:[%s972_s2 + $0x70] sm:$0xff] %vm336_vm0, %v332_v10  ;;  %v416_v51 = vmul.f32 %v332_v10, %v332_v10  ;;  %v388_v55 = vsel %vm336_vm0, %v332_v10, 0.0  ;;  %v360_v9 = vld [vmem:[%s973_s3] sm:$0x1] }
  0xda   :  { %344 = vst.msk [vmem:[%s972_s2 + $0x38] sm:$0xff] %vm336_vm0, %v314_v12  ;;  %v374_v17 = vsel %vm336_vm0, %v314_v12, 0.0  ;;  %v409_v18 = vmul.f32 %v314_v12, %v314_v12  ;;  %v445_v58 = vsel %vm336_vm0, %v416_v51, 0.0  ;;  %v401_v12 = vld [vmem:[%s974_s4] sm:$0x1] }
  0xdb   :  { %v375_v21 = vadd.f32 %v374_v17, %v373_v15 }
  0xdc   :  { %v431_v24 = vsel %vm336_vm0, %v409_v18, 0.0  ;;  %v284_v32 = vpop.f32.mrf.mxu2 }
  0xdd   :  { %v377_v26 = vadd.f32 %v376_v22, %v375_v21  ;;  %v432_v27 = vadd.f32 %v431_v24, %v430_v20  ;;  %v333_v33 = vpop.f32.mrf.mxu3 }
  0xde   :  { %v334_v7 = vadd.f32 %v333_v33, %v284_v32 }
  0xdf   :  { %v379_v34 = vadd.f32 %v378_v29, %v377_v26  ;;  %v434_v35 = vadd.f32 %v433_v28, %v432_v27 }
  0xe0   :  { %352 = vst.msk [vmem:[%s972_s2 + $0x78] sm:$0xff] %vm336_vm0, %v334_v7  ;;  %v417_v56 = vmul.f32 %v334_v7, %v334_v7  ;;  %v390_v59 = vsel %vm336_vm0, %v334_v7, 0.0 }
  0xe1   :  { %v381_v39 = vadd.f32 %v380_v37, %v379_v34  ;;  %v436_v40 = vadd.f32 %v435_v36, %v434_v35 }
  0xe2   :  { %v447_v62 = vsel %vm336_vm0, %v417_v56, 0.0 }
  0xe3   :  { %v438_v43 = vadd.f32 %v437_v13, %v436_v40  ;;  %v383_v19 = vadd.f32 %v382_v41, %v381_v39 }
  0xe5   :  { %v385_v47 = vadd.f32 %v384_v45, %v383_v19  ;;  %v440_v49 = vadd.f32 %v439_v44, %v438_v43 }
  0xe7   :  { %v387_v52 = vadd.f32 %v386_v25, %v385_v47  ;;  %v442_v53 = vadd.f32 %v441_v50, %v440_v49 }
  0xe9   :  { %v389_v57 = vadd.f32 %v388_v55, %v387_v52  ;;  %v444_v31 = vadd.f32 %v443_v54, %v442_v53 }
  0xeb   :  { %v446_v60 = vadd.f32 %v445_v58, %v444_v31  ;;  %v391_v61 = vadd.f32 %v390_v59, %v389_v57 }
  0xed   :  { %v392_v63 = vrot.slane %v391_v61, 4  ;;  %v448_v48 = vadd.f32 %v447_v62, %v446_v60 }
  0xef   :  { %v393_v0 = vadd.f32 %v392_v63, %v391_v61  ;;  %v449_v1 = vrot.slane %v448_v48, 4 }
  0xf1   :  { %v394_v2 = vrot.slane %v393_v0, 2  ;;  %v450_v3 = vadd.f32 %v449_v1, %v448_v48 }
  0xf3   :  { %v395_v4 = vadd.f32 %v394_v2, %v393_v0  ;;  %v451_v5 = vrot.slane %v450_v3, 2 }
  0xf5   :  { %v396_v6 = vrot.slane %v395_v4, 1  ;;  %v452_v8 = vadd.f32 %v451_v5, %v450_v3 }
  0xf7   :  { %v397_v10 = vadd.f32 %v396_v6, %v395_v4  ;;  %v453_v11 = vrot.slane %v452_v8, 1 }
  0xf9   :  { %v398_v14 = vadd.f32 %v397_v10, %v360_v9  ;;  %v454_v15 = vadd.f32 %v453_v11, %v452_v8 }
  0xfb   :  { %400 = vst.msk [vmem:[%s973_s3] sm:$0x1] %vm357_vm1, %v398_v14  ;;  %v455_v16 = vadd.f32 %v454_v15, %v401_v12 }
  0xfd   :  { %456 = vst.msk [vmem:[%s974_s4] sm:$0x1] %vm357_vm1, %v455_v16 }

// kernel: discriminator_forward.13
= control target key start
LH: loop header
LB: loop body
LE: loop exit
PB: predicated region body
PF: predicated region fallthrough
CT: control target
= control target key end

     0   :  { %vm55_vm3 = vcmask 523264   ;;  %v72_v32 = vlaneseq  ;;  %vm77_vm5 = vcmask 130112   ;;  %vm82_vm6 = vcmask 1041409   ;;  %s153_s0 = inlined_call_operand.vmem [shape: f32[2,16,64], index: 0, kind: input, shape index: {}]   ;;  %s154_s1 = inlined_call_operand.vmem [shape: f32[1,1,64], index: 1, kind: input, shape index: {}]   ;;  %s155_s2 = inlined_call_operand.vmem [shape: f32[1,1,64], index: 2, kind: input, shape index: {}]   ;;  %s156_s3 = inlined_call_operand.vmem [shape: f32[1,16,64], index: 3, kind: input, shape index: {}]   ;;  %s157_s4 = inlined_call_operand.vmem [shape: f32[2,1], index: 4, kind: output, shape index: {}]  }
   0x1   :  { %v19_v0 = vld [vmem:[%s153_s0 + $0x10] sm:$0xff]  ;;  %v95_v1 = vld [vmem:[%s154_s1] ss:$0 sm:$0xff]  ;;  %v20_v5 = vld [vmem:[%s153_s0 + $0x18] sm:$0xff]  ;;  %vm85_vm7 = vcmask 123904   ;;  %vm89_vm8 = vcmask 1024  }
   0x2   :  { %v96_v2 = vld [vmem:[%s155_s2] ss:$0 sm:$0xff]  ;;  %v27_v3 = vmul.f32 %v95_v1, %v19_v0  ;;  %v28_v7 = vmul.f32 %v95_v1, %v20_v5  ;;  %v18_v8 = vld [vmem:[%s153_s0 + $0x8] sm:$0xff]  ;;  %v73_v35 = vand.u32 127, %v72_v32 }
   0x3   :  { %v17_v4 = vld [vmem:[%s153_s0] sm:$0xff]  ;;  %v26_v10 = vmul.f32 %v95_v1, %v18_v8  ;;  %v50_v24 = vld [vmem:[%s156_s3 + $0x8] sm:$0xff] }
   0x4   :  { %v25_v6 = vmul.f32 %v95_v1, %v17_v4  ;;  %v35_v9 = vadd.f32 %v96_v2, %v27_v3  ;;  %v36_v12 = vadd.f32 %v96_v2, %v28_v7  ;;  %v49_v14 = vld [vmem:[%s156_s3] sm:$0xff]  ;;  %v75_v36 = vadd.s32 4294967288, %v73_v35 }
   0x5   :  { %v34_v15 = vadd.f32 %v96_v2, %v26_v10 }
   0x6   :  { %v33_v11 = vadd.f32 %v96_v2, %v25_v6  ;;  %vm39_vm0 = vcmp.gt.f32.partialorder %v35_v9, 0.0  ;;  %v43_v13 = vmul.f32 0.2, %v35_v9  ;;  %vm40_vm2 = vcmp.gt.f32.partialorder %v36_v12, 0.0 }
   0x7   :  { %v44_v17 = vmul.f32 0.2, %v36_v12  ;;  %vm38_vm4 = vcmp.gt.f32.partialorder %v34_v15, 0.0  ;;  %v42_v19 = vmul.f32 0.2, %v34_v15 }
   0x8   :  { %vm37_vm1 = vcmp.gt.f32.partialorder %v33_v11, 0.0  ;;  %v41_v16 = vmul.f32 0.2, %v33_v11  ;;  %v47_v18 = vsel %vm39_vm0, %v35_v9, %v43_v13 }
   0x9   :  { %v53_v20 = vmul.f32 %v49_v14, %v47_v18  ;;  %v48_v23 = vsel %vm40_vm2, %v36_v12, %v44_v17  ;;  %v46_v26 = vsel %vm38_vm4, %v34_v15, %v42_v19 }
   0xa   :  { %v45_v21 = vsel %vm37_vm1, %v33_v11, %v41_v16  ;;  %v54_v28 = vmul.f32 %v50_v24, %v48_v23  ;;  %v52_v29 = vmul.f32 %v50_v24, %v46_v26 }
   0xb   :  { %v51_v22 = vmul.f32 %v49_v14, %v45_v21  ;;  %v62_v25 = vsel %vm55_vm3, %v53_v20, 0.0 }
   0xc   :  { %63 = vadd.xlane.f32.xlu1 %v62_v25  ;;  %v65_v30 = vsel %vm55_vm3, %v54_v28, 0.0  ;;  %v59_v31 = vsel %vm55_vm3, %v52_v29, 0.0 }
   0xd   :  { %v56_v27 = vsel %vm55_vm3, %v51_v22, 0.0 }
   0xe   :  { %57 = vadd.xlane.f32.xlu0 %v56_v27 }
  0x14   :  { %66 = vadd.xlane.f32.xlu1 %v65_v30 }
  0x16   :  { %60 = vadd.xlane.f32.xlu0 %v59_v31 }
  0x7f   :  { %v64_v33 = vpop.xlane.xlu1 %63 }
  0x80   :  { %v79_v38 = vperm.slane %v64_v33, %v73_v35 }
  0x81   :  { %v58_v34 = vpop.xlane.xlu0 %57 }
  0x82   :  { %v74_v41 = vperm.slane %v58_v34, %v73_v35 }
  0x87   :  { %v67_v37 = vpop.xlane.xlu1 %66 }
  0x88   :  { %v80_v39 = vperm.slane %v67_v37, %v75_v36 }
  0x89   :  { %v61_v40 = vpop.xlane.xlu0 %60 }
  0x8a   :  { %v76_v42 = vperm.slane %v61_v40, %v75_v36  ;;  %v81_v43 = vsel %vm77_vm5, %v80_v39, %v79_v38 }
  0x8c   :  { %v78_v44 = vsel %vm77_vm5, %v76_v42, %v74_v41 }
  0x8d   :  { %v83_v45 = vsel %vm82_vm6, %v81_v43, %v78_v44 }
  0x8e   :  { %v86_v46 = vsel %vm85_vm7, %v83_v45, 0.0 }
  0x8f   :  { %87 = vadd.xlane.f32.xlu2 %v86_v46 }
 0x102   :  { %v88_v47 = vpop.xlane.xlu2 %87 }
 0x103   :  { %90 = vst.msk [vmem:[%s157_s4] sm:$0x3] %vm89_vm8, %v88_v47 }

// kernel: discriminator_forward.12
= control target key start
LH: loop header
LB: loop body
LE: loop exit
PB: predicated region body
PF: predicated region fallthrough
CT: control target
= control target key end

     0   :  { %vm403_vm0 = vcmask 516096   ;;  %v656_v59 = vmov 0.0   ;;  %vm394_vm1 = vcmask 523264   ;;  %s872_s1 = inlined_call_operand.vmem [shape: bf16[512,64], index: 1, kind: input, shape index: {}]   ;;  %s873_s0 = inlined_call_operand.vmem [shape: bf16[32,512], index: 0, kind: input, shape index: {}]   ;;  %s874_s3 = inlined_call_operand.vmem [shape: f32[1,64], index: 3, kind: output, shape index: {1}]   ;;  %s875_s4 = inlined_call_operand.vmem [shape: f32[1,64], index: 4, kind: output, shape index: {2}]   ;;  %s876_s2 = inlined_call_operand.vmem [shape: f32[32,64], index: 2, kind: output, shape index: {0}]  }
   0x1   :  { %v630_v0 = vld [vmem:[%s872_s1 + $0x38] sm:$0xff]  ;;  %v629_v4 = vld [vmem:[%s872_s1 + $0x30] sm:$0xff]  ;;  %v628_v8 = vld [vmem:[%s872_s1 + $0x28] sm:$0xff]  ;;  %404 = vst.msk [vmem:[%s874_s3] sm:$0x1] %vm403_vm0, %v656_v59 }
   0x2   :  { %v638_v1 = vld [vmem:[%s872_s1 + $0x78] sm:$0xff]  ;;  %318 = vmatpush.bf16.msra.mxu0 %v630_v0  ;;  %v637_v5 = vld [vmem:[%s872_s1 + $0x70] sm:$0xff]  ;;  %v636_v9 = vld [vmem:[%s872_s1 + $0x68] sm:$0xff]  ;;  %405 = vst.msk [vmem:[%s875_s4] sm:$0x1] %vm403_vm0, %v656_v59 }
   0x3   :  { %v646_v2 = vld [vmem:[%s872_s1 + $0xb8] sm:$0xff]  ;;  %337 = vmatpush.bf16.msra.mxu1 %v638_v1  ;;  %v645_v6 = vld [vmem:[%s872_s1 + $0xb0] sm:$0xff]  ;;  %v644_v10 = vld [vmem:[%s872_s1 + $0xa8] sm:$0xff] }
   0x4   :  { %v654_v3 = vld [vmem:[%s872_s1 + $0xf8] sm:$0xff]  ;;  %356 = vmatpush.bf16.msra.mxu2 %v646_v2  ;;  %v653_v7 = vld [vmem:[%s872_s1 + $0xf0] sm:$0xff]  ;;  %v652_v11 = vld [vmem:[%s872_s1 + $0xe8] sm:$0xff] }
   0x5   :  { %375 = vmatpush.bf16.msra.mxu3 %v654_v3  ;;  %v627_v12 = vld [vmem:[%s872_s1 + $0x20] sm:$0xff]  ;;  %v626_v16 = vld [vmem:[%s872_s1 + $0x18] sm:$0xff]  ;;  %v625_v20 = vld [vmem:[%s872_s1 + $0x10] sm:$0xff] }
   0x6   :  { %319 = vmatpush.bf16.msra.mxu0 %v629_v4  ;;  %v635_v13 = vld [vmem:[%s872_s1 + $0x60] sm:$0xff]  ;;  %v634_v17 = vld [vmem:[%s872_s1 + $0x58] sm:$0xff]  ;;  %v633_v21 = vld [vmem:[%s872_s1 + $0x50] sm:$0xff] }
   0x7   :  { %338 = vmatpush.bf16.msra.mxu1 %v637_v5  ;;  %v643_v14 = vld [vmem:[%s872_s1 + $0xa0] sm:$0xff]  ;;  %v642_v18 = vld [vmem:[%s872_s1 + $0x98] sm:$0xff]  ;;  %v641_v22 = vld [vmem:[%s872_s1 + $0x90] sm:$0xff] }
   0x8   :  { %357 = vmatpush.bf16.msra.mxu2 %v645_v6  ;;  %v651_v15 = vld [vmem:[%s872_s1 + $0xe0] sm:$0xff]  ;;  %v650_v19 = vld [vmem:[%s872_s1 + $0xd8] sm:$0xff]  ;;  %v649_v23 = vld [vmem:[%s872_s1 + $0xd0] sm:$0xff] }
   0x9   :  { %376 = vmatpush.bf16.msra.mxu3 %v653_v7  ;;  %v624_v24 = vld [vmem:[%s872_s1 + $0x8] sm:$0xff]  ;;  %v623_v28 = vld [vmem:[%s872_s1] sm:$0xff]  ;;  %v617_v33 = vld [vmem:[%s873_s0 + $0xc] sm:$0xf0] }
   0xa   :  { %320 = vmatpush.bf16.msra.mxu0 %v628_v8  ;;  %v632_v25 = vld [vmem:[%s872_s1 + $0x48] sm:$0xff]  ;;  %v631_v29 = vld [vmem:[%s872_s1 + $0x40] sm:$0xff]  ;;  %v459_v35 = vld [vmem:[%s873_s0 + $0x10] sm:$0xf0] }
   0xb   :  { %339 = vmatpush.bf16.msra.mxu1 %v636_v9  ;;  %v640_v26 = vld [vmem:[%s872_s1 + $0x88] sm:$0xff]  ;;  %v639_v30 = vld [vmem:[%s872_s1 + $0x80] sm:$0xff]  ;;  %v618_v37 = vld [vmem:[%s873_s0 + $0x14] sm:$0xf0] }
   0xc   :  { %358 = vmatpush.bf16.msra.mxu2 %v644_v10  ;;  %v648_v27 = vld [vmem:[%s872_s1 + $0xc8] sm:$0xff]  ;;  %v647_v31 = vld [vmem:[%s872_s1 + $0xc0] sm:$0xff]  ;;  %v467_v39 = vld [vmem:[%s873_s0 + $0x18] sm:$0xf0] }
   0xd   :  { %377 = vmatpush.bf16.msra.mxu3 %v652_v11  ;;  %v457_v32 = vld [vmem:[%s873_s0] sm:$0xf]  ;;  %v615_v34 = vld [vmem:[%s873_s0 + $0x4] sm:$0xf]  ;;  %v465_v36 = vld [vmem:[%s873_s0 + $0x8] sm:$0xf] }
   0xe   :  { %321 = vmatpush.bf16.msra.mxu0 %v627_v12  ;;  %v616_v38 = vld [vmem:[%s873_s0 + $0xc] sm:$0xf]  ;;  %v458_v40 = vor.u32 %v617_v33, %v457_v32  ;;  %v462_v41 = vor.u32 %v615_v34, %v459_v35  ;;  %v466_v42 = vor.u32 %v618_v37, %v465_v36  ;;  %v473_v44 = vld [vmem:[%s873_s0 + $0x20] sm:$0xf]  ;;  %v621_v45 = vld [vmem:[%s873_s0 + $0x2c] sm:$0xf0] }
   0xf   :  { %340 = vmatpush.bf16.msra.mxu1 %v635_v13  ;;  %v470_v43 = vor.u32 %v616_v38, %v467_v39  ;;  %v619_v46 = vld [vmem:[%s873_s0 + $0x24] sm:$0xf]  ;;  %v475_v47 = vld [vmem:[%s873_s0 + $0x30] sm:$0xf0]  ;;  %v481_v48 = vld [vmem:[%s873_s0 + $0x28] sm:$0xf]  ;;  %v474_v52 = vor.u32 %v621_v45, %v473_v44 }
  0x10   :  { %359 = vmatpush.bf16.msra.mxu2 %v643_v14  ;;  %v622_v49 = vld [vmem:[%s873_s0 + $0x34] sm:$0xf0]  ;;  %v620_v50 = vld [vmem:[%s873_s0 + $0x2c] sm:$0xf]  ;;  %v483_v51 = vld [vmem:[%s873_s0 + $0x38] sm:$0xf0]  ;;  %v478_v53 = vor.u32 %v619_v46, %v475_v47 }
  0x11   :  { %378 = vmatpush.bf16.msra.mxu3 %v651_v15  ;;  %v482_v54 = vor.u32 %v622_v49, %v481_v48  ;;  %v486_v55 = vor.u32 %v620_v50, %v483_v51  ;;  %v406_v48 = vld [vmem:[%s874_s3] sm:$0x1] }
  0x12   :  { %322 = vmatpush.bf16.msra.mxu0 %v626_v16  ;;  %v423_v51 = vld [vmem:[%s875_s4] sm:$0x1] }
  0x13   :  { %341 = vmatpush.bf16.msra.mxu1 %v634_v17 }
  0x14   :  { %360 = vmatpush.bf16.msra.mxu2 %v642_v18 }
  0x15   :  { %379 = vmatpush.bf16.msra.mxu3 %v650_v19 }
  0x16   :  { %323 = vmatpush.bf16.msra.mxu0 %v625_v20 }
  0x17   :  { %342 = vmatpush.bf16.msra.mxu1 %v633_v21 }
  0x18   :  { %361 = vmatpush.bf16.msra.mxu2 %v641_v22 }
  0x19   :  { %380 = vmatpush.bf16.msra.mxu3 %v649_v23 }
  0x1a   :  { %324 = vmatpush.bf16.msra.mxu0 %v624_v24 }
  0x1b   :  { %343 = vmatpush.bf16.msra.mxu1 %v632_v25 }
  0x1c   :  { %362 = vmatpush.bf16.msra.mxu2 %v640_v26 }
  0x1d   :  { %381 = vmatpush.bf16.msra.mxu3 %v648_v27 }
  0x1e   :  { %325 = vmatpush.bf16.msra.mxu0 %v623_v28 }
  0x1f   :  { %344 = vmatpush.bf16.msra.mxu1 %v631_v29 }
  0x20   :  { %363 = vmatpush.bf16.msra.mxu2 %v639_v30 }
  0x21   :  { %382 = vmatpush.bf16.msra.mxu3 %v647_v31  ;;  %326 = vmatmul.bf16.vlgmr.msra.gmra.mxu0 %v458_v40 }
  0x22   :  { %345 = vmatmul.bf16.vlgmr.msra.gmra.mxu1 %v462_v41 }
  0x23   :  { %364 = vmatmul.bf16.vlgmr.msra.gmra.mxu2 %v466_v42 }
  0x24   :  { %383 = vmatmul.bf16.vlgmr.msra.gmra.mxu3 %v470_v43 }
  0x31   :  { %331 = vmatmul.bf16.gmra.mxu0 %v474_v52 }
  0x32   :  { %350 = vmatmul.bf16.gmra.mxu1 %v478_v53 }
  0x33   :  { %369 = vmatmul.bf16.gmra.mxu2 %v482_v54 }
  0x34   :  { %388 = vmatmul.bf16.gmra.mxu3 %v486_v55 }
  0x9e   :  { %v327_v56 = vpop.f32.mrf.mxu0 }
  0x9f   :  { %v346_v57 = vpop.f32.mrf.mxu1 }
  0xa0   :  { %v347_v58 = vadd.f32 %v346_v57, %v327_v56 }
  0xa6   :  { %v365_v60 = vpop.f32.mrf.mxu2  ;;  %v329_v63 = vpop.f32.mrf.mxu0 }
  0xa7   :  { %v384_v61 = vpop.f32.mrf.mxu3  ;;  %v366_v62 = vadd.f32 %v365_v60, %v347_v58  ;;  %v348_v0 = vpop.f32.mrf.mxu1 }
  0xa8   :  { %v349_v2 = vadd.f32 %v348_v0, %v329_v63 }
  0xa9   :  { %v385_v1 = vadd.f32 %v384_v61, %v366_v62 }
  0xab   :  { %395 = vst.msk [vmem:[%s876_s2] sm:$0xff] %vm394_vm1, %v385_v1  ;;  %v424_v17 = vmul.f32 %v385_v1, %v385_v1  ;;  %v407_v22 = vsel %vm394_vm1, %v385_v1, 0.0 }
  0xad   :  { %v428_v28 = vsel %vm394_vm1, %v424_v17, 0.0 }
  0xae   :  { %v367_v3 = vpop.f32.mrf.mxu2  ;;  %v332_v6 = vpop.f32.mrf.mxu0 }
  0xaf   :  { %v386_v4 = vpop.f32.mrf.mxu3  ;;  %v368_v5 = vadd.f32 %v367_v3, %v349_v2  ;;  %v351_v7 = vpop.f32.mrf.mxu1 }
  0xb0   :  { %v352_v9 = vadd.f32 %v351_v7, %v332_v6 }
  0xb1   :  { %v387_v8 = vadd.f32 %v386_v4, %v368_v5 }
  0xb3   :  { %396 = vst.msk [vmem:[%s876_s2 + $0x8] sm:$0xff] %vm394_vm1, %v387_v8  ;;  %v425_v16 = vmul.f32 %v387_v8, %v387_v8  ;;  %v408_v18 = vsel %vm394_vm1, %v387_v8, 0.0 }
  0xb4   :  { %v409_v26 = vadd.f32 %v408_v18, %v407_v22 }
  0xb5   :  { %v429_v23 = vsel %vm394_vm1, %v425_v16, 0.0 }
  0xb6   :  { %v370_v10 = vpop.f32.mrf.mxu2  ;;  %v334_v14 = vpop.f32.mrf.mxu0  ;;  %v430_v31 = vadd.f32 %v429_v23, %v428_v28 }
  0xb7   :  { %v389_v11 = vpop.f32.mrf.mxu3  ;;  %v371_v12 = vadd.f32 %v370_v10, %v352_v9  ;;  %v353_v15 = vpop.f32.mrf.mxu1 }
  0xb8   :  { %v354_v20 = vadd.f32 %v353_v15, %v334_v14 }
  0xb9   :  { %v390_v13 = vadd.f32 %v389_v11, %v371_v12 }
  0xbb   :  { %397 = vst.msk [vmem:[%s876_s2 + $0x10] sm:$0xff] %vm394_vm1, %v390_v13  ;;  %v426_v19 = vmul.f32 %v390_v13, %v390_v13  ;;  %v410_v24 = vsel %vm394_vm1, %v390_v13, 0.0 }
  0xbc   :  { %v411_v32 = vadd.f32 %v410_v24, %v409_v26 }
  0xbd   :  { %v431_v29 = vsel %vm394_vm1, %v426_v19, 0.0 }
  0xbe   :  { %v372_v21 = vpop.f32.mrf.mxu2  ;;  %v432_v35 = vadd.f32 %v431_v29, %v430_v31 }
  0xbf   :  { %v373_v25 = vadd.f32 %v372_v21, %v354_v20  ;;  %v391_v27 = vpop.f32.mrf.mxu3 }
  0xc1   :  { %v392_v30 = vadd.f32 %v391_v27, %v373_v25 }
  0xc3   :  { %398 = vst.msk [vmem:[%s876_s2 + $0x18] sm:$0xff] %vm394_vm1, %v392_v30  ;;  %v412_v33 = vsel %vm394_vm1, %v392_v30, 0.0  ;;  %v427_v34 = vmul.f32 %v392_v30, %v392_v30 }
  0xc4   :  { %v413_v36 = vadd.f32 %v412_v33, %v411_v32 }
  0xc5   :  { %v433_v37 = vsel %vm394_vm1, %v427_v34, 0.0 }
  0xc6   :  { %v414_v38 = vrot.slane %v413_v36, 4  ;;  %v434_v39 = vadd.f32 %v433_v37, %v432_v35 }
  0xc8   :  { %v415_v40 = vadd.f32 %v414_v38, %v413_v36  ;;  %v435_v41 = vrot.slane %v434_v39, 4 }
  0xca   :  { %v416_v42 = vrot.slane %v415_v40, 2  ;;  %v436_v43 = vadd.f32 %v435_v41, %v434_v39 }
  0xcc   :  { %v417_v44 = vadd.f32 %v416_v42, %v415_v40  ;;  %v437_v45 = vrot.slane %v436_v43, 2 }
  0xce   :  { %v418_v46 = vrot.slane %v417_v44, 1  ;;  %v438_v47 = vadd.f32 %v437_v45, %v436_v43 }
  0xd0   :  { %v419_v49 = vadd.f32 %v418_v46, %v417_v44  ;;  %v439_v50 = vrot.slane %v438_v47, 1 }
  0xd2   :  { %v420_v52 = vadd.f32 %v419_v49, %v406_v48  ;;  %v440_v53 = vadd.f32 %v439_v50, %v438_v47 }
  0xd4   :  { %422 = vst.msk [vmem:[%s874_s3] sm:$0x1] %vm403_vm0, %v420_v52  ;;  %v441_v54 = vadd.f32 %v440_v53, %v423_v51 }
  0xd6   :  { %442 = vst.msk [vmem:[%s875_s4] sm:$0x1] %vm403_vm0, %v441_v54 }

</bundles_post_ra>
